<compile_context>
chip_gen: v6e
topology: v6e:2x2x1
jax: 0.10.0
libtpu: 0.0.40
codegen_flags: <defaults>
</compile_context>

<pallas_src>
import functools

import numpy as np
import jax
import jax.numpy as jnp
from jax.experimental import pallas as pl
from jax.experimental.pallas import tpu as pltpu


# ----------------------------------------------------------------------------
# Device-dependent knobs
# ----------------------------------------------------------------------------
def _detect_mxu_dtype():
    try:
        kind = jax.devices()[0].device_kind.lower()
    except Exception:
        return jnp.float32
    if any(tag in kind for tag in ("v6", "v7", "7x")):
        return jnp.bfloat16        # v6e / v7x: bf16 MXU operands, f32 accumulate
    return jnp.float32             # v5e & older: keep f32 (no bf16 VPU/EUP path)


_MXU_DTYPE = _detect_mxu_dtype()
_TILE_M = 256 if _MXU_DTYPE == jnp.bfloat16 else 128


def _pick_tile_m(m, want):
    return m if m <= want else want


def _pick_tile_n(nout, max_tn=1024):
    if nout <= max_tn:
        return nout
    tn = max_tn - (max_tn % 128)
    while tn >= 128:
        if nout % tn == 0:
            return tn
        tn -= 128
    return nout


def _pick_window_block(batch, ww2, s2, c, budget_bytes=4 << 20):
    """#windows per attention grid step: a multiple of Wn*Wn that divides B*Wn*Wn."""
    per_win = s2 * (4 * c + 2 * s2) * 4          # q,k,v,out rows + score temps (f32)
    max_wins = max(ww2, budget_bytes // max(per_win, 1))
    for g in range(batch, 0, -1):
        if batch % g == 0 and g * ww2 <= max_wins:
            return g * ww2
    return ww2


def _layernorm_f32(x, gamma, beta):
    mu = jnp.mean(x, axis=-1, keepdims=True)
    var = jnp.mean(jnp.square(x - mu), axis=-1, keepdims=True)
    return (x - mu) * jax.lax.rsqrt(var + 1e-5) * gamma + beta


def _gelu_exact(y):
    # exact erf-based GELU (torch nn.GELU default), computed in f32
    return 0.5 * y * (1.0 + jax.lax.erf(y * 0.7071067811865476))


# ----------------------------------------------------------------------------
# Pallas kernels
# ----------------------------------------------------------------------------
def _ln_linear_kernel(x_ref, g_ref, b_ref, w_ref, bias_ref, o_ref, *, act, mxu_dtype):
    """y = LayerNorm(x) @ w.T + bias  (torch Linear convention: w is (out, in))."""
    x = x_ref[...].astype(jnp.float32)
    xn = _layernorm_f32(x, g_ref[...], b_ref[...])
    y = jax.lax.dot_general(xn.astype(mxu_dtype), w_ref[...].astype(mxu_dtype),
                            (((1,), (1,)), ((), ())),
                            preferred_element_type=jnp.float32)
    y = y + bias_ref[...]
    if act == "gelu":
        y = _gelu_exact(y)
    o_ref[...] = y.astype(o_ref.dtype)


def _linear_res_kernel(x_ref, w_ref, bias_ref, r_ref, o_ref, *, mxu_dtype):
    """y = x @ w.T + bias + residual."""
    y = jax.lax.dot_general(x_ref[...].astype(mxu_dtype), w_ref[...].astype(mxu_dtype),
                            (((1,), (1,)), ((), ())),
                            preferred_element_type=jnp.float32)
    o_ref[...] = (y + bias_ref[...] + r_ref[...]).astype(o_ref.dtype)


def _mlp_fused_kernel(x_ref, g_ref, b_ref, w1_ref, b1_ref, w2_ref, b2_ref, o_ref,
                      *, mxu_dtype):
    """y = x + fc2(GELU(fc1(LayerNorm(x)))); the (tm, 4C) hidden stays in VMEM."""
    x = x_ref[...].astype(jnp.float32)
    xn = _layernorm_f32(x, g_ref[...], b_ref[...])
    h = jax.lax.dot_general(xn.astype(mxu_dtype), w1_ref[...].astype(mxu_dtype),
                            (((1,), (1,)), ((), ())),
                            preferred_element_type=jnp.float32)
    h = _gelu_exact(h + b1_ref[...])
    y = jax.lax.dot_general(h.astype(mxu_dtype), w2_ref[...].astype(mxu_dtype),
                            (((1,), (1,)), ((), ())),
                            preferred_element_type=jnp.float32)
    o_ref[...] = (y + b2_ref[...] + x).astype(o_ref.dtype)


def _window_attn_kernel(q_ref, k_ref, v_ref, bias_ref, o_ref, *,
                        scale, num_heads, mxu_dtype):
    """Batched window attention; heads fused in the channel (lane) dim."""
    _, _, C = q_ref.shape
    E = C // num_heads
    q = q_ref[...]
    k = k_ref[...]
    v = v_ref[...]
    bias = bias_ref[...]            # (wblk, S, S) f32; rel-pos (+ -inf shift mask)
    head_outs = []
    for h in range(num_heads):
        lo, hi = h * E, (h + 1) * E
        qh = q[:, :, lo:hi].astype(mxu_dtype)
        kh = k[:, :, lo:hi].astype(mxu_dtype)
        vh = v[:, :, lo:hi].astype(mxu_dtype)
        s = jnp.einsum("bqd,bkd->bqk", qh, kh,
                       preferred_element_type=jnp.float32)
        s = s * scale + bias
        m = jnp.max(s, axis=-1, keepdims=True)
        p = jnp.exp(s - m)
        denom = jnp.sum(p, axis=-1, keepdims=True)
        p = p * pl.reciprocal(denom, approx=True)
        oh = jnp.einsum("bqk,bkd->bqd", p.astype(mxu_dtype), vh,
                        preferred_element_type=jnp.float32)
        head_outs.append(oh)
    o_ref[...] = jnp.concatenate(head_outs, axis=-1).astype(o_ref.dtype)


# ----------------------------------------------------------------------------
# Kernel wrappers
# ----------------------------------------------------------------------------
def ln_linear(x2d, gamma, beta, w, b, act="none"):
    M, K = x2d.shape
    Nout = w.shape[0]
    tm = _pick_tile_m(M, _TILE_M)
    tn = _pick_tile_n(Nout)
    Mp = ((M + tm - 1) // tm) * tm
    xp = x2d if Mp == M else jnp.pad(x2d, ((0, Mp - M), (0, 0)))
    out = pl.pallas_call(
        functools.partial(_ln_linear_kernel, act=act, mxu_dtype=_MXU_DTYPE),
        out_shape=jax.ShapeDtypeStruct((Mp, Nout), x2d.dtype),
        grid=(Mp // tm, Nout // tn),
        in_specs=[pl.BlockSpec((tm, K), lambda i, j: (i, 0)),
                  pl.BlockSpec((1, K), lambda i, j: (0, 0)),
                  pl.BlockSpec((1, K), lambda i, j: (0, 0)),
                  pl.BlockSpec((tn, K), lambda i, j: (j, 0)),
                  pl.BlockSpec((1, tn), lambda i, j: (0, j))],
        out_specs=pl.BlockSpec((tm, tn), lambda i, j: (i, j)),
        compiler_params=pltpu.CompilerParams(
            dimension_semantics=("parallel", "parallel")),
    )(xp, gamma.reshape(1, K), beta.reshape(1, K), w, b.reshape(1, Nout))
    return out if Mp == M else out[:M]


def linear_residual(x2d, w, b, res2d):
    M, K = x2d.shape
    Nout = w.shape[0]
    tm = _pick_tile_m(M, _TILE_M)
    tn = _pick_tile_n(Nout)
    Mp = ((M + tm - 1) // tm) * tm
    if Mp != M:
        x2d = jnp.pad(x2d, ((0, Mp - M), (0, 0)))
        res2d = jnp.pad(res2d, ((0, Mp - M), (0, 0)))
    out = pl.pallas_call(
        functools.partial(_linear_res_kernel, mxu_dtype=_MXU_DTYPE),
        out_shape=jax.ShapeDtypeStruct((Mp, Nout), x2d.dtype),
        grid=(Mp // tm, Nout // tn),
        in_specs=[pl.BlockSpec((tm, K), lambda i, j: (i, 0)),
                  pl.BlockSpec((tn, K), lambda i, j: (j, 0)),
                  pl.BlockSpec((1, tn), lambda i, j: (0, j)),
                  pl.BlockSpec((tm, tn), lambda i, j: (i, j))],
        out_specs=pl.BlockSpec((tm, tn), lambda i, j: (i, j)),
        compiler_params=pltpu.CompilerParams(
            dimension_semantics=("parallel", "parallel")),
    )(x2d, w, b.reshape(1, Nout), res2d)
    return out if Mp == M else out[:M]


def mlp_fused(x2d, gamma, beta, w1, b1, w2, b2):
    """Whole MLP sub-block in one kernel; weights stay resident across the grid."""
    M, C = x2d.shape
    Hd = w1.shape[0]
    tm = _pick_tile_m(M, _TILE_M)
    Mp = ((M + tm - 1) // tm) * tm
    xp = x2d if Mp == M else jnp.pad(x2d, ((0, Mp - M), (0, 0)))
    out = pl.pallas_call(
        functools.partial(_mlp_fused_kernel, mxu_dtype=_MXU_DTYPE),
        out_shape=jax.ShapeDtypeStruct((Mp, C), x2d.dtype),
        grid=(Mp // tm,),
        in_specs=[pl.BlockSpec((tm, C), lambda i: (i, 0)),
                  pl.BlockSpec((1, C), lambda i: (0, 0)),
                  pl.BlockSpec((1, C), lambda i: (0, 0)),
                  pl.BlockSpec((Hd, C), lambda i: (0, 0)),
                  pl.BlockSpec((1, Hd), lambda i: (0, 0)),
                  pl.BlockSpec((C, Hd), lambda i: (0, 0)),
                  pl.BlockSpec((1, C), lambda i: (0, 0))],
        out_specs=pl.BlockSpec((tm, C), lambda i: (i, 0)),
        compiler_params=pltpu.CompilerParams(
            dimension_semantics=("parallel",)),
    )(xp, gamma.reshape(1, C), beta.reshape(1, C),
      w1, b1.reshape(1, Hd), w2, b2.reshape(1, C))
    return out if Mp == M else out[:M]


def window_attention(q, k, v, bias_blk, *, scale, num_heads, wblk):
    NWS, S, C = q.shape
    return pl.pallas_call(
        functools.partial(_window_attn_kernel, scale=float(scale),
                          num_heads=num_heads, mxu_dtype=_MXU_DTYPE),
        out_shape=jax.ShapeDtypeStruct((NWS, S, C), q.dtype),
        grid=(NWS // wblk,),
        in_specs=[pl.BlockSpec((wblk, S, C), lambda i: (i, 0, 0)),
                  pl.BlockSpec((wblk, S, C), lambda i: (i, 0, 0)),
                  pl.BlockSpec((wblk, S, C), lambda i: (i, 0, 0)),
                  pl.BlockSpec((wblk, S, S), lambda i: (0, 0, 0))],   # resident
        out_specs=pl.BlockSpec((wblk, S, C), lambda i: (i, 0, 0)),
        compiler_params=pltpu.CompilerParams(
            dimension_semantics=("parallel",)),
    )(q, k, v, bias_blk)


# ----------------------------------------------------------------------------
# Model glue (matches the PyTorch einops/rearrange semantics exactly)
# ----------------------------------------------------------------------------
def shifted_window_msa(x, p, ln_g, ln_b, *, num_heads, window_size, shifted):
    B, N, C = x.shape
    side = int(round(np.sqrt(N)))
    ws = window_size
    Wn = side // ws
    s2 = ws * ws
    Hh = num_heads
    E = C // Hh
    ww2 = Wn * Wn

    x2d = x.reshape(B * N, C)

    # QKV projection fused with pre-LayerNorm.  The output channels are
    # permuted (weight-level, once) from torch's interleaved (e,H,k) layout to
    # contiguous (k, H, e) slabs, so q/k/v per head are contiguous downstream.
    perm = np.empty(3 * C, dtype=np.int32)
    for kk in range(3):
        for hh in range(Hh):
            for ee in range(E):
                perm[kk * C + hh * E + ee] = (ee * Hh + hh) * 3 + kk
    w1p = p["w1"][perm, :]
    b1p = p["b1"][perm]
    qkv = ln_linear(x2d, ln_g, ln_b, w1p, b1p)           # (B*N, 3C)

    # Cyclic shift + window partition (pure data movement, XLA glue).
    y = qkv.reshape(B, side, side, 3 * C)
    if shifted:
        sh = (-ws) // 2                                   # == torch: -ws // 2
        y = jnp.roll(y, (sh, sh), axis=(1, 2))
    y = y.reshape(B, Wn, ws, Wn, ws, 3 * C)
    y = y.transpose(0, 1, 3, 2, 4, 5).reshape(B * ww2, s2, 3 * C)
    q = y[:, :, :C]
    k = y[:, :, C:2 * C]
    v = y[:, :, 2 * C:]

    # Relative-position bias (+ shift mask): one (s2,s2) tile per window
    # position, (Wn*Wn, s2, s2) total — never broadcast over batch or heads.
    idx = np.array([[a, b] for a in range(ws) for b in range(ws)])
    rel = idx[None, :, :] - idx[:, None, :] + ws - 1
    rel_bias = p["pos"][rel[:, :, 0], rel[:, :, 1]].astype(jnp.float32)
    bias = jnp.broadcast_to(rel_bias, (Wn, Wn, s2, s2))
    if shifted:
        blk = ws * (ws // 2)
        rm = np.zeros((s2, s2), np.float32)
        rm[-blk:, : s2 - blk] = -np.inf
        rm[: s2 - blk, -blk:] = -np.inf
        cm = rm.reshape(ws, ws, ws, ws).transpose(1, 0, 3, 2).reshape(s2, s2)
        mask = np.zeros((Wn, Wn, s2, s2), np.float32)
        mask[-1, :] += rm       # last row of windows
        mask[:, -1] += cm       # last column of windows (corner gets both)
        bias = bias + jnp.asarray(mask)
    bias = bias.reshape(ww2, s2, s2)

    # Batched window attention (heads fused in the channel dim).
    wblk = _pick_window_block(B, ww2, s2, C)
    bias_blk = jnp.tile(bias, (wblk // ww2, 1, 1))        # (wblk, s2, s2)
    o = window_attention(q, k, v, bias_blk,
                         scale=1.0 / np.sqrt(C / Hh),
                         num_heads=Hh, wblk=wblk)          # (B*ww2, s2, C)

    # Undo window partition (no reverse roll — matches the torch reference).
    o = o.reshape(B, Wn, Wn, ws, ws, C)
    o = o.transpose(0, 1, 3, 2, 4, 5).reshape(B * N, C)

    # Output projection fused with the residual add: x + MSA(ln(x)).
    return linear_residual(o, p["w2"], p["b2"], x2d).reshape(B, N, C)


def mlp_block(x, p, ln_g, ln_b):
    B, N, C = x.shape
    x2d = x.reshape(B * N, C)
    Hd = p["w1"].shape[0]
    weight_bytes = 2 * Hd * C * 4
    if weight_bytes <= (20 << 20):
        # Fully fused LN -> fc1 -> GELU -> fc2 -> +residual; hidden never hits HBM.
        y = mlp_fused(x2d, ln_g, ln_b, p["w1"], p["b1"], p["w2"], p["b2"])
    else:
        h = ln_linear(x2d, ln_g, ln_b, p["w1"], p["b1"], act="gelu")
        y = linear_residual(h, p["w2"], p["b2"], x2d)
    return y.reshape(B, N, C)


@functools.partial(jax.jit, static_argnames=("num_heads", "window_size"))
def swin_encoder(x, params, *, num_heads, window_size):
    ln_g, ln_b = params["ln_g"], params["ln_b"]
    x = shifted_window_msa(x, params["wmsa"], ln_g, ln_b,
                           num_heads=num_heads, window_size=window_size,
                           shifted=False)
    x = mlp_block(x, params["mlp"], ln_g, ln_b)
    x = shifted_window_msa(x, params["swmsa"], ln_g, ln_b,
                           num_heads=num_heads, window_size=window_size,
                           shifted=True)
    x = mlp_block(x, params["mlp"], ln_g, ln_b)   # same shared MLP / LN, as in torch
    return x


# ----------------------------------------------------------------------------
# Deterministic parameter init (synthetic; shapes mirror the torch __init__)
# ----------------------------------------------------------------------------
def init_params(key, emb_size, window_size):
    keys = jax.random.split(key, 16)
    kit = iter(keys)

    def lin(out_f, in_f):
        w = jax.random.normal(next(kit), (out_f, in_f), jnp.float32) * 0.02
        b = jax.random.normal(next(kit), (out_f,), jnp.float32) * 0.02
        return w, b

    def msa():
        w1, b1 = lin(3 * emb_size, emb_size)
        w2, b2 = lin(emb_size, emb_size)
        pos = jax.random.normal(next(kit),
                                (2 * window_size - 1, 2 * window_size - 1),
                                jnp.float32)
        return {"w1": w1, "b1": b1, "w2": w2, "b2": b2, "pos": pos}

    params = {
        "wmsa": msa(),
        "swmsa": msa(),
        "ln_g": jnp.ones((emb_size,), jnp.float32),
        "ln_b": jnp.zeros((emb_size,), jnp.float32),
    }
    mw1, mb1 = lin(4 * emb_size, emb_size)
    mw2, mb2 = lin(emb_size, 4 * emb_size)
    params["mlp"] = {"w1": mw1, "b1": mb1, "w2": mw2, "b2": mb2}
    return params


if __name__ == "__main__":
    B = 2
    emb_size = 32
    num_heads = 4
    window_size = 4
    side = 8                 # 8x8 tokens -> 2x2 windows of 4x4
    N = side * side

    key = jax.random.PRNGKey(0)
    kx, kp = jax.random.split(key)
    x = jax.random.normal(kx, (B, N, emb_size), jnp.float32)
    params = init_params(kp, emb_size, window_size)

    out = swin_encoder(x, params, num_heads=num_heads, window_size=window_size)
    out = jax.block_until_ready(out)

    assert out.shape == (B, N, emb_size)
    assert bool(jnp.all(jnp.isfinite(out)))
    print("KERNEL_OK")
</pallas_src>

<mosaic_0001>
module attributes {stable_mosaic.version = 11 : i64} {
  func.func @_window_attn_kernel(%arg0: i32, %arg1: memref<8x16x32xf32, #tpu.memory_space<vmem>>, %arg2: memref<8x16x32xf32, #tpu.memory_space<vmem>>, %arg3: memref<8x16x32xf32, #tpu.memory_space<vmem>>, %arg4: memref<8x16x16xf32, #tpu.memory_space<vmem>>, %arg5: memref<8x16x32xf32, #tpu.memory_space<vmem>>) attributes {dimension_semantics = [#tpu.dimension_semantics<parallel>], iteration_bounds = array<i64: 1>, scalar_prefetch = 0 : i64, scratch_operands = 0 : i64, tpu.core_type = #tpu.core_type<tc>, window_params = [{transform_indices = @transform_0, window_bounds = array<i64: 8, 16, 32>}, {transform_indices = @transform_1, window_bounds = array<i64: 8, 16, 32>}, {transform_indices = @transform_2, window_bounds = array<i64: 8, 16, 32>}, {pipeline_mode = #tpu.pipeline_mode<synchronous>, transform_indices = @transform_3, window_bounds = array<i64: 8, 16, 16>}, {transform_indices = @transform_4, window_bounds = array<i64: 8, 16, 32>}]} {
    %c0 = arith.constant 0 : index
    %c0_0 = arith.constant 0 : index
    %c0_1 = arith.constant 0 : index
    %0 = vector.load %arg1[%c0, %c0_0, %c0_1] : memref<8x16x32xf32, #tpu.memory_space<vmem>>, vector<8x16x32xf32>
    %c0_2 = arith.constant 0 : index
    %c0_3 = arith.constant 0 : index
    %c0_4 = arith.constant 0 : index
    %1 = vector.load %arg2[%c0_2, %c0_3, %c0_4] : memref<8x16x32xf32, #tpu.memory_space<vmem>>, vector<8x16x32xf32>
    %c0_5 = arith.constant 0 : index
    %c0_6 = arith.constant 0 : index
    %c0_7 = arith.constant 0 : index
    %2 = vector.load %arg3[%c0_5, %c0_6, %c0_7] : memref<8x16x32xf32, #tpu.memory_space<vmem>>, vector<8x16x32xf32>
    %c0_8 = arith.constant 0 : index
    %c0_9 = arith.constant 0 : index
    %c0_10 = arith.constant 0 : index
    %3 = vector.load %arg4[%c0_8, %c0_9, %c0_10] : memref<8x16x16xf32, #tpu.memory_space<vmem>>, vector<8x16x16xf32>
    %4 = vector.extract_strided_slice %0 {offsets = [0, 0, 0], sizes = [8, 16, 8], strides = [1, 1, 1]} : vector<8x16x32xf32> to vector<8x16x8xf32>
    %5 = vector.extract_strided_slice %1 {offsets = [0, 0, 0], sizes = [8, 16, 8], strides = [1, 1, 1]} : vector<8x16x32xf32> to vector<8x16x8xf32>
    %6 = vector.extract_strided_slice %2 {offsets = [0, 0, 0], sizes = [8, 16, 8], strides = [1, 1, 1]} : vector<8x16x32xf32> to vector<8x16x8xf32>
    "tpu.trace_start"() <{level = 10 : i32, message = "bqd,bkd->bqk"}> : () -> ()
    %cst = arith.constant dense<0.000000e+00> : vector<8x16x16xf32>
    %7 = tpu.matmul %4, %5, %cst {dimension_numbers = #tpu.dot_dimension_numbers<[2], [2], [1], [1], [0, 0, 0, 1, 1, 1], [0], [0]>} : vector<8x16x8xf32>, vector<8x16x8xf32>, vector<8x16x16xf32> -> vector<8x16x16xf32>
    "tpu.trace_stop"() : () -> ()
    %cst_11 = arith.constant 0.353553385 : f32
    %8 = vector.broadcast %cst_11 : f32 to vector<8x16x16xf32>
    %9 = arith.mulf %7, %8 : vector<8x16x16xf32>
    %10 = arith.addf %9, %3 : vector<8x16x16xf32>
    %cst_12 = arith.constant dense<0xFF800000> : vector<8x16xf32>
    %11 = vector.multi_reduction <maximumf>, %10, %cst_12 [2] : vector<8x16x16xf32> to vector<8x16xf32>
    %12 = vector.shape_cast %11 : vector<8x16xf32> to vector<8x16x1xf32>
    %13 = vector.broadcast %12 : vector<8x16x1xf32> to vector<8x16x16xf32>
    %14 = arith.subf %10, %13 : vector<8x16x16xf32>
    %15 = math.exp %14 : vector<8x16x16xf32>
    %cst_13 = arith.constant dense<0.000000e+00> : vector<8x16xf32>
    %16 = vector.multi_reduction <add>, %15, %cst_13 [2] : vector<8x16x16xf32> to vector<8x16xf32>
    %17 = vector.shape_cast %16 : vector<8x16xf32> to vector<8x16x1xf32>
    %18 = tpu.reciprocal %17 {approx = true} : vector<8x16x1xf32> -> vector<8x16x1xf32>
    %19 = vector.broadcast %18 : vector<8x16x1xf32> to vector<8x16x16xf32>
    %20 = arith.mulf %15, %19 : vector<8x16x16xf32>
    "tpu.trace_start"() <{level = 10 : i32, message = "bqk,bkd->bqd"}> : () -> ()
    %cst_14 = arith.constant dense<0.000000e+00> : vector<8x16x8xf32>
    %21 = tpu.matmul %20, %6, %cst_14 {dimension_numbers = #tpu.dot_dimension_numbers<[2], [1], [1], [2], [0, 0, 0, 1, 1, 2], [0], [0]>} : vector<8x16x16xf32>, vector<8x16x8xf32>, vector<8x16x8xf32> -> vector<8x16x8xf32>
    "tpu.trace_stop"() : () -> ()
    %22 = vector.extract_strided_slice %0 {offsets = [0, 0, 8], sizes = [8, 16, 8], strides = [1, 1, 1]} : vector<8x16x32xf32> to vector<8x16x8xf32>
    %23 = vector.extract_strided_slice %1 {offsets = [0, 0, 8], sizes = [8, 16, 8], strides = [1, 1, 1]} : vector<8x16x32xf32> to vector<8x16x8xf32>
    %24 = vector.extract_strided_slice %2 {offsets = [0, 0, 8], sizes = [8, 16, 8], strides = [1, 1, 1]} : vector<8x16x32xf32> to vector<8x16x8xf32>
    "tpu.trace_start"() <{level = 10 : i32, message = "bqd,bkd->bqk"}> : () -> ()
    %cst_15 = arith.constant dense<0.000000e+00> : vector<8x16x16xf32>
    %25 = tpu.matmul %22, %23, %cst_15 {dimension_numbers = #tpu.dot_dimension_numbers<[2], [2], [1], [1], [0, 0, 0, 1, 1, 1], [0], [0]>} : vector<8x16x8xf32>, vector<8x16x8xf32>, vector<8x16x16xf32> -> vector<8x16x16xf32>
    "tpu.trace_stop"() : () -> ()
    %cst_16 = arith.constant 0.353553385 : f32
    %26 = vector.broadcast %cst_16 : f32 to vector<8x16x16xf32>
    %27 = arith.mulf %25, %26 : vector<8x16x16xf32>
    %28 = arith.addf %27, %3 : vector<8x16x16xf32>
    %cst_17 = arith.constant dense<0xFF800000> : vector<8x16xf32>
    %29 = vector.multi_reduction <maximumf>, %28, %cst_17 [2] : vector<8x16x16xf32> to vector<8x16xf32>
    %30 = vector.shape_cast %29 : vector<8x16xf32> to vector<8x16x1xf32>
    %31 = vector.broadcast %30 : vector<8x16x1xf32> to vector<8x16x16xf32>
    %32 = arith.subf %28, %31 : vector<8x16x16xf32>
    %33 = math.exp %32 : vector<8x16x16xf32>
    %cst_18 = arith.constant dense<0.000000e+00> : vector<8x16xf32>
    %34 = vector.multi_reduction <add>, %33, %cst_18 [2] : vector<8x16x16xf32> to vector<8x16xf32>
    %35 = vector.shape_cast %34 : vector<8x16xf32> to vector<8x16x1xf32>
    %36 = tpu.reciprocal %35 {approx = true} : vector<8x16x1xf32> -> vector<8x16x1xf32>
    %37 = vector.broadcast %36 : vector<8x16x1xf32> to vector<8x16x16xf32>
    %38 = arith.mulf %33, %37 : vector<8x16x16xf32>
    "tpu.trace_start"() <{level = 10 : i32, message = "bqk,bkd->bqd"}> : () -> ()
    %cst_19 = arith.constant dense<0.000000e+00> : vector<8x16x8xf32>
    %39 = tpu.matmul %38, %24, %cst_19 {dimension_numbers = #tpu.dot_dimension_numbers<[2], [1], [1], [2], [0, 0, 0, 1, 1, 2], [0], [0]>} : vector<8x16x16xf32>, vector<8x16x8xf32>, vector<8x16x8xf32> -> vector<8x16x8xf32>
    "tpu.trace_stop"() : () -> ()
    %40 = vector.extract_strided_slice %0 {offsets = [0, 0, 16], sizes = [8, 16, 8], strides = [1, 1, 1]} : vector<8x16x32xf32> to vector<8x16x8xf32>
    %41 = vector.extract_strided_slice %1 {offsets = [0, 0, 16], sizes = [8, 16, 8], strides = [1, 1, 1]} : vector<8x16x32xf32> to vector<8x16x8xf32>
    %42 = vector.extract_strided_slice %2 {offsets = [0, 0, 16], sizes = [8, 16, 8], strides = [1, 1, 1]} : vector<8x16x32xf32> to vector<8x16x8xf32>
    "tpu.trace_start"() <{level = 10 : i32, message = "bqd,bkd->bqk"}> : () -> ()
    %cst_20 = arith.constant dense<0.000000e+00> : vector<8x16x16xf32>
    %43 = tpu.matmul %40, %41, %cst_20 {dimension_numbers = #tpu.dot_dimension_numbers<[2], [2], [1], [1], [0, 0, 0, 1, 1, 1], [0], [0]>} : vector<8x16x8xf32>, vector<8x16x8xf32>, vector<8x16x16xf32> -> vector<8x16x16xf32>
    "tpu.trace_stop"() : () -> ()
    %cst_21 = arith.constant 0.353553385 : f32
    %44 = vector.broadcast %cst_21 : f32 to vector<8x16x16xf32>
    %45 = arith.mulf %43, %44 : vector<8x16x16xf32>
    %46 = arith.addf %45, %3 : vector<8x16x16xf32>
    %cst_22 = arith.constant dense<0xFF800000> : vector<8x16xf32>
    %47 = vector.multi_reduction <maximumf>, %46, %cst_22 [2] : vector<8x16x16xf32> to vector<8x16xf32>
    %48 = vector.shape_cast %47 : vector<8x16xf32> to vector<8x16x1xf32>
    %49 = vector.broadcast %48 : vector<8x16x1xf32> to vector<8x16x16xf32>
    %50 = arith.subf %46, %49 : vector<8x16x16xf32>
    %51 = math.exp %50 : vector<8x16x16xf32>
    %cst_23 = arith.constant dense<0.000000e+00> : vector<8x16xf32>
    %52 = vector.multi_reduction <add>, %51, %cst_23 [2] : vector<8x16x16xf32> to vector<8x16xf32>
    %53 = vector.shape_cast %52 : vector<8x16xf32> to vector<8x16x1xf32>
    %54 = tpu.reciprocal %53 {approx = true} : vector<8x16x1xf32> -> vector<8x16x1xf32>
    %55 = vector.broadcast %54 : vector<8x16x1xf32> to vector<8x16x16xf32>
    %56 = arith.mulf %51, %55 : vector<8x16x16xf32>
    "tpu.trace_start"() <{level = 10 : i32, message = "bqk,bkd->bqd"}> : () -> ()
    %cst_24 = arith.constant dense<0.000000e+00> : vector<8x16x8xf32>
    %57 = tpu.matmul %56, %42, %cst_24 {dimension_numbers = #tpu.dot_dimension_numbers<[2], [1], [1], [2], [0, 0, 0, 1, 1, 2], [0], [0]>} : vector<8x16x16xf32>, vector<8x16x8xf32>, vector<8x16x8xf32> -> vector<8x16x8xf32>
    "tpu.trace_stop"() : () -> ()
    %58 = vector.extract_strided_slice %0 {offsets = [0, 0, 24], sizes = [8, 16, 8], strides = [1, 1, 1]} : vector<8x16x32xf32> to vector<8x16x8xf32>
    %59 = vector.extract_strided_slice %1 {offsets = [0, 0, 24], sizes = [8, 16, 8], strides = [1, 1, 1]} : vector<8x16x32xf32> to vector<8x16x8xf32>
    %60 = vector.extract_strided_slice %2 {offsets = [0, 0, 24], sizes = [8, 16, 8], strides = [1, 1, 1]} : vector<8x16x32xf32> to vector<8x16x8xf32>
    "tpu.trace_start"() <{level = 10 : i32, message = "bqd,bkd->bqk"}> : () -> ()
    %cst_25 = arith.constant dense<0.000000e+00> : vector<8x16x16xf32>
    %61 = tpu.matmul %58, %59, %cst_25 {dimension_numbers = #tpu.dot_dimension_numbers<[2], [2], [1], [1], [0, 0, 0, 1, 1, 1], [0], [0]>} : vector<8x16x8xf32>, vector<8x16x8xf32>, vector<8x16x16xf32> -> vector<8x16x16xf32>
    "tpu.trace_stop"() : () -> ()
    %cst_26 = arith.constant 0.353553385 : f32
    %62 = vector.broadcast %cst_26 : f32 to vector<8x16x16xf32>
    %63 = arith.mulf %61, %62 : vector<8x16x16xf32>
    %64 = arith.addf %63, %3 : vector<8x16x16xf32>
    %cst_27 = arith.constant dense<0xFF800000> : vector<8x16xf32>
    %65 = vector.multi_reduction <maximumf>, %64, %cst_27 [2] : vector<8x16x16xf32> to vector<8x16xf32>
    %66 = vector.shape_cast %65 : vector<8x16xf32> to vector<8x16x1xf32>
    %67 = vector.broadcast %66 : vector<8x16x1xf32> to vector<8x16x16xf32>
    %68 = arith.subf %64, %67 : vector<8x16x16xf32>
    %69 = math.exp %68 : vector<8x16x16xf32>
    %cst_28 = arith.constant dense<0.000000e+00> : vector<8x16xf32>
    %70 = vector.multi_reduction <add>, %69, %cst_28 [2] : vector<8x16x16xf32> to vector<8x16xf32>
    %71 = vector.shape_cast %70 : vector<8x16xf32> to vector<8x16x1xf32>
    %72 = tpu.reciprocal %71 {approx = true} : vector<8x16x1xf32> -> vector<8x16x1xf32>
    %73 = vector.broadcast %72 : vector<8x16x1xf32> to vector<8x16x16xf32>
    %74 = arith.mulf %69, %73 : vector<8x16x16xf32>
    "tpu.trace_start"() <{level = 10 : i32, message = "bqk,bkd->bqd"}> : () -> ()
    %cst_29 = arith.constant dense<0.000000e+00> : vector<8x16x8xf32>
    %75 = tpu.matmul %74, %60, %cst_29 {dimension_numbers = #tpu.dot_dimension_numbers<[2], [1], [1], [2], [0, 0, 0, 1, 1, 2], [0], [0]>} : vector<8x16x16xf32>, vector<8x16x8xf32>, vector<8x16x8xf32> -> vector<8x16x8xf32>
    "tpu.trace_stop"() : () -> ()
    %76 = tpu.concatenate %21, %39, %57, %75 in 2 : vector<8x16x8xf32>, vector<8x16x8xf32>, vector<8x16x8xf32>, vector<8x16x8xf32> -> vector<8x16x32xf32>
    %c0_30 = arith.constant 0 : index
    %c0_31 = arith.constant 0 : index
    %c0_32 = arith.constant 0 : index
    %77 = vector.load %arg5[%c0_30, %c0_31, %c0_32] : memref<8x16x32xf32, #tpu.memory_space<vmem>>, vector<8x16x32xf32>
    tpu.vector_store %arg5[%c0_30, %c0_31, %c0_32], %76 {strides = array<i32>} : memref<8x16x32xf32, #tpu.memory_space<vmem>>, vector<8x16x32xf32>,
    return
  }
  func.func @transform_0(%arg0: i32) -> (i32, i32, i32) {
    %c0_i32 = arith.constant 0 : i32
    %c0_i32_0 = arith.constant 0 : i32
    %c0_i32_1 = arith.constant 0 : i32
    return %arg0, %c0_i32, %c0_i32_0 : i32, i32, i32
  }
  func.func @transform_1(%arg0: i32) -> (i32, i32, i32) {
    %c0_i32 = arith.constant 0 : i32
    %c0_i32_0 = arith.constant 0 : i32
    %c0_i32_1 = arith.constant 0 : i32
    return %arg0, %c0_i32, %c0_i32_0 : i32, i32, i32
  }
  func.func @transform_2(%arg0: i32) -> (i32, i32, i32) {
    %c0_i32 = arith.constant 0 : i32
    %c0_i32_0 = arith.constant 0 : i32
    %c0_i32_1 = arith.constant 0 : i32
    return %arg0, %c0_i32, %c0_i32_0 : i32, i32, i32
  }
  func.func @transform_3(%arg0: i32) -> (i32, i32, i32) {
    %c0_i32 = arith.constant 0 : i32
    %c0_i32_0 = arith.constant 0 : i32
    %c0_i32_1 = arith.constant 0 : i32
    %c0_i32_2 = arith.constant 0 : i32
    return %c0_i32, %c0_i32_0, %c0_i32_1 : i32, i32, i32
  }
  func.func @transform_4(%arg0: i32) -> (i32, i32, i32) {
    %c0_i32 = arith.constant 0 : i32
    %c0_i32_0 = arith.constant 0 : i32
    %c0_i32_1 = arith.constant 0 : i32
    return %arg0, %c0_i32, %c0_i32_0 : i32, i32, i32
  }
}

module attributes {stable_mosaic.version = 11 : i64} {
  func.func @_ln_linear_kernel(%arg0: i32, %arg1: i32, %arg2: memref<128x32xf32, #tpu.memory_space<vmem>>, %arg3: memref<1x32xf32, #tpu.memory_space<vmem>>, %arg4: memref<1x32xf32, #tpu.memory_space<vmem>>, %arg5: memref<96x32xf32, #tpu.memory_space<vmem>>, %arg6: memref<1x96xf32, #tpu.memory_space<vmem>>, %arg7: memref<128x96xf32, #tpu.memory_space<vmem>>) attributes {dimension_semantics = [#tpu.dimension_semantics<parallel>, #tpu.dimension_semantics<parallel>], iteration_bounds = array<i64: 1, 1>, scalar_prefetch = 0 : i64, scratch_operands = 0 : i64, tpu.core_type = #tpu.core_type<tc>, window_params = [{transform_indices = @transform_0, window_bounds = array<i64: 128, 32>}, {pipeline_mode = #tpu.pipeline_mode<synchronous>, transform_indices = @transform_1, window_bounds = array<i64: 1, 32>}, {pipeline_mode = #tpu.pipeline_mode<synchronous>, transform_indices = @transform_2, window_bounds = array<i64: 1, 32>}, {transform_indices = @transform_3, window_bounds = array<i64: 96, 32>}, {transform_indices = @transform_4, window_bounds = array<i64: 1, 96>}, {transform_indices = @transform_5, window_bounds = array<i64: 128, 96>}]} {
    %c0 = arith.constant 0 : index
    %c0_0 = arith.constant 0 : index
    %0 = vector.load %arg2[%c0, %c0_0] : memref<128x32xf32, #tpu.memory_space<vmem>>, vector<128x32xf32>
    %c0_1 = arith.constant 0 : index
    %c0_2 = arith.constant 0 : index
    %1 = vector.load %arg3[%c0_1, %c0_2] : memref<1x32xf32, #tpu.memory_space<vmem>>, vector<1x32xf32>
    %c0_3 = arith.constant 0 : index
    %c0_4 = arith.constant 0 : index
    %2 = vector.load %arg4[%c0_3, %c0_4] : memref<1x32xf32, #tpu.memory_space<vmem>>, vector<1x32xf32>
    %cst = arith.constant dense<0.000000e+00> : vector<128xf32>
    %3 = vector.multi_reduction <add>, %0, %cst [1] : vector<128x32xf32> to vector<128xf32>
    %4 = vector.shape_cast %3 : vector<128xf32> to vector<128x1xf32>
    %cst_5 = arith.constant 3.200000e+01 : f32
    %5 = vector.broadcast %cst_5 : f32 to vector<128x1xf32>
    %6 = arith.divf %4, %5 : vector<128x1xf32>
    %7 = vector.broadcast %6 : vector<128x1xf32> to vector<128x32xf32>
    %8 = arith.subf %0, %7 : vector<128x32xf32>
    %9 = arith.mulf %8, %8 : vector<128x32xf32>
    %cst_6 = arith.constant dense<0.000000e+00> : vector<128xf32>
    %10 = vector.multi_reduction <add>, %9, %cst_6 [1] : vector<128x32xf32> to vector<128xf32>
    %11 = vector.shape_cast %10 : vector<128xf32> to vector<128x1xf32>
    %cst_7 = arith.constant 3.200000e+01 : f32
    %12 = vector.broadcast %cst_7 : f32 to vector<128x1xf32>
    %13 = arith.divf %11, %12 : vector<128x1xf32>
    %14 = vector.broadcast %6 : vector<128x1xf32> to vector<128x32xf32>
    %15 = arith.subf %0, %14 : vector<128x32xf32>
    %cst_8 = arith.constant 9.99999974E-6 : f32
    %16 = vector.broadcast %cst_8 : f32 to vector<128x1xf32>
    %17 = arith.addf %13, %16 : vector<128x1xf32>
    %18 = math.rsqrt %17 : vector<128x1xf32>
    %19 = vector.broadcast %18 : vector<128x1xf32> to vector<128x32xf32>
    %20 = arith.mulf %15, %19 : vector<128x32xf32>
    %21 = vector.broadcast %1 : vector<1x32xf32> to vector<128x32xf32>
    %22 = arith.mulf %20, %21 : vector<128x32xf32>
    %23 = vector.broadcast %2 : vector<1x32xf32> to vector<128x32xf32>
    %24 = arith.addf %22, %23 : vector<128x32xf32>
    %c0_9 = arith.constant 0 : index
    %c0_10 = arith.constant 0 : index
    %25 = vector.load %arg5[%c0_9, %c0_10] : memref<96x32xf32, #tpu.memory_space<vmem>>, vector<96x32xf32>
    %cst_11 = arith.constant dense<0.000000e+00> : vector<128x96xf32>
    %26 = tpu.matmul %24, %25, %cst_11 {dimension_numbers = #tpu.dot_dimension_numbers<[1], [1], [0], [0], [0, 0, 1, 0], [], []>} : vector<128x32xf32>, vector<96x32xf32>, vector<128x96xf32> -> vector<128x96xf32>
    %c0_12 = arith.constant 0 : index
    %c0_13 = arith.constant 0 : index
    %27 = vector.load %arg6[%c0_12, %c0_13] : memref<1x96xf32, #tpu.memory_space<vmem>>, vector<1x96xf32>
    %28 = vector.broadcast %27 : vector<1x96xf32> to vector<128x96xf32>
    %29 = arith.addf %26, %28 : vector<128x96xf32>
    %c0_14 = arith.constant 0 : index
    %c0_15 = arith.constant 0 : index
    %30 = vector.load %arg7[%c0_14, %c0_15] : memref<128x96xf32, #tpu.memory_space<vmem>>, vector<128x96xf32>
    tpu.vector_store %arg7[%c0_14, %c0_15], %29 {strides = array<i32>} : memref<128x96xf32, #tpu.memory_space<vmem>>, vector<128x96xf32>,
    return
  }
  func.func @transform_0(%arg0: i32, %arg1: i32) -> (i32, i32) {
    %c0_i32 = arith.constant 0 : i32
    %c0_i32_0 = arith.constant 0 : i32
    return %arg0, %c0_i32 : i32, i32
  }
  func.func @transform_1(%arg0: i32, %arg1: i32) -> (i32, i32) {
    %c0_i32 = arith.constant 0 : i32
    %c0_i32_0 = arith.constant 0 : i32
    %c0_i32_1 = arith.constant 0 : i32
    return %c0_i32, %c0_i32_0 : i32, i32
  }
  func.func @transform_2(%arg0: i32, %arg1: i32) -> (i32, i32) {
    %c0_i32 = arith.constant 0 : i32
    %c0_i32_0 = arith.constant 0 : i32
    %c0_i32_1 = arith.constant 0 : i32
    return %c0_i32, %c0_i32_0 : i32, i32
  }
  func.func @transform_3(%arg0: i32, %arg1: i32) -> (i32, i32) {
    %c0_i32 = arith.constant 0 : i32
    %c0_i32_0 = arith.constant 0 : i32
    return %arg1, %c0_i32 : i32, i32
  }
  func.func @transform_4(%arg0: i32, %arg1: i32) -> (i32, i32) {
    %c0_i32 = arith.constant 0 : i32
    %c0_i32_0 = arith.constant 0 : i32
    return %c0_i32, %arg1 : i32, i32
  }
  func.func @transform_5(%arg0: i32, %arg1: i32) -> (i32, i32) {
    %c0_i32 = arith.constant 0 : i32
    return %arg0, %arg1 : i32, i32
  }
}

module attributes {stable_mosaic.version = 11 : i64} {
  func.func @_linear_res_kernel(%arg0: i32, %arg1: i32, %arg2: memref<128x32xf32, #tpu.memory_space<vmem>>, %arg3: memref<32x32xf32, #tpu.memory_space<vmem>>, %arg4: memref<1x32xf32, #tpu.memory_space<vmem>>, %arg5: memref<128x32xf32, #tpu.memory_space<vmem>>, %arg6: memref<128x32xf32, #tpu.memory_space<vmem>>) attributes {dimension_semantics = [#tpu.dimension_semantics<parallel>, #tpu.dimension_semantics<parallel>], iteration_bounds = array<i64: 1, 1>, scalar_prefetch = 0 : i64, scratch_operands = 0 : i64, tpu.core_type = #tpu.core_type<tc>, window_params = [{transform_indices = @transform_0, window_bounds = array<i64: 128, 32>}, {transform_indices = @transform_1, window_bounds = array<i64: 32, 32>}, {transform_indices = @transform_2, window_bounds = array<i64: 1, 32>}, {transform_indices = @transform_3, window_bounds = array<i64: 128, 32>}, {transform_indices = @transform_4, window_bounds = array<i64: 128, 32>}]} {
    %c0 = arith.constant 0 : index
    %c0_0 = arith.constant 0 : index
    %0 = vector.load %arg2[%c0, %c0_0] : memref<128x32xf32, #tpu.memory_space<vmem>>, vector<128x32xf32>
    %c0_1 = arith.constant 0 : index
    %c0_2 = arith.constant 0 : index
    %1 = vector.load %arg3[%c0_1, %c0_2] : memref<32x32xf32, #tpu.memory_space<vmem>>, vector<32x32xf32>
    %cst = arith.constant dense<0.000000e+00> : vector<128x32xf32>
    %2 = tpu.matmul %0, %1, %cst {dimension_numbers = #tpu.dot_dimension_numbers<[1], [1], [0], [0], [0, 0, 1, 0], [], []>} : vector<128x32xf32>, vector<32x32xf32>, vector<128x32xf32> -> vector<128x32xf32>
    %c0_3 = arith.constant 0 : index
    %c0_4 = arith.constant 0 : index
    %3 = vector.load %arg4[%c0_3, %c0_4] : memref<1x32xf32, #tpu.memory_space<vmem>>, vector<1x32xf32>
    %4 = vector.broadcast %3 : vector<1x32xf32> to vector<128x32xf32>
    %5 = arith.addf %2, %4 : vector<128x32xf32>
    %c0_5 = arith.constant 0 : index
    %c0_6 = arith.constant 0 : index
    %6 = vector.load %arg5[%c0_5, %c0_6] : memref<128x32xf32, #tpu.memory_space<vmem>>, vector<128x32xf32>
    %7 = arith.addf %5, %6 : vector<128x32xf32>
    %c0_7 = arith.constant 0 : index
    %c0_8 = arith.constant 0 : index
    %8 = vector.load %arg6[%c0_7, %c0_8] : memref<128x32xf32, #tpu.memory_space<vmem>>, vector<128x32xf32>
    tpu.vector_store %arg6[%c0_7, %c0_8], %7 {strides = array<i32>} : memref<128x32xf32, #tpu.memory_space<vmem>>, vector<128x32xf32>,
    return
  }
  func.func @transform_0(%arg0: i32, %arg1: i32) -> (i32, i32) {
    %c0_i32 = arith.constant 0 : i32
    %c0_i32_0 = arith.constant 0 : i32
    return %arg0, %c0_i32 : i32, i32
  }
  func.func @transform_1(%arg0: i32, %arg1: i32) -> (i32, i32) {
    %c0_i32 = arith.constant 0 : i32
    %c0_i32_0 = arith.constant 0 : i32
    return %arg1, %c0_i32 : i32, i32
  }
  func.func @transform_2(%arg0: i32, %arg1: i32) -> (i32, i32) {
    %c0_i32 = arith.constant 0 : i32
    %c0_i32_0 = arith.constant 0 : i32
    return %c0_i32, %arg1 : i32, i32
  }
  func.func @transform_3(%arg0: i32, %arg1: i32) -> (i32, i32) {
    %c0_i32 = arith.constant 0 : i32
    return %arg0, %arg1 : i32, i32
  }
  func.func @transform_4(%arg0: i32, %arg1: i32) -> (i32, i32) {
    %c0_i32 = arith.constant 0 : i32
    return %arg0, %arg1 : i32, i32
  }
}

module attributes {stable_mosaic.version = 11 : i64} {
  func.func @_mlp_fused_kernel(%arg0: i32, %arg1: memref<128x32xf32, #tpu.memory_space<vmem>>, %arg2: memref<1x32xf32, #tpu.memory_space<vmem>>, %arg3: memref<1x32xf32, #tpu.memory_space<vmem>>, %arg4: memref<128x32xf32, #tpu.memory_space<vmem>>, %arg5: memref<1x128xf32, #tpu.memory_space<vmem>>, %arg6: memref<32x128xf32, #tpu.memory_space<vmem>>, %arg7: memref<1x32xf32, #tpu.memory_space<vmem>>, %arg8: memref<128x32xf32, #tpu.memory_space<vmem>>) attributes {dimension_semantics = [#tpu.dimension_semantics<parallel>], iteration_bounds = array<i64: 1>, scalar_prefetch = 0 : i64, scratch_operands = 0 : i64, tpu.core_type = #tpu.core_type<tc>, window_params = [{transform_indices = @transform_0, window_bounds = array<i64: 128, 32>}, {pipeline_mode = #tpu.pipeline_mode<synchronous>, transform_indices = @transform_1, window_bounds = array<i64: 1, 32>}, {pipeline_mode = #tpu.pipeline_mode<synchronous>, transform_indices = @transform_2, window_bounds = array<i64: 1, 32>}, {pipeline_mode = #tpu.pipeline_mode<synchronous>, transform_indices = @transform_3, window_bounds = array<i64: 128, 32>}, {pipeline_mode = #tpu.pipeline_mode<synchronous>, transform_indices = @transform_4, window_bounds = array<i64: 1, 128>}, {pipeline_mode = #tpu.pipeline_mode<synchronous>, transform_indices = @transform_5, window_bounds = array<i64: 32, 128>}, {pipeline_mode = #tpu.pipeline_mode<synchronous>, transform_indices = @transform_6, window_bounds = array<i64: 1, 32>}, {transform_indices = @transform_7, window_bounds = array<i64: 128, 32>}]} {
    %c0 = arith.constant 0 : index
    %c0_0 = arith.constant 0 : index
    %0 = vector.load %arg1[%c0, %c0_0] : memref<128x32xf32, #tpu.memory_space<vmem>>, vector<128x32xf32>
    %c0_1 = arith.constant 0 : index
    %c0_2 = arith.constant 0 : index
    %1 = vector.load %arg2[%c0_1, %c0_2] : memref<1x32xf32, #tpu.memory_space<vmem>>, vector<1x32xf32>
    %c0_3 = arith.constant 0 : index
    %c0_4 = arith.constant 0 : index
    %2 = vector.load %arg3[%c0_3, %c0_4] : memref<1x32xf32, #tpu.memory_space<vmem>>, vector<1x32xf32>
    %cst = arith.constant dense<0.000000e+00> : vector<128xf32>
    %3 = vector.multi_reduction <add>, %0, %cst [1] : vector<128x32xf32> to vector<128xf32>
    %4 = vector.shape_cast %3 : vector<128xf32> to vector<128x1xf32>
    %cst_5 = arith.constant 3.200000e+01 : f32
    %5 = vector.broadcast %cst_5 : f32 to vector<128x1xf32>
    %6 = arith.divf %4, %5 : vector<128x1xf32>
    %7 = vector.broadcast %6 : vector<128x1xf32> to vector<128x32xf32>
    %8 = arith.subf %0, %7 : vector<128x32xf32>
    %9 = arith.mulf %8, %8 : vector<128x32xf32>
    %cst_6 = arith.constant dense<0.000000e+00> : vector<128xf32>
    %10 = vector.multi_reduction <add>, %9, %cst_6 [1] : vector<128x32xf32> to vector<128xf32>
    %11 = vector.shape_cast %10 : vector<128xf32> to vector<128x1xf32>
    %cst_7 = arith.constant 3.200000e+01 : f32
    %12 = vector.broadcast %cst_7 : f32 to vector<128x1xf32>
    %13 = arith.divf %11, %12 : vector<128x1xf32>
    %14 = vector.broadcast %6 : vector<128x1xf32> to vector<128x32xf32>
    %15 = arith.subf %0, %14 : vector<128x32xf32>
    %cst_8 = arith.constant 9.99999974E-6 : f32
    %16 = vector.broadcast %cst_8 : f32 to vector<128x1xf32>
    %17 = arith.addf %13, %16 : vector<128x1xf32>
    %18 = math.rsqrt %17 : vector<128x1xf32>
    %19 = vector.broadcast %18 : vector<128x1xf32> to vector<128x32xf32>
    %20 = arith.mulf %15, %19 : vector<128x32xf32>
    %21 = vector.broadcast %1 : vector<1x32xf32> to vector<128x32xf32>
    %22 = arith.mulf %20, %21 : vector<128x32xf32>
    %23 = vector.broadcast %2 : vector<1x32xf32> to vector<128x32xf32>
    %24 = arith.addf %22, %23 : vector<128x32xf32>
    %c0_9 = arith.constant 0 : index
    %c0_10 = arith.constant 0 : index
    %25 = vector.load %arg4[%c0_9, %c0_10] : memref<128x32xf32, #tpu.memory_space<vmem>>, vector<128x32xf32>
    %cst_11 = arith.constant dense<0.000000e+00> : vector<128x128xf32>
    %26 = tpu.matmul %24, %25, %cst_11 {dimension_numbers = #tpu.dot_dimension_numbers<[1], [1], [0], [0], [0, 0, 1, 0], [], []>} : vector<128x32xf32>, vector<128x32xf32>, vector<128x128xf32> -> vector<128x128xf32>
    %c0_12 = arith.constant 0 : index
    %c0_13 = arith.constant 0 : index
    %27 = vector.load %arg5[%c0_12, %c0_13] : memref<1x128xf32, #tpu.memory_space<vmem>>, vector<1x128xf32>
    %28 = vector.broadcast %27 : vector<1x128xf32> to vector<128x128xf32>
    %29 = arith.addf %26, %28 : vector<128x128xf32>
    %cst_14 = arith.constant 5.000000e-01 : f32
    %30 = vector.broadcast %cst_14 : f32 to vector<128x128xf32>
    %31 = arith.mulf %30, %29 : vector<128x128xf32>
    %cst_15 = arith.constant 0.707106769 : f32
    %32 = vector.broadcast %cst_15 : f32 to vector<128x128xf32>
    %33 = arith.mulf %29, %32 : vector<128x128xf32>
    %34 = math.erf %33 : vector<128x128xf32>
    %cst_16 = arith.constant 1.000000e+00 : f32
    %35 = vector.broadcast %cst_16 : f32 to vector<128x128xf32>
    %36 = arith.addf %35, %34 : vector<128x128xf32>
    %37 = arith.mulf %31, %36 : vector<128x128xf32>
    %c0_17 = arith.constant 0 : index
    %c0_18 = arith.constant 0 : index
    %38 = vector.load %arg6[%c0_17, %c0_18] : memref<32x128xf32, #tpu.memory_space<vmem>>, vector<32x128xf32>
    %cst_19 = arith.constant dense<0.000000e+00> : vector<128x32xf32>
    %39 = tpu.matmul %37, %38, %cst_19 {dimension_numbers = #tpu.dot_dimension_numbers<[1], [1], [0], [0], [0, 0, 1, 0], [], []>} : vector<128x128xf32>, vector<32x128xf32>, vector<128x32xf32> -> vector<128x32xf32>
    %c0_20 = arith.constant 0 : index
    %c0_21 = arith.constant 0 : index
    %40 = vector.load %arg7[%c0_20, %c0_21] : memref<1x32xf32, #tpu.memory_space<vmem>>, vector<1x32xf32>
    %41 = vector.broadcast %40 : vector<1x32xf32> to vector<128x32xf32>
    %42 = arith.addf %39, %41 : vector<128x32xf32>
    %43 = arith.addf %42, %0 : vector<128x32xf32>
    %c0_22 = arith.constant 0 : index
    %c0_23 = arith.constant 0 : index
    %44 = vector.load %arg8[%c0_22, %c0_23] : memref<128x32xf32, #tpu.memory_space<vmem>>, vector<128x32xf32>
    tpu.vector_store %arg8[%c0_22, %c0_23], %43 {strides = array<i32>} : memref<128x32xf32, #tpu.memory_space<vmem>>, vector<128x32xf32>,
    return
  }
  func.func @transform_0(%arg0: i32) -> (i32, i32) {
    %c0_i32 = arith.constant 0 : i32
    %c0_i32_0 = arith.constant 0 : i32
    return %arg0, %c0_i32 : i32, i32
  }
  func.func @transform_1(%arg0: i32) -> (i32, i32) {
    %c0_i32 = arith.constant 0 : i32
    %c0_i32_0 = arith.constant 0 : i32
    %c0_i32_1 = arith.constant 0 : i32
    return %c0_i32, %c0_i32_0 : i32, i32
  }
  func.func @transform_2(%arg0: i32) -> (i32, i32) {
    %c0_i32 = arith.constant 0 : i32
    %c0_i32_0 = arith.constant 0 : i32
    %c0_i32_1 = arith.constant 0 : i32
    return %c0_i32, %c0_i32_0 : i32, i32
  }
  func.func @transform_3(%arg0: i32) -> (i32, i32) {
    %c0_i32 = arith.constant 0 : i32
    %c0_i32_0 = arith.constant 0 : i32
    %c0_i32_1 = arith.constant 0 : i32
    return %c0_i32, %c0_i32_0 : i32, i32
  }
  func.func @transform_4(%arg0: i32) -> (i32, i32) {
    %c0_i32 = arith.constant 0 : i32
    %c0_i32_0 = arith.constant 0 : i32
    %c0_i32_1 = arith.constant 0 : i32
    return %c0_i32, %c0_i32_0 : i32, i32
  }
  func.func @transform_5(%arg0: i32) -> (i32, i32) {
    %c0_i32 = arith.constant 0 : i32
    %c0_i32_0 = arith.constant 0 : i32
    %c0_i32_1 = arith.constant 0 : i32
    return %c0_i32, %c0_i32_0 : i32, i32
  }
  func.func @transform_6(%arg0: i32) -> (i32, i32) {
    %c0_i32 = arith.constant 0 : i32
    %c0_i32_0 = arith.constant 0 : i32
    %c0_i32_1 = arith.constant 0 : i32
    return %c0_i32, %c0_i32_0 : i32, i32
  }
  func.func @transform_7(%arg0: i32) -> (i32, i32) {
    %c0_i32 = arith.constant 0 : i32
    %c0_i32_0 = arith.constant 0 : i32
    return %arg0, %c0_i32 : i32, i32
  }
}

</mosaic_0001>

<bundles_post_ra>
// kernel: swin_encoder.8
= control target key start
LH: loop header
LB: loop body
LE: loop exit
PB: predicated region body
PF: predicated region fallthrough
CT: control target
= control target key end

     0   :  { %vm38_vm0 = vcmask 261120   ;;  %vm540_vm1 = vcmask 785408   ;;  %s1187_s0 = inlined_call_operand.vmem [shape: f32[128,32], index: 0, kind: input, shape index: {}]   ;;  %s1188_s3 = inlined_call_operand.vmem [shape: f32[96,32], index: 3, kind: input, shape index: {}]   ;;  %s1189_s1 = inlined_call_operand.vmem [shape: f32[1,32], index: 1, kind: input, shape index: {}]   ;;  %s1190_s2 = inlined_call_operand.vmem [shape: f32[1,32], index: 2, kind: input, shape index: {}]   ;;  %s1191_s4 = inlined_call_operand.vmem [shape: f32[1,96], index: 4, kind: input, shape index: {}]   ;;  %s1192_s5 = inlined_call_operand.vmem [shape: f32[128,96], index: 5, kind: output, shape index: {}]  }
   0x1   :  { %v757_v0 = vld [vmem:[%s1187_s0] sm:$0xff]  ;;  %v762_v1 = vld [vmem:[%s1187_s0 + $0x8] sm:$0xff]  ;;  %v785_v8 = vld [vmem:[%s1187_s0 + $0x10] sm:$0xff] }
   0x2   :  { %v767_v2 = vld [vmem:[%s1187_s0 + $0x40] sm:$0xff]  ;;  %v39_v3 = vsel %vm38_vm0, %v757_v0, 0.0  ;;  %v42_v4 = vsel %vm38_vm0, %v762_v1, 0.0  ;;  %v776_v5 = vld [vmem:[%s1187_s0 + $0x48] sm:$0xff]  ;;  %v790_v9 = vld [vmem:[%s1187_s0 + $0x50] sm:$0xff]  ;;  %v45_v10 = vsel %vm38_vm0, %v785_v8, 0.0 }
   0x3   :  { %40 = vadd.xlane.f32.xlu0 %v39_v3  ;;  %43 = vadd.xlane.f32.xlu1 %v42_v4  ;;  %v63_v6 = vsel %vm38_vm0, %v767_v2, 0.0  ;;  %v66_v7 = vsel %vm38_vm0, %v776_v5, 0.0  ;;  %v69_v11 = vsel %vm38_vm0, %v790_v9, 0.0  ;;  %v799_v12 = vld [vmem:[%s1187_s0 + $0x18] sm:$0xff]  ;;  %v813_v16 = vld [vmem:[%s1187_s0 + $0x20] sm:$0xff]  ;;  %v827_v20 = vld [vmem:[%s1187_s0 + $0x28] sm:$0xff] }
   0x4   :  { %v804_v13 = vld [vmem:[%s1187_s0 + $0x58] sm:$0xff]  ;;  %v48_v14 = vsel %vm38_vm0, %v799_v12, 0.0  ;;  %v818_v17 = vld [vmem:[%s1187_s0 + $0x60] sm:$0xff]  ;;  %v51_v18 = vsel %vm38_vm0, %v813_v16, 0.0  ;;  %v832_v21 = vld [vmem:[%s1187_s0 + $0x68] sm:$0xff]  ;;  %v54_v22 = vsel %vm38_vm0, %v827_v20, 0.0 }
   0x5   :  { %v72_v15 = vsel %vm38_vm0, %v804_v13, 0.0  ;;  %v75_v19 = vsel %vm38_vm0, %v818_v17, 0.0  ;;  %v78_v23 = vsel %vm38_vm0, %v832_v21, 0.0  ;;  %v841_v24 = vld [vmem:[%s1187_s0 + $0x30] sm:$0xff]  ;;  %v855_v28 = vld [vmem:[%s1187_s0 + $0x38] sm:$0xff]  ;;  %v301_v34 = vld [vmem:[%s1188_s3 + $0x48] sm:$0xff] }
   0x6   :  { %v846_v25 = vld [vmem:[%s1187_s0 + $0x70] sm:$0xff]  ;;  %v57_v26 = vsel %vm38_vm0, %v841_v24, 0.0  ;;  %v860_v29 = vld [vmem:[%s1187_s0 + $0x78] sm:$0xff]  ;;  %v60_v30 = vsel %vm38_vm0, %v855_v28, 0.0  ;;  %v300_v35 = vld [vmem:[%s1188_s3 + $0x40] sm:$0xff] }
   0x7   :  { %64 = vadd.xlane.f32.xlu0 %v63_v6  ;;  %67 = vadd.xlane.f32.xlu1 %v66_v7  ;;  %v81_v27 = vsel %vm38_vm0, %v846_v25, 0.0  ;;  %v84_v31 = vsel %vm38_vm0, %v860_v29, 0.0  ;;  %v303_v32 = vld [vmem:[%s1188_s3 + $0x58] sm:$0xff]  ;;  %v302_v33 = vld [vmem:[%s1188_s3 + $0x50] sm:$0xff] }
   0x8   :  { %620 = vmatprep.subr.msk.mxu0 %vm38_vm0, %v303_v32  ;;  %668 = vmatprep.subr.msk.mxu1 %vm38_vm0, %v303_v32  ;;  %v299_v36 = vld [vmem:[%s1188_s3 + $0x38] sm:$0xff] }
   0x9   :  { %621 = vmatpush3.xpose.msk.msra.mxu0 %vm38_vm0, %v303_v32  ;;  %680 = vmatpush3.xpose.msk.msra.mxu1 %vm38_vm0, %v303_v32  ;;  %v297_v32 = vld [vmem:[%s1188_s3 + $0x28] sm:$0xff] }
   0xa   :  { %622 = vmatprep.subr.msk.mxu0 %vm38_vm0, %v302_v33  ;;  %669 = vmatprep.subr.msk.mxu1 %vm38_vm0, %v302_v33 }
   0xb   :  { %46 = vadd.xlane.f32.xlu0 %v45_v10  ;;  %70 = vadd.xlane.f32.xlu1 %v69_v11 }
   0xd   :  { %623 = vmatpush3.xpose.msk.msra.mxu0 %vm38_vm0, %v302_v33  ;;  %681 = vmatpush3.xpose.msk.msra.mxu1 %vm38_vm0, %v302_v33 }
   0xe   :  { %624 = vmatprep.subr.msk.mxu0 %vm38_vm0, %v301_v34  ;;  %670 = vmatprep.subr.msk.mxu1 %vm38_vm0, %v301_v34 }
   0xf   :  { %49 = vadd.xlane.f32.xlu0 %v48_v14  ;;  %73 = vadd.xlane.f32.xlu1 %v72_v15 }
  0x11   :  { %625 = vmatpush3.xpose.msk.msra.mxu0 %vm38_vm0, %v301_v34  ;;  %682 = vmatpush3.xpose.msk.msra.mxu1 %vm38_vm0, %v301_v34 }
  0x12   :  { %626 = vmatprep.subr.msk.mxu0 %vm38_vm0, %v300_v35  ;;  %671 = vmatprep.subr.msk.mxu1 %vm38_vm0, %v300_v35 }
  0x13   :  { %52 = vadd.xlane.f32.xlu0 %v51_v18  ;;  %76 = vadd.xlane.f32.xlu1 %v75_v19 }
  0x15   :  { %627 = vmatpush3.xpose.msk.msra.mxu0 %vm38_vm0, %v300_v35  ;;  %683 = vmatpush3.xpose.msk.msra.mxu1 %vm38_vm0, %v300_v35 }
  0x16   :  { %628 = vmatprep.subr.msk.mxu0 %vm38_vm0, %v299_v36  ;;  %672 = vmatprep.subr.msk.mxu1 %vm38_vm0, %v299_v36 }
  0x17   :  { %55 = vadd.xlane.f32.xlu0 %v54_v22  ;;  %79 = vadd.xlane.f32.xlu1 %v78_v23 }
  0x19   :  { %629 = vmatpush3.xpose.msk.msra.mxu0 %vm38_vm0, %v299_v36  ;;  %684 = vmatpush3.xpose.msk.msra.mxu1 %vm38_vm0, %v299_v36 }
  0x1b   :  { %58 = vadd.xlane.f32.xlu0 %v57_v26  ;;  %82 = vadd.xlane.f32.xlu1 %v81_v27 }
  0x1f   :  { %61 = vadd.xlane.f32.xlu0 %v60_v30  ;;  %85 = vadd.xlane.f32.xlu1 %v84_v31 }
  0x8c   :  { %v41_v37 = vpop.xlane.xlu0 %40  ;;  %v44_v38 = vpop.xlane.xlu1 %43 }
  0x8d   :  { %v88_v39 = vmul.f32 0.03125, %v41_v37  ;;  %v89_v40 = vmul.f32 0.03125, %v44_v38 }
  0x8f   :  { %v902_v41 = vsub.f32 %v757_v0, %v88_v39  ;;  %v905_v42 = vsub.f32 %v762_v1, %v89_v40 }
  0x90   :  { %v65_v43 = vpop.xlane.xlu0 %64  ;;  %v68_v44 = vpop.xlane.xlu1 %67 }
  0x91   :  { %v96_v45 = vmul.f32 0.03125, %v65_v43  ;;  %v97_v46 = vmul.f32 0.03125, %v68_v44  ;;  %v120_v47 = vmul.f32 %v902_v41, %v902_v41  ;;  %v121_v48 = vmul.f32 %v905_v42, %v905_v42  ;;  %v296_v43 = vld [vmem:[%s1188_s3 + $0x20] sm:$0xff] }
  0x93   :  { %v912_v49 = vsub.f32 %v767_v2, %v96_v45  ;;  %v915_v50 = vsub.f32 %v776_v5, %v97_v46  ;;  %v136_v51 = vsel %vm38_vm0, %v120_v47, 0.0  ;;  %v139_v54 = vsel %vm38_vm0, %v121_v48, 0.0 }
  0x94   :  { %137 = vadd.xlane.f32.xlu0 %v136_v51  ;;  %v47_v52 = vpop.xlane.xlu0 %46  ;;  %v71_v53 = vpop.xlane.xlu1 %70 }
  0x95   :  { %v90_v55 = vmul.f32 0.03125, %v47_v52  ;;  %v98_v56 = vmul.f32 0.03125, %v71_v53  ;;  %v128_v57 = vmul.f32 %v912_v49, %v912_v49  ;;  %v129_v58 = vmul.f32 %v915_v50, %v915_v50 }
  0x97   :  { %v924_v59 = vsub.f32 %v785_v8, %v90_v55  ;;  %v927_v60 = vsub.f32 %v790_v9, %v98_v56  ;;  %v160_v61 = vsel %vm38_vm0, %v128_v57, 0.0  ;;  %v163_v0 = vsel %vm38_vm0, %v129_v58, 0.0 }
  0x98   :  { %140 = vadd.xlane.f32.xlu0 %v139_v54  ;;  %161 = vadd.xlane.f32.xlu1 %v160_v61  ;;  %v50_v62 = vpop.xlane.xlu0 %49  ;;  %v74_v63 = vpop.xlane.xlu1 %73  ;;  %v295_v54 = vld [vmem:[%s1188_s3 + $0x18] sm:$0xff] }
  0x99   :  { %v91_v1 = vmul.f32 0.03125, %v50_v62  ;;  %v99_v2 = vmul.f32 0.03125, %v74_v63  ;;  %v122_v3 = vmul.f32 %v924_v59, %v924_v59  ;;  %v130_v4 = vmul.f32 %v927_v60, %v927_v60 }
  0x9b   :  { %v936_v5 = vsub.f32 %v799_v12, %v91_v1  ;;  %v939_v6 = vsub.f32 %v804_v13, %v99_v2  ;;  %v142_v7 = vsel %vm38_vm0, %v122_v3, 0.0  ;;  %v166_v10 = vsel %vm38_vm0, %v130_v4, 0.0  ;;  %v298_v13 = vld [vmem:[%s1188_s3 + $0x30] sm:$0xff]  ;;  %v292_v1 = vld [vmem:[%s1188_s3] sm:$0xff] }
  0x9c   :  { %164 = vadd.xlane.f32.xlu1 %v163_v0  ;;  %143 = vadd.xlane.f32.xlu0 %v142_v7  ;;  %v53_v8 = vpop.xlane.xlu0 %52  ;;  %v77_v9 = vpop.xlane.xlu1 %76  ;;  %v293_v0 = vld [vmem:[%s1188_s3 + $0x8] sm:$0xff] }
  0x9d   :  { %v92_v11 = vmul.f32 0.03125, %v53_v8  ;;  %v100_v14 = vmul.f32 0.03125, %v77_v9  ;;  %v123_v15 = vmul.f32 %v936_v5, %v936_v5  ;;  %v131_v12 = vmul.f32 %v939_v6, %v939_v6  ;;  %630 = vmatprep.subr.msk.mxu0 %vm38_vm0, %v298_v13  ;;  %673 = vmatprep.subr.msk.mxu1 %vm38_vm0, %v298_v13 }
  0x9e   :  { %631 = vmatpush3.xpose.msk.msra.mxu0 %vm38_vm0, %v298_v13  ;;  %685 = vmatpush3.xpose.msk.msra.mxu1 %vm38_vm0, %v298_v13 }
  0x9f   :  { %v953_v18 = vsub.f32 %v813_v16, %v92_v11  ;;  %v956_v19 = vsub.f32 %v818_v17, %v100_v14  ;;  %v145_v22 = vsel %vm38_vm0, %v123_v15, 0.0  ;;  %v169_v27 = vsel %vm38_vm0, %v131_v12, 0.0  ;;  %632 = vmatprep.subr.msk.mxu0 %vm38_vm0, %v297_v32  ;;  %674 = vmatprep.subr.msk.mxu1 %vm38_vm0, %v297_v32 }
  0xa0   :  { %167 = vadd.xlane.f32.xlu1 %v166_v10  ;;  %146 = vadd.xlane.f32.xlu0 %v145_v22  ;;  %v56_v23 = vpop.xlane.xlu0 %55  ;;  %v80_v26 = vpop.xlane.xlu1 %79 }
  0xa1   :  { %v93_v30 = vmul.f32 0.03125, %v56_v23  ;;  %v101_v31 = vmul.f32 0.03125, %v80_v26  ;;  %v124_v16 = vmul.f32 %v953_v18, %v953_v18  ;;  %v132_v17 = vmul.f32 %v956_v19, %v956_v19 }
  0xa2   :  { %633 = vmatpush3.xpose.msk.msra.mxu0 %vm38_vm0, %v297_v32  ;;  %686 = vmatpush3.xpose.msk.msra.mxu1 %vm38_vm0, %v297_v32 }
  0xa3   :  { %v970_v33 = vsub.f32 %v827_v20, %v93_v30  ;;  %v973_v34 = vsub.f32 %v832_v21, %v101_v31  ;;  %v148_v35 = vsel %vm38_vm0, %v124_v16, 0.0  ;;  %v172_v38 = vsel %vm38_vm0, %v132_v17, 0.0  ;;  %634 = vmatprep.subr.msk.mxu0 %vm38_vm0, %v296_v43  ;;  %675 = vmatprep.subr.msk.mxu1 %vm38_vm0, %v296_v43 }
  0xa4   :  { %170 = vadd.xlane.f32.xlu1 %v169_v27  ;;  %149 = vadd.xlane.f32.xlu0 %v148_v35  ;;  %v59_v36 = vpop.xlane.xlu0 %58  ;;  %v83_v37 = vpop.xlane.xlu1 %82 }
  0xa5   :  { %v94_v39 = vmul.f32 0.03125, %v59_v36  ;;  %v102_v40 = vmul.f32 0.03125, %v83_v37  ;;  %v125_v20 = vmul.f32 %v970_v33, %v970_v33  ;;  %v133_v21 = vmul.f32 %v973_v34, %v973_v34 }
  0xa6   :  { %635 = vmatpush3.xpose.msk.msra.mxu0 %vm38_vm0, %v296_v43  ;;  %687 = vmatpush3.xpose.msk.msra.mxu1 %vm38_vm0, %v296_v43 }
  0xa7   :  { %v989_v44 = vsub.f32 %v841_v24, %v94_v39  ;;  %v992_v45 = vsub.f32 %v846_v25, %v102_v40  ;;  %v151_v46 = vsel %vm38_vm0, %v125_v20, 0.0  ;;  %v175_v51 = vsel %vm38_vm0, %v133_v21, 0.0  ;;  %636 = vmatprep.subr.msk.mxu0 %vm38_vm0, %v295_v54  ;;  %676 = vmatprep.subr.msk.mxu1 %vm38_vm0, %v295_v54  ;;  %v1049_v40 = vld [vmem:[%s1189_s1] ss:$0 sm:$0xff] }
  0xa8   :  { %173 = vadd.xlane.f32.xlu1 %v172_v38  ;;  %152 = vadd.xlane.f32.xlu0 %v151_v46  ;;  %v62_v47 = vpop.xlane.xlu0 %61  ;;  %v86_v48 = vpop.xlane.xlu1 %85 }
  0xa9   :  { %v95_v52 = vmul.f32 0.03125, %v62_v47  ;;  %v103_v53 = vmul.f32 0.03125, %v86_v48  ;;  %v126_v24 = vmul.f32 %v989_v44, %v989_v44  ;;  %v134_v25 = vmul.f32 %v992_v45, %v992_v45  ;;  %v1055_v48 = vld [vmem:[%s1190_s2] ss:$0 sm:$0xff] }
  0xaa   :  { %637 = vmatpush3.xpose.msk.msra.mxu0 %vm38_vm0, %v295_v54  ;;  %688 = vmatpush3.xpose.msk.msra.mxu1 %vm38_vm0, %v295_v54 }
  0xab   :  { %v1008_v55 = vsub.f32 %v855_v28, %v95_v52  ;;  %v1011_v56 = vsub.f32 %v860_v29, %v103_v53  ;;  %v154_v57 = vsel %vm38_vm0, %v126_v24, 0.0  ;;  %v178_v58 = vsel %vm38_vm0, %v134_v25, 0.0  ;;  %v294_v29 = vld [vmem:[%s1188_s3 + $0x10] sm:$0xff] }
  0xac   :  { %176 = vadd.xlane.f32.xlu1 %v175_v51  ;;  %155 = vadd.xlane.f32.xlu0 %v154_v57 }
  0xad   :  { %v127_v61 = vmul.f32 %v1008_v55, %v1008_v55  ;;  %v135_v28 = vmul.f32 %v1011_v56, %v1011_v56  ;;  %638 = vmatprep.subr.msk.mxu0 %vm38_vm0, %v294_v29  ;;  %677 = vmatprep.subr.msk.mxu1 %vm38_vm0, %v294_v29 }
  0xae   :  { %639 = vmatpush3.xpose.msk.msra.mxu0 %vm38_vm0, %v294_v29  ;;  %689 = vmatpush3.xpose.msk.msra.mxu1 %vm38_vm0, %v294_v29 }
  0xaf   :  { %v157_v62 = vsel %vm38_vm0, %v127_v61, 0.0  ;;  %v181_v63 = vsel %vm38_vm0, %v135_v28, 0.0  ;;  %640 = vmatprep.subr.msk.mxu0 %vm38_vm0, %v293_v0  ;;  %678 = vmatprep.subr.msk.mxu1 %vm38_vm0, %v293_v0 }
  0xb0   :  { %179 = vadd.xlane.f32.xlu1 %v178_v58  ;;  %158 = vadd.xlane.f32.xlu0 %v157_v62 }
  0xb2   :  { %641 = vmatpush3.xpose.msk.msra.mxu0 %vm38_vm0, %v293_v0  ;;  %690 = vmatpush3.xpose.msk.msra.mxu1 %vm38_vm0, %v293_v0 }
  0xb3   :  { %642 = vmatprep.subr.msk.mxu0 %vm38_vm0, %v292_v1  ;;  %679 = vmatprep.subr.msk.mxu1 %vm38_vm0, %v292_v1 }
  0xb4   :  { %182 = vadd.xlane.f32.xlu1 %v181_v63 }
  0xb6   :  { %643 = vmatpush3.xpose.msk.msra.mxu0 %vm38_vm0, %v292_v1  ;;  %691 = vmatpush3.xpose.msk.msra.mxu1 %vm38_vm0, %v292_v1 }
 0x11d   :  { %v138_v2 = vpop.xlane.xlu0 %137 }
 0x11e   :  { %v184_v3 = vmul.f32 0.03125, %v138_v2 }
 0x120   :  { %v200_v4 = vadd.f32 1e-05, %v184_v3 }
 0x121   :  { %v162_v7 = vpop.xlane.xlu1 %161  ;;  %v141_v8 = vpop.xlane.xlu0 %140 }
 0x122   :  { %692 = vrsqrt.f32 %v200_v4  ;;  %v192_v9 = vmul.f32 0.03125, %v162_v7  ;;  %v185_v10 = vmul.f32 0.03125, %v141_v8 }
 0x124   :  { %v208_v11 = vadd.f32 1e-05, %v192_v9  ;;  %v201_v14 = vadd.f32 1e-05, %v185_v10 }
 0x125   :  { %v165_v15 = vpop.xlane.xlu1 %164  ;;  %v144_v12 = vpop.xlane.xlu0 %143 }
 0x126   :  { %694 = vrsqrt.f32 %v208_v11  ;;  %v193_v13 = vmul.f32 0.03125, %v165_v15  ;;  %v186_v22 = vmul.f32 0.03125, %v144_v12 }
 0x127   :  { %696 = vrsqrt.f32 %v201_v14 }
 0x128   :  { %v209_v23 = vadd.f32 1e-05, %v193_v13  ;;  %v202_v26 = vadd.f32 1e-05, %v186_v22 }
 0x129   :  { %v168_v27 = vpop.xlane.xlu1 %167  ;;  %v147_v30 = vpop.xlane.xlu0 %146 }
 0x12a   :  { %698 = vrsqrt.f32 %v209_v23  ;;  %v194_v31 = vmul.f32 0.03125, %v168_v27  ;;  %v187_v16 = vmul.f32 0.03125, %v147_v30 }
 0x12b   :  { %700 = vrsqrt.f32 %v202_v26 }
 0x12c   :  { %v210_v17 = vadd.f32 1e-05, %v194_v31  ;;  %v203_v32 = vadd.f32 1e-05, %v187_v16 }
 0x12d   :  { %v171_v35 = vpop.xlane.xlu1 %170  ;;  %v150_v36 = vpop.xlane.xlu0 %149 }
 0x12e   :  { %702 = vrsqrt.f32 %v210_v17  ;;  %v195_v37 = vmul.f32 0.03125, %v171_v35  ;;  %v188_v38 = vmul.f32 0.03125, %v150_v36 }
 0x12f   :  { %v693_v39 = vpop.eup %692  ;;  %704 = vrsqrt.f32 %v203_v32 }
 0x130   :  { %v211_v20 = vadd.f32 1e-05, %v195_v37  ;;  %v204_v21 = vadd.f32 1e-05, %v188_v38  ;;  %v232_v43 = vmul.f32 %v693_v39, %v902_v41 }
 0x131   :  { %v174_v46 = vpop.xlane.xlu1 %173  ;;  %v153_v47 = vpop.xlane.xlu0 %152 }
 0x132   :  { %706 = vrsqrt.f32 %v211_v20  ;;  %v196_v51 = vmul.f32 0.03125, %v174_v46  ;;  %v189_v52 = vmul.f32 0.03125, %v153_v47  ;;  %v254_v53 = vmul.f32 %v1049_v40, %v232_v43 }
 0x133   :  { %v695_v24 = vpop.eup %694  ;;  %708 = vrsqrt.f32 %v204_v21 }
 0x134   :  { %v697_v25 = vpop.eup %696  ;;  %v212_v54 = vadd.f32 1e-05, %v196_v51  ;;  %v205_v57 = vadd.f32 1e-05, %v189_v52  ;;  %v276_v58 = vadd.f32 %v1055_v48, %v254_v53  ;;  %v240_v41 = vmul.f32 %v695_v24, %v912_v49 }
 0x135   :  { %v177_v61 = vpop.xlane.xlu1 %176  ;;  %v156_v28 = vpop.xlane.xlu0 %155  ;;  %v233_v29 = vmul.f32 %v697_v25, %v905_v42 }
 0x136   :  { %710 = vrsqrt.f32 %v212_v54  ;;  %v197_v62 = vmul.f32 0.03125, %v177_v61  ;;  %v190_v63 = vmul.f32 0.03125, %v156_v28  ;;  %644 = vmatprep.mubr.msk.f32.mxu0 %vm38_vm0, %v276_v58  ;;  %v262_v0 = vmul.f32 %v1049_v40, %v240_v41 }
 0x137   :  { %v699_v1 = vpop.eup %698  ;;  %712 = vrsqrt.f32 %v205_v57  ;;  %v255_v2 = vmul.f32 %v1049_v40, %v233_v29 }
 0x138   :  { %v701_v3 = vpop.eup %700  ;;  %v213_v4 = vadd.f32 1e-05, %v197_v62  ;;  %v206_v7 = vadd.f32 1e-05, %v190_v63  ;;  %v284_v49 = vadd.f32 %v1055_v48, %v262_v0  ;;  %v241_v8 = vmul.f32 %v699_v1, %v915_v50 }
 0x139   :  { %v180_v9 = vpop.xlane.xlu1 %179  ;;  %v159_v42 = vpop.xlane.xlu0 %158  ;;  %v277_v10 = vadd.f32 %v1055_v48, %v255_v2  ;;  %v234_v11 = vmul.f32 %v701_v3, %v924_v59 }
 0x13a   :  { %714 = vrsqrt.f32 %v213_v4  ;;  %v198_v14 = vmul.f32 0.03125, %v180_v9  ;;  %v191_v15 = vmul.f32 0.03125, %v159_v42  ;;  %656 = vmatprep.mubr.msk.f32.mxu1 %vm38_vm0, %v284_v49  ;;  %v263_v12 = vmul.f32 %v1049_v40, %v241_v8  ;;  %v563_v49 = vld [vmem:[%s1191_s4] ss:$0 sm:$0xff] }
 0x13b   :  { %v703_v13 = vpop.eup %702  ;;  %716 = vrsqrt.f32 %v206_v7  ;;  %645 = vmatmul.mubr.msk.f32.vlgmr.msra.gmra.mxu0 %vm38_vm0, %v277_v10  ;;  %v256_v22 = vmul.f32 %v1049_v40, %v234_v11 }
 0x13c   :  { %v705_v50 = vpop.eup %704  ;;  %v214_v23 = vadd.f32 1e-05, %v198_v14  ;;  %v207_v26 = vadd.f32 1e-05, %v191_v15  ;;  %v285_v27 = vadd.f32 %v1055_v48, %v263_v12  ;;  %v242_v59 = vmul.f32 %v703_v13, %v927_v60 }
 0x13d   :  { %v183_v30 = vpop.xlane.xlu1 %182  ;;  %v278_v31 = vadd.f32 %v1055_v48, %v256_v22  ;;  %v235_v16 = vmul.f32 %v705_v50, %v936_v5 }
 0x13e   :  { %718 = vrsqrt.f32 %v214_v23  ;;  %v199_v17 = vmul.f32 0.03125, %v183_v30  ;;  %657 = vmatmul.mubr.msk.f32.vlgmr.msra.gmra.mxu1 %vm38_vm0, %v285_v27  ;;  %v264_v32 = vmul.f32 %v1049_v40, %v242_v59 }
 0x13f   :  { %v707_v35 = vpop.eup %706  ;;  %720 = vrsqrt.f32 %v207_v26  ;;  %647 = vmatprep.mubr.msk.f32.mxu0 %vm38_vm0, %v278_v31  ;;  %v257_v36 = vmul.f32 %v1049_v40, %v235_v16 }
 0x140   :  { %v709_v37 = vpop.eup %708  ;;  %v215_v38 = vadd.f32 1e-05, %v199_v17  ;;  %v286_v60 = vadd.f32 %v1055_v48, %v264_v32  ;;  %v243_v39 = vmul.f32 %v707_v35, %v939_v6 }
 0x141   :  { %v279_v5 = vadd.f32 %v1055_v48, %v257_v36  ;;  %v236_v20 = vmul.f32 %v709_v37, %v953_v18 }
 0x142   :  { %722 = vrsqrt.f32 %v215_v38  ;;  %659 = vmatprep.mubr.msk.f32.mxu1 %vm38_vm0, %v286_v60  ;;  %v265_v21 = vmul.f32 %v1049_v40, %v243_v39 }
 0x143   :  { %v711_v43 = vpop.eup %710  ;;  %648 = vmatmul.mubr.msk.f32.gmra.mxu0 %vm38_vm0, %v279_v5  ;;  %v258_v46 = vmul.f32 %v1049_v40, %v236_v20 }
 0x144   :  { %v713_v47 = vpop.eup %712  ;;  %v287_v51 = vadd.f32 %v1055_v48, %v265_v21  ;;  %v244_v52 = vmul.f32 %v711_v43, %v956_v19 }
 0x145   :  { %v280_v6 = vadd.f32 %v1055_v48, %v258_v46  ;;  %v237_v53 = vmul.f32 %v713_v47, %v970_v33 }
 0x146   :  { %660 = vmatmul.mubr.msk.f32.gmra.mxu1 %vm38_vm0, %v287_v51  ;;  %v266_v18 = vmul.f32 %v1049_v40, %v244_v52 }
 0x147   :  { %v715_v24 = vpop.eup %714  ;;  %650 = vmatprep.mubr.msk.f32.mxu0 %vm38_vm0, %v280_v6  ;;  %v259_v25 = vmul.f32 %v1049_v40, %v237_v53 }
 0x148   :  { %v717_v54 = vpop.eup %716  ;;  %v288_v57 = vadd.f32 %v1055_v48, %v266_v18  ;;  %v245_v58 = vmul.f32 %v715_v24, %v973_v34 }
 0x149   :  { %v281_v19 = vadd.f32 %v1055_v48, %v259_v25  ;;  %v238_v41 = vmul.f32 %v717_v54, %v989_v44 }
 0x14a   :  { %662 = vmatprep.mubr.msk.f32.mxu1 %vm38_vm0, %v288_v57  ;;  %v267_v33 = vmul.f32 %v1049_v40, %v245_v58 }
 0x14b   :  { %v719_v61 = vpop.eup %718  ;;  %651 = vmatmul.mubr.msk.f32.gmra.mxu0 %vm38_vm0, %v281_v19  ;;  %v260_v28 = vmul.f32 %v1049_v40, %v238_v41 }
 0x14c   :  { %v721_v29 = vpop.eup %720  ;;  %v289_v62 = vadd.f32 %v1055_v48, %v267_v33  ;;  %v246_v63 = vmul.f32 %v719_v61, %v992_v45 }
 0x14d   :  { %v282_v34 = vadd.f32 %v1055_v48, %v260_v28  ;;  %v239_v0 = vmul.f32 %v721_v29, %v1008_v55 }
 0x14e   :  { %663 = vmatmul.mubr.msk.f32.gmra.mxu1 %vm38_vm0, %v289_v62  ;;  %v268_v44 = vmul.f32 %v1049_v40, %v246_v63 }
 0x14f   :  { %v723_v1 = vpop.eup %722  ;;  %653 = vmatprep.mubr.msk.f32.mxu0 %vm38_vm0, %v282_v34  ;;  %v261_v2 = vmul.f32 %v1049_v40, %v239_v0 }
 0x150   :  { %v290_v3 = vadd.f32 %v1055_v48, %v268_v44  ;;  %v247_v4 = vmul.f32 %v723_v1, %v1011_v56 }
 0x151   :  { %v283_v7 = vadd.f32 %v1055_v48, %v261_v2 }
 0x152   :  { %665 = vmatprep.mubr.msk.f32.mxu1 %vm38_vm0, %v290_v3  ;;  %v269_v45 = vmul.f32 %v1049_v40, %v247_v4 }
 0x153   :  { %654 = vmatmul.mubr.msk.f32.gmra.mxu0 %vm38_vm0, %v283_v7 }
 0x154   :  { %v291_v55 = vadd.f32 %v1055_v48, %v269_v45 }
 0x156   :  { %666 = vmatmul.mubr.msk.f32.gmra.mxu1 %vm38_vm0, %v291_v55 }
 0x1fb   :  { %v646_v8 = vpop.f32.mrf.mxu0 }
 0x1fc   :  { %v467_v9 = vadd.f32 %v646_v8, %v563_v49 }
 0x1fd   :  { %v461_v56 = vpop.f32.mrf.mxu0 }
 0x1fe   :  { %542 = vst.msk [vmem:[%s1192_s5 + $0x8] sm:$0xff] %vm540_vm1, %v467_v9  ;;  %v462_v40 = vadd.f32 %v563_v49, %v461_v56  ;;  %v658_v42 = vpop.f32.mrf.mxu1 }
 0x1ff   :  { %v507_v10 = vadd.f32 %v658_v42, %v563_v49 }
 0x200   :  { %541 = vst.msk [vmem:[%s1192_s5] sm:$0xff] %vm540_vm1, %v462_v40  ;;  %v501_v48 = vpop.f32.mrf.mxu1 }
 0x201   :  { %550 = vst.msk [vmem:[%s1192_s5 + $0x48] sm:$0xff] %vm540_vm1, %v507_v10  ;;  %v502_v11 = vadd.f32 %v563_v49, %v501_v48 }
 0x203   :  { %549 = vst.msk [vmem:[%s1192_s5 + $0x40] sm:$0xff] %vm540_vm1, %v502_v11  ;;  %v649_v14 = vpop.f32.mrf.mxu0 }
 0x204   :  { %v477_v15 = vadd.f32 %v649_v14, %v563_v49 }
 0x205   :  { %v471_v12 = vpop.f32.mrf.mxu0 }
 0x206   :  { %544 = vst.msk [vmem:[%s1192_s5 + $0x18] sm:$0xff] %vm540_vm1, %v477_v15  ;;  %v472_v13 = vadd.f32 %v563_v49, %v471_v12  ;;  %v661_v22 = vpop.f32.mrf.mxu1 }
 0x207   :  { %v517_v50 = vadd.f32 %v661_v22, %v563_v49 }
 0x208   :  { %543 = vst.msk [vmem:[%s1192_s5 + $0x10] sm:$0xff] %vm540_vm1, %v472_v13  ;;  %v511_v23 = vpop.f32.mrf.mxu1 }
 0x209   :  { %552 = vst.msk [vmem:[%s1192_s5 + $0x58] sm:$0xff] %vm540_vm1, %v517_v50  ;;  %v512_v26 = vadd.f32 %v563_v49, %v511_v23 }
 0x20b   :  { %551 = vst.msk [vmem:[%s1192_s5 + $0x50] sm:$0xff] %vm540_vm1, %v512_v26  ;;  %v652_v27 = vpop.f32.mrf.mxu0 }
 0x20c   :  { %v487_v59 = vadd.f32 %v652_v27, %v563_v49 }
 0x20d   :  { %v481_v30 = vpop.f32.mrf.mxu0 }
 0x20e   :  { %546 = vst.msk [vmem:[%s1192_s5 + $0x28] sm:$0xff] %vm540_vm1, %v487_v59  ;;  %v482_v31 = vadd.f32 %v563_v49, %v481_v30  ;;  %v664_v16 = vpop.f32.mrf.mxu1 }
 0x20f   :  { %v527_v17 = vadd.f32 %v664_v16, %v563_v49 }
 0x210   :  { %545 = vst.msk [vmem:[%s1192_s5 + $0x20] sm:$0xff] %vm540_vm1, %v482_v31  ;;  %v521_v32 = vpop.f32.mrf.mxu1 }
 0x211   :  { %554 = vst.msk [vmem:[%s1192_s5 + $0x68] sm:$0xff] %vm540_vm1, %v527_v17  ;;  %v522_v35 = vadd.f32 %v563_v49, %v521_v32 }
 0x213   :  { %553 = vst.msk [vmem:[%s1192_s5 + $0x60] sm:$0xff] %vm540_vm1, %v522_v35  ;;  %v655_v36 = vpop.f32.mrf.mxu0 }
 0x214   :  { %v497_v37 = vadd.f32 %v655_v36, %v563_v49 }
 0x215   :  { %v491_v38 = vpop.f32.mrf.mxu0 }
 0x216   :  { %548 = vst.msk [vmem:[%s1192_s5 + $0x38] sm:$0xff] %vm540_vm1, %v497_v37  ;;  %v492_v60 = vadd.f32 %v563_v49, %v491_v38  ;;  %v667_v39 = vpop.f32.mrf.mxu1 }
 0x217   :  { %v537_v5 = vadd.f32 %v667_v39, %v563_v49 }
 0x218   :  { %547 = vst.msk [vmem:[%s1192_s5 + $0x30] sm:$0xff] %vm540_vm1, %v492_v60  ;;  %v531_v20 = vpop.f32.mrf.mxu1 }
 0x219   :  { %556 = vst.msk [vmem:[%s1192_s5 + $0x78] sm:$0xff] %vm540_vm1, %v537_v5  ;;  %v532_v21 = vadd.f32 %v563_v49, %v531_v20 }
 0x21b   :  { %555 = vst.msk [vmem:[%s1192_s5 + $0x70] sm:$0xff] %vm540_vm1, %v532_v21 }

// kernel: swin_encoder.10
= control target key start
LH: loop header
LB: loop body
LE: loop exit
PB: predicated region body
PF: predicated region fallthrough
CT: control target
= control target key end

     0   :  { %vm44_vm0 = vcmask 261120   ;;  %s633_s1 = inlined_call_operand.vmem [shape: f32[32,32], index: 1, kind: input, shape index: {}]   ;;  %s634_s0 = inlined_call_operand.vmem [shape: f32[128,32], index: 0, kind: input, shape index: {}]   ;;  %s635_s2 = inlined_call_operand.vmem [shape: f32[1,32], index: 2, kind: input, shape index: {}]   ;;  %s636_s3 = inlined_call_operand.vmem [shape: f32[128,32], index: 3, kind: input, shape index: {}]   ;;  %s637_s4 = inlined_call_operand.vmem [shape: f32[128,32], index: 4, kind: output, shape index: {}]  }
   0x1   :  { %v36_v0 = vld [vmem:[%s633_s1 + $0x18] sm:$0xff]  ;;  %v35_v1 = vld [vmem:[%s633_s1 + $0x10] sm:$0xff]  ;;  %v17_v2 = vld [vmem:[%s634_s0] sm:$0xff] }
   0x2   :  { %343 = vmatprep.subr.msk.mxu0 %vm44_vm0, %v36_v0  ;;  %375 = vmatprep.subr.msk.mxu1 %vm44_vm0, %v36_v0  ;;  %v25_v3 = vld [vmem:[%s634_s0 + $0x40] sm:$0xff]  ;;  %v34_v4 = vld [vmem:[%s633_s1 + $0x8] sm:$0xff]  ;;  %v19_v8 = vld [vmem:[%s634_s0 + $0x10] sm:$0xff] }
   0x3   :  { %344 = vmatpush3.xpose.msk.msra.mxu0 %vm44_vm0, %v36_v0  ;;  %379 = vmatpush3.xpose.msk.msra.mxu1 %vm44_vm0, %v36_v0  ;;  %v33_v5 = vld [vmem:[%s633_s1] sm:$0xff]  ;;  %v18_v6 = vld [vmem:[%s634_s0 + $0x8] sm:$0xff]  ;;  %v27_v9 = vld [vmem:[%s634_s0 + $0x50] sm:$0xff] }
   0x4   :  { %345 = vmatprep.subr.msk.mxu0 %vm44_vm0, %v35_v1  ;;  %376 = vmatprep.subr.msk.mxu1 %vm44_vm0, %v35_v1  ;;  %v26_v7 = vld [vmem:[%s634_s0 + $0x48] sm:$0xff]  ;;  %v20_v10 = vld [vmem:[%s634_s0 + $0x18] sm:$0xff]  ;;  %v21_v12 = vld [vmem:[%s634_s0 + $0x20] sm:$0xff] }
   0x5   :  { %351 = vmatprep.mubr.msk.f32.mxu0 %vm44_vm0, %v17_v2  ;;  %363 = vmatprep.mubr.msk.f32.mxu1 %vm44_vm0, %v25_v3  ;;  %v28_v11 = vld [vmem:[%s634_s0 + $0x58] sm:$0xff]  ;;  %v29_v13 = vld [vmem:[%s634_s0 + $0x60] sm:$0xff]  ;;  %v22_v14 = vld [vmem:[%s634_s0 + $0x28] sm:$0xff] }
   0x6   :  { %v30_v15 = vld [vmem:[%s634_s0 + $0x68] sm:$0xff]  ;;  %v23_v16 = vld [vmem:[%s634_s0 + $0x30] sm:$0xff]  ;;  %v24_v18 = vld [vmem:[%s634_s0 + $0x38] sm:$0xff] }
   0x7   :  { %346 = vmatpush3.xpose.msk.msra.mxu0 %vm44_vm0, %v35_v1  ;;  %380 = vmatpush3.xpose.msk.msra.mxu1 %vm44_vm0, %v35_v1  ;;  %v31_v17 = vld [vmem:[%s634_s0 + $0x70] sm:$0xff]  ;;  %v32_v19 = vld [vmem:[%s634_s0 + $0x78] sm:$0xff]  ;;  %v503_v20 = vld [vmem:[%s635_s2] ss:$0 sm:$0xff] }
   0x8   :  { %347 = vmatprep.subr.msk.mxu0 %vm44_vm0, %v34_v4  ;;  %377 = vmatprep.subr.msk.mxu1 %vm44_vm0, %v34_v4  ;;  %v251_v22 = vld [vmem:[%s636_s3 + $0x8] sm:$0xff]  ;;  %v250_v28 = vld [vmem:[%s636_s3] sm:$0xff]  ;;  %v253_v36 = vld [vmem:[%s636_s3 + $0x18] sm:$0xff] }
   0x9   :  { %v259_v24 = vld [vmem:[%s636_s3 + $0x48] sm:$0xff]  ;;  %v258_v30 = vld [vmem:[%s636_s3 + $0x40] sm:$0xff]  ;;  %v261_v38 = vld [vmem:[%s636_s3 + $0x58] sm:$0xff] }
   0xa   :  { %v252_v44 = vld [vmem:[%s636_s3 + $0x10] sm:$0xff]  ;;  %v255_v52 = vld [vmem:[%s636_s3 + $0x28] sm:$0xff]  ;;  %v254_v60 = vld [vmem:[%s636_s3 + $0x20] sm:$0xff] }
   0xb   :  { %348 = vmatpush3.xpose.msk.msra.mxu0 %vm44_vm0, %v34_v4  ;;  %381 = vmatpush3.xpose.msk.msra.mxu1 %vm44_vm0, %v34_v4  ;;  %v260_v46 = vld [vmem:[%s636_s3 + $0x50] sm:$0xff]  ;;  %v263_v54 = vld [vmem:[%s636_s3 + $0x68] sm:$0xff]  ;;  %v262_v62 = vld [vmem:[%s636_s3 + $0x60] sm:$0xff] }
   0xc   :  { %349 = vmatprep.subr.msk.mxu0 %vm44_vm0, %v33_v5  ;;  %378 = vmatprep.subr.msk.mxu1 %vm44_vm0, %v33_v5  ;;  %v257_v4 = vld [vmem:[%s636_s3 + $0x38] sm:$0xff] }
   0xf   :  { %350 = vmatpush3.xpose.msk.msra.mxu0 %vm44_vm0, %v33_v5  ;;  %382 = vmatpush3.xpose.msk.msra.mxu1 %vm44_vm0, %v33_v5 }
  0x12   :  { %352 = vmatmul.mubr.msk.f32.vlgmr.msra.gmra.mxu0 %vm44_vm0, %v18_v6  ;;  %364 = vmatmul.mubr.msk.f32.vlgmr.msra.gmra.mxu1 %vm44_vm0, %v26_v7  ;;  %v265_v6 = vld [vmem:[%s636_s3 + $0x78] sm:$0xff] }
  0x13   :  { %354 = vmatprep.mubr.msk.f32.mxu0 %vm44_vm0, %v19_v8  ;;  %366 = vmatprep.mubr.msk.f32.mxu1 %vm44_vm0, %v27_v9 }
  0x16   :  { %355 = vmatmul.mubr.msk.f32.gmra.mxu0 %vm44_vm0, %v20_v10  ;;  %367 = vmatmul.mubr.msk.f32.gmra.mxu1 %vm44_vm0, %v28_v11 }
  0x17   :  { %357 = vmatprep.mubr.msk.f32.mxu0 %vm44_vm0, %v21_v12  ;;  %369 = vmatprep.mubr.msk.f32.mxu1 %vm44_vm0, %v29_v13  ;;  %v256_v12 = vld [vmem:[%s636_s3 + $0x30] sm:$0xff] }
  0x1a   :  { %358 = vmatmul.mubr.msk.f32.gmra.mxu0 %vm44_vm0, %v22_v14  ;;  %370 = vmatmul.mubr.msk.f32.gmra.mxu1 %vm44_vm0, %v30_v15  ;;  %v264_v14 = vld [vmem:[%s636_s3 + $0x70] sm:$0xff] }
  0x1b   :  { %360 = vmatprep.mubr.msk.f32.mxu0 %vm44_vm0, %v23_v16  ;;  %372 = vmatprep.mubr.msk.f32.mxu1 %vm44_vm0, %v31_v17 }
  0x1e   :  { %361 = vmatmul.mubr.msk.f32.gmra.mxu0 %vm44_vm0, %v24_v18  ;;  %373 = vmatmul.mubr.msk.f32.gmra.mxu1 %vm44_vm0, %v32_v19 }
  0xd2   :  { %v353_v21 = vpop.f32.mrf.mxu0  ;;  %v365_v23 = vpop.f32.mrf.mxu1 }
  0xd3   :  { %v177_v25 = vadd.f32 %v353_v21, %v503_v20  ;;  %v217_v26 = vadd.f32 %v365_v23, %v503_v20 }
  0xd4   :  { %v171_v27 = vpop.f32.mrf.mxu0  ;;  %v211_v29 = vpop.f32.mrf.mxu1 }
  0xd5   :  { %v267_v31 = vadd.f32 %v251_v22, %v177_v25  ;;  %v275_v32 = vadd.f32 %v259_v24, %v217_v26  ;;  %v172_v33 = vadd.f32 %v503_v20, %v171_v27  ;;  %v212_v34 = vadd.f32 %v503_v20, %v211_v29 }
  0xd6   :  { %v356_v35 = vpop.f32.mrf.mxu0  ;;  %v368_v37 = vpop.f32.mrf.mxu1 }
  0xd7   :  { %283 = vst.msk [vmem:[%s637_s4 + $0x8] sm:$0xff] %vm44_vm0, %v267_v31  ;;  %291 = vst.msk [vmem:[%s637_s4 + $0x48] sm:$0xff] %vm44_vm0, %v275_v32  ;;  %v266_v39 = vadd.f32 %v250_v28, %v172_v33  ;;  %v274_v40 = vadd.f32 %v258_v30, %v212_v34  ;;  %v187_v41 = vadd.f32 %v356_v35, %v503_v20 }
  0xd8   :  { %v227_v42 = vadd.f32 %v368_v37, %v503_v20  ;;  %v181_v43 = vpop.f32.mrf.mxu0  ;;  %v221_v45 = vpop.f32.mrf.mxu1 }
  0xd9   :  { %282 = vst.msk [vmem:[%s637_s4] sm:$0xff] %vm44_vm0, %v266_v39  ;;  %290 = vst.msk [vmem:[%s637_s4 + $0x40] sm:$0xff] %vm44_vm0, %v274_v40  ;;  %v269_v47 = vadd.f32 %v253_v36, %v187_v41  ;;  %v182_v49 = vadd.f32 %v503_v20, %v181_v43  ;;  %v222_v50 = vadd.f32 %v503_v20, %v221_v45 }
  0xda   :  { %v277_v48 = vadd.f32 %v261_v38, %v227_v42  ;;  %v359_v51 = vpop.f32.mrf.mxu0  ;;  %v371_v53 = vpop.f32.mrf.mxu1 }
  0xdb   :  { %285 = vst.msk [vmem:[%s637_s4 + $0x18] sm:$0xff] %vm44_vm0, %v269_v47  ;;  %v268_v55 = vadd.f32 %v252_v44, %v182_v49  ;;  %v276_v56 = vadd.f32 %v260_v46, %v222_v50  ;;  %v197_v57 = vadd.f32 %v359_v51, %v503_v20  ;;  %v237_v58 = vadd.f32 %v371_v53, %v503_v20 }
  0xdc   :  { %293 = vst.msk [vmem:[%s637_s4 + $0x58] sm:$0xff] %vm44_vm0, %v277_v48  ;;  %v191_v59 = vpop.f32.mrf.mxu0  ;;  %v231_v61 = vpop.f32.mrf.mxu1 }
  0xdd   :  { %284 = vst.msk [vmem:[%s637_s4 + $0x10] sm:$0xff] %vm44_vm0, %v268_v55  ;;  %292 = vst.msk [vmem:[%s637_s4 + $0x50] sm:$0xff] %vm44_vm0, %v276_v56  ;;  %v271_v63 = vadd.f32 %v255_v52, %v197_v57  ;;  %v279_v0 = vadd.f32 %v263_v54, %v237_v58  ;;  %v192_v1 = vadd.f32 %v503_v20, %v191_v59 }
  0xde   :  { %v232_v2 = vadd.f32 %v503_v20, %v231_v61  ;;  %v362_v3 = vpop.f32.mrf.mxu0  ;;  %v374_v5 = vpop.f32.mrf.mxu1 }
  0xdf   :  { %287 = vst.msk [vmem:[%s637_s4 + $0x28] sm:$0xff] %vm44_vm0, %v271_v63  ;;  %295 = vst.msk [vmem:[%s637_s4 + $0x68] sm:$0xff] %vm44_vm0, %v279_v0  ;;  %v270_v7 = vadd.f32 %v254_v60, %v192_v1  ;;  %v207_v9 = vadd.f32 %v362_v3, %v503_v20  ;;  %v247_v10 = vadd.f32 %v374_v5, %v503_v20 }
  0xe0   :  { %v278_v8 = vadd.f32 %v262_v62, %v232_v2  ;;  %v201_v11 = vpop.f32.mrf.mxu0  ;;  %v241_v13 = vpop.f32.mrf.mxu1 }
  0xe1   :  { %286 = vst.msk [vmem:[%s637_s4 + $0x20] sm:$0xff] %vm44_vm0, %v270_v7  ;;  %v273_v15 = vadd.f32 %v257_v4, %v207_v9  ;;  %v281_v16 = vadd.f32 %v265_v6, %v247_v10  ;;  %v202_v17 = vadd.f32 %v503_v20, %v201_v11  ;;  %v242_v18 = vadd.f32 %v503_v20, %v241_v13 }
  0xe2   :  { %294 = vst.msk [vmem:[%s637_s4 + $0x60] sm:$0xff] %vm44_vm0, %v278_v8 }
  0xe3   :  { %289 = vst.msk [vmem:[%s637_s4 + $0x38] sm:$0xff] %vm44_vm0, %v273_v15  ;;  %297 = vst.msk [vmem:[%s637_s4 + $0x78] sm:$0xff] %vm44_vm0, %v281_v16  ;;  %v272_v19 = vadd.f32 %v256_v12, %v202_v17  ;;  %v280_v21 = vadd.f32 %v264_v14, %v242_v18 }
  0xe5   :  { %288 = vst.msk [vmem:[%s637_s4 + $0x30] sm:$0xff] %vm44_vm0, %v272_v19  ;;  %296 = vst.msk [vmem:[%s637_s4 + $0x70] sm:$0xff] %vm44_vm0, %v280_v21 }

// kernel: swin_encoder.11
= control target key start
LH: loop header
LB: loop body
LE: loop exit
PB: predicated region body
PF: predicated region fallthrough
CT: control target
= control target key end

     0   :  { %vm44_vm0 = vcmask 261120   ;;  %s1666_s0 = inlined_call_operand.vmem [shape: f32[128,32], index: 0, kind: input, shape index: {}]   ;;  %s1667_s3 = inlined_call_operand.vmem [shape: f32[128,32], index: 3, kind: input, shape index: {}]   ;;  %s1668_s1 = inlined_call_operand.vmem [shape: f32[1,32], index: 1, kind: input, shape index: {}]   ;;  %s1669_s2 = inlined_call_operand.vmem [shape: f32[1,32], index: 2, kind: input, shape index: {}]   ;;  %s1670_s5 = inlined_call_operand.vmem [shape: f32[32,128], index: 5, kind: input, shape index: {}]   ;;  %s1671_s4 = inlined_call_operand.vmem [shape: f32[1,128], index: 4, kind: input, shape index: {}]   ;;  %s1672_s6 = inlined_call_operand.vmem [shape: f32[1,32], index: 6, kind: input, shape index: {}]   ;;  %s1673_s7 = inlined_call_operand.vmem [shape: f32[128,32], index: 7, kind: output, shape index: {}]  }
   0x1   :  { %v1129_v0 = vld [vmem:[%s1666_s0] sm:$0xff]  ;;  %v1134_v1 = vld [vmem:[%s1666_s0 + $0x10] sm:$0xff]  ;;  %v1139_v2 = vld [vmem:[%s1666_s0 + $0x8] sm:$0xff] }
   0x2   :  { %v45_v3 = vsel %vm44_vm0, %v1129_v0, 0.0  ;;  %v51_v4 = vsel %vm44_vm0, %v1134_v1, 0.0  ;;  %v1148_v5 = vld [vmem:[%s1666_s0 + $0x18] sm:$0xff]  ;;  %v48_v6 = vsel %vm44_vm0, %v1139_v2, 0.0  ;;  %v1157_v8 = vld [vmem:[%s1666_s0 + $0x20] sm:$0xff]  ;;  %v1162_v9 = vld [vmem:[%s1666_s0 + $0x28] sm:$0xff] }
   0x3   :  { %46 = vadd.xlane.f32.xlu0 %v45_v3  ;;  %52 = vadd.xlane.f32.xlu1 %v51_v4  ;;  %v54_v7 = vsel %vm44_vm0, %v1148_v5, 0.0  ;;  %v57_v10 = vsel %vm44_vm0, %v1157_v8, 0.0  ;;  %v60_v11 = vsel %vm44_vm0, %v1162_v9, 0.0  ;;  %v1171_v12 = vld [vmem:[%s1666_s0 + $0x30] sm:$0xff]  ;;  %v1176_v13 = vld [vmem:[%s1666_s0 + $0x38] sm:$0xff]  ;;  %v1185_v16 = vld [vmem:[%s1666_s0 + $0x40] sm:$0xff] }
   0x4   :  { %v63_v14 = vsel %vm44_vm0, %v1171_v12, 0.0  ;;  %v66_v15 = vsel %vm44_vm0, %v1176_v13, 0.0  ;;  %v1190_v17 = vld [vmem:[%s1666_s0 + $0x48] sm:$0xff]  ;;  %v69_v18 = vsel %vm44_vm0, %v1185_v16, 0.0  ;;  %v1199_v20 = vld [vmem:[%s1666_s0 + $0x50] sm:$0xff]  ;;  %v1204_v21 = vld [vmem:[%s1666_s0 + $0x58] sm:$0xff] }
   0x5   :  { %v72_v19 = vsel %vm44_vm0, %v1190_v17, 0.0  ;;  %v75_v22 = vsel %vm44_vm0, %v1199_v20, 0.0  ;;  %v78_v23 = vsel %vm44_vm0, %v1204_v21, 0.0  ;;  %v1213_v24 = vld [vmem:[%s1666_s0 + $0x60] sm:$0xff]  ;;  %v1218_v25 = vld [vmem:[%s1666_s0 + $0x68] sm:$0xff]  ;;  %v1227_v28 = vld [vmem:[%s1666_s0 + $0x70] sm:$0xff] }
   0x6   :  { %v81_v26 = vsel %vm44_vm0, %v1213_v24, 0.0  ;;  %v84_v27 = vsel %vm44_vm0, %v1218_v25, 0.0  ;;  %v1232_v29 = vld [vmem:[%s1666_s0 + $0x78] sm:$0xff]  ;;  %v87_v30 = vsel %vm44_vm0, %v1227_v28, 0.0  ;;  %v312_v33 = vld [vmem:[%s1667_s3 + $0x70] sm:$0xff]  ;;  %v311_v34 = vld [vmem:[%s1667_s3 + $0x68] sm:$0xff] }
   0x7   :  { %49 = vadd.xlane.f32.xlu0 %v48_v6  ;;  %55 = vadd.xlane.f32.xlu1 %v54_v7  ;;  %v90_v31 = vsel %vm44_vm0, %v1232_v29, 0.0  ;;  %v313_v32 = vld [vmem:[%s1667_s3 + $0x78] sm:$0xff]  ;;  %v310_v35 = vld [vmem:[%s1667_s3 + $0x60] sm:$0xff]  ;;  %v308_v37 = vld [vmem:[%s1667_s3 + $0x50] sm:$0xff] }
   0x8   :  { %922 = vmatprep.subr.msk.mxu0 %vm44_vm0, %v313_v32  ;;  %v309_v36 = vld [vmem:[%s1667_s3 + $0x58] sm:$0xff]  ;;  %v307_v38 = vld [vmem:[%s1667_s3 + $0x48] sm:$0xff]  ;;  %v306_v39 = vld [vmem:[%s1667_s3 + $0x40] sm:$0xff] }
   0x9   :  { %923 = vmatpush3.xpose.msk.msra.mxu0 %vm44_vm0, %v313_v32  ;;  %v305_v40 = vld [vmem:[%s1667_s3 + $0x38] sm:$0xff] }
   0xa   :  { %924 = vmatprep.subr.msk.mxu0 %vm44_vm0, %v312_v33 }
   0xb   :  { %58 = vadd.xlane.f32.xlu0 %v57_v10  ;;  %61 = vadd.xlane.f32.xlu1 %v60_v11 }
   0xd   :  { %925 = vmatpush3.xpose.msk.msra.mxu0 %vm44_vm0, %v312_v33 }
   0xe   :  { %926 = vmatprep.subr.msk.mxu0 %vm44_vm0, %v311_v34 }
   0xf   :  { %64 = vadd.xlane.f32.xlu0 %v63_v14  ;;  %67 = vadd.xlane.f32.xlu1 %v66_v15 }
  0x11   :  { %927 = vmatpush3.xpose.msk.msra.mxu0 %vm44_vm0, %v311_v34 }
  0x12   :  { %928 = vmatprep.subr.msk.mxu0 %vm44_vm0, %v310_v35 }
  0x13   :  { %70 = vadd.xlane.f32.xlu0 %v69_v18  ;;  %73 = vadd.xlane.f32.xlu1 %v72_v19 }
  0x15   :  { %929 = vmatpush3.xpose.msk.msra.mxu0 %vm44_vm0, %v310_v35 }
  0x16   :  { %930 = vmatprep.subr.msk.mxu0 %vm44_vm0, %v309_v36 }
  0x17   :  { %76 = vadd.xlane.f32.xlu0 %v75_v22  ;;  %79 = vadd.xlane.f32.xlu1 %v78_v23 }
  0x19   :  { %931 = vmatpush3.xpose.msk.msra.mxu0 %vm44_vm0, %v309_v36 }
  0x1a   :  { %932 = vmatprep.subr.msk.mxu0 %vm44_vm0, %v308_v37 }
  0x1b   :  { %82 = vadd.xlane.f32.xlu0 %v81_v26  ;;  %85 = vadd.xlane.f32.xlu1 %v84_v27 }
  0x1d   :  { %933 = vmatpush3.xpose.msk.msra.mxu0 %vm44_vm0, %v308_v37 }
  0x1e   :  { %934 = vmatprep.subr.msk.mxu0 %vm44_vm0, %v307_v38 }
  0x1f   :  { %88 = vadd.xlane.f32.xlu0 %v87_v30  ;;  %91 = vadd.xlane.f32.xlu1 %v90_v31 }
  0x21   :  { %935 = vmatpush3.xpose.msk.msra.mxu0 %vm44_vm0, %v307_v38 }
  0x22   :  { %936 = vmatprep.subr.msk.mxu0 %vm44_vm0, %v306_v39 }
  0x25   :  { %937 = vmatpush3.xpose.msk.msra.mxu0 %vm44_vm0, %v306_v39 }
  0x26   :  { %938 = vmatprep.subr.msk.mxu0 %vm44_vm0, %v305_v40 }
  0x29   :  { %939 = vmatpush3.xpose.msk.msra.mxu0 %vm44_vm0, %v305_v40 }
  0x8c   :  { %v47_v41 = vpop.xlane.xlu0 %46  ;;  %v53_v42 = vpop.xlane.xlu1 %52 }
  0x8d   :  { %v94_v43 = vmul.f32 0.03125, %v47_v41  ;;  %v96_v44 = vmul.f32 0.03125, %v53_v42 }
  0x8f   :  { %v1284_v45 = vsub.f32 %v1129_v0, %v94_v43  ;;  %v1287_v46 = vsub.f32 %v1134_v1, %v96_v44 }
  0x90   :  { %v50_v47 = vpop.xlane.xlu0 %49  ;;  %v56_v48 = vpop.xlane.xlu1 %55 }
  0x91   :  { %v95_v49 = vmul.f32 0.03125, %v50_v47  ;;  %v97_v50 = vmul.f32 0.03125, %v56_v48  ;;  %v126_v51 = vmul.f32 %v1284_v45, %v1284_v45  ;;  %v128_v52 = vmul.f32 %v1287_v46, %v1287_v46 }
  0x93   :  { %v1294_v53 = vsub.f32 %v1139_v2, %v95_v49  ;;  %v1297_v54 = vsub.f32 %v1148_v5, %v97_v50  ;;  %v142_v55 = vsel %vm44_vm0, %v126_v51, 0.0  ;;  %v148_v58 = vsel %vm44_vm0, %v128_v52, 0.0 }
  0x94   :  { %143 = vadd.xlane.f32.xlu0 %v142_v55  ;;  %v59_v56 = vpop.xlane.xlu0 %58  ;;  %v62_v57 = vpop.xlane.xlu1 %61 }
  0x95   :  { %v98_v59 = vmul.f32 0.03125, %v59_v56  ;;  %v99_v60 = vmul.f32 0.03125, %v62_v57  ;;  %v127_v61 = vmul.f32 %v1294_v53, %v1294_v53  ;;  %v129_v62 = vmul.f32 %v1297_v54, %v1297_v54 }
  0x97   :  { %v1306_v63 = vsub.f32 %v1157_v8, %v98_v59  ;;  %v1309_v1 = vsub.f32 %v1162_v9, %v99_v60  ;;  %v145_v3 = vsel %vm44_vm0, %v127_v61, 0.0  ;;  %v151_v7 = vsel %vm44_vm0, %v129_v62, 0.0 }
  0x98   :  { %149 = vadd.xlane.f32.xlu0 %v148_v58  ;;  %146 = vadd.xlane.f32.xlu1 %v145_v3  ;;  %v65_v4 = vpop.xlane.xlu0 %64  ;;  %v68_v6 = vpop.xlane.xlu1 %67 }
  0x99   :  { %v100_v10 = vmul.f32 0.03125, %v65_v4  ;;  %v101_v11 = vmul.f32 0.03125, %v68_v6  ;;  %v130_v14 = vmul.f32 %v1306_v63, %v1306_v63  ;;  %v131_v8 = vmul.f32 %v1309_v1, %v1309_v1 }
  0x9b   :  { %v1318_v15 = vsub.f32 %v1171_v12, %v100_v10  ;;  %v1321_v18 = vsub.f32 %v1176_v13, %v101_v11  ;;  %v154_v19 = vsel %vm44_vm0, %v130_v14, 0.0  ;;  %v157_v26 = vsel %vm44_vm0, %v131_v8, 0.0  ;;  %v304_v13 = vld [vmem:[%s1667_s3 + $0x30] sm:$0xff]  ;;  %v299_v8 = vld [vmem:[%s1667_s3 + $0x8] sm:$0xff] }
  0x9c   :  { %152 = vadd.xlane.f32.xlu1 %v151_v7  ;;  %155 = vadd.xlane.f32.xlu0 %v154_v19  ;;  %v71_v22 = vpop.xlane.xlu0 %70  ;;  %v74_v23 = vpop.xlane.xlu1 %73  ;;  %v298_v19 = vld [vmem:[%s1667_s3] sm:$0xff] }
  0x9d   :  { %v102_v27 = vmul.f32 0.03125, %v71_v22  ;;  %v103_v30 = vmul.f32 0.03125, %v74_v23  ;;  %v132_v31 = vmul.f32 %v1318_v15, %v1318_v15  ;;  %v133_v12 = vmul.f32 %v1321_v18, %v1321_v18  ;;  %940 = vmatprep.subr.msk.mxu0 %vm44_vm0, %v304_v13 }
  0x9e   :  { %941 = vmatpush3.xpose.msk.msra.mxu0 %vm44_vm0, %v304_v13 }
  0x9f   :  { %v1334_v32 = vsub.f32 %v1185_v16, %v102_v27  ;;  %v1337_v33 = vsub.f32 %v1190_v17, %v103_v30  ;;  %v160_v34 = vsel %vm44_vm0, %v132_v31, 0.0  ;;  %v163_v37 = vsel %vm44_vm0, %v133_v12, 0.0  ;;  %v303_v17 = vld [vmem:[%s1667_s3 + $0x28] sm:$0xff] }
  0xa0   :  { %158 = vadd.xlane.f32.xlu1 %v157_v26  ;;  %161 = vadd.xlane.f32.xlu0 %v160_v34  ;;  %v77_v35 = vpop.xlane.xlu0 %76  ;;  %v80_v36 = vpop.xlane.xlu1 %79 }
  0xa1   :  { %v104_v38 = vmul.f32 0.03125, %v77_v35  ;;  %v105_v39 = vmul.f32 0.03125, %v80_v36  ;;  %v134_v40 = vmul.f32 %v1334_v32, %v1334_v32  ;;  %v135_v16 = vmul.f32 %v1337_v33, %v1337_v33  ;;  %942 = vmatprep.subr.msk.mxu0 %vm44_vm0, %v303_v17 }
  0xa2   :  { %943 = vmatpush3.xpose.msk.msra.mxu0 %vm44_vm0, %v303_v17 }
  0xa3   :  { %v1350_v41 = vsub.f32 %v1199_v20, %v104_v38  ;;  %v1353_v42 = vsub.f32 %v1204_v21, %v105_v39  ;;  %v166_v43 = vsel %vm44_vm0, %v134_v40, 0.0  ;;  %v169_v48 = vsel %vm44_vm0, %v135_v16, 0.0  ;;  %v302_v21 = vld [vmem:[%s1667_s3 + $0x20] sm:$0xff] }
  0xa4   :  { %164 = vadd.xlane.f32.xlu1 %v163_v37  ;;  %167 = vadd.xlane.f32.xlu0 %v166_v43  ;;  %v83_v44 = vpop.xlane.xlu0 %82  ;;  %v86_v47 = vpop.xlane.xlu1 %85 }
  0xa5   :  { %v106_v49 = vmul.f32 0.03125, %v83_v44  ;;  %v107_v50 = vmul.f32 0.03125, %v86_v47  ;;  %v136_v51 = vmul.f32 %v1350_v41, %v1350_v41  ;;  %v137_v20 = vmul.f32 %v1353_v42, %v1353_v42  ;;  %944 = vmatprep.subr.msk.mxu0 %vm44_vm0, %v302_v21 }
  0xa6   :  { %945 = vmatpush3.xpose.msk.msra.mxu0 %vm44_vm0, %v302_v21 }
  0xa7   :  { %v1367_v52 = vsub.f32 %v1213_v24, %v106_v49  ;;  %v1370_v55 = vsub.f32 %v1218_v25, %v107_v50  ;;  %v172_v56 = vsel %vm44_vm0, %v136_v51, 0.0  ;;  %v175_v59 = vsel %vm44_vm0, %v137_v20, 0.0  ;;  %v301_v25 = vld [vmem:[%s1667_s3 + $0x18] sm:$0xff] }
  0xa8   :  { %170 = vadd.xlane.f32.xlu1 %v169_v48  ;;  %173 = vadd.xlane.f32.xlu0 %v172_v56  ;;  %v89_v57 = vpop.xlane.xlu0 %88  ;;  %v92_v58 = vpop.xlane.xlu1 %91  ;;  %v1417_v56 = vld [vmem:[%s1668_s1] ss:$0 sm:$0xff] }
  0xa9   :  { %v108_v60 = vmul.f32 0.03125, %v89_v57  ;;  %v109_v61 = vmul.f32 0.03125, %v92_v58  ;;  %v138_v62 = vmul.f32 %v1367_v52, %v1367_v52  ;;  %v139_v24 = vmul.f32 %v1370_v55, %v1370_v55  ;;  %946 = vmatprep.subr.msk.mxu0 %vm44_vm0, %v301_v25 }
  0xaa   :  { %947 = vmatpush3.xpose.msk.msra.mxu0 %vm44_vm0, %v301_v25 }
  0xab   :  { %v1384_v3 = vsub.f32 %v1227_v28, %v108_v60  ;;  %v1387_v4 = vsub.f32 %v1232_v29, %v109_v61  ;;  %v178_v6 = vsel %vm44_vm0, %v138_v62, 0.0  ;;  %v181_v7 = vsel %vm44_vm0, %v139_v24, 0.0  ;;  %v300_v28 = vld [vmem:[%s1667_s3 + $0x10] sm:$0xff]  ;;  %v1423_v62 = vld [vmem:[%s1669_s2] ss:$0 sm:$0xff] }
  0xac   :  { %176 = vadd.xlane.f32.xlu1 %v175_v59  ;;  %179 = vadd.xlane.f32.xlu0 %v178_v6 }
  0xad   :  { %v140_v10 = vmul.f32 %v1384_v3, %v1384_v3  ;;  %v141_v11 = vmul.f32 %v1387_v4, %v1387_v4  ;;  %948 = vmatprep.subr.msk.mxu0 %vm44_vm0, %v300_v28 }
  0xae   :  { %949 = vmatpush3.xpose.msk.msra.mxu0 %vm44_vm0, %v300_v28 }
  0xaf   :  { %v184_v29 = vsel %vm44_vm0, %v140_v10, 0.0  ;;  %v187_v14 = vsel %vm44_vm0, %v141_v11, 0.0  ;;  %950 = vmatprep.subr.msk.mxu0 %vm44_vm0, %v299_v8 }
  0xb0   :  { %182 = vadd.xlane.f32.xlu1 %v181_v7  ;;  %185 = vadd.xlane.f32.xlu0 %v184_v29 }
  0xb2   :  { %951 = vmatpush3.xpose.msk.msra.mxu0 %vm44_vm0, %v299_v8 }
  0xb3   :  { %952 = vmatprep.subr.msk.mxu0 %vm44_vm0, %v298_v19 }
  0xb4   :  { %188 = vadd.xlane.f32.xlu1 %v187_v14 }
  0xb6   :  { %953 = vmatpush3.xpose.msk.msra.mxu0 %vm44_vm0, %v298_v19 }
 0x11d   :  { %v144_v22 = vpop.xlane.xlu0 %143 }
 0x11e   :  { %v190_v23 = vmul.f32 0.03125, %v144_v22 }
 0x120   :  { %v206_v26 = vadd.f32 1e-05, %v190_v23 }
 0x121   :  { %v147_v27 = vpop.xlane.xlu1 %146  ;;  %v150_v30 = vpop.xlane.xlu0 %149 }
 0x122   :  { %1010 = vrsqrt.f32 %v206_v26  ;;  %v191_v31 = vmul.f32 0.03125, %v147_v27  ;;  %v192_v12 = vmul.f32 0.03125, %v150_v30 }
 0x124   :  { %v207_v13 = vadd.f32 1e-05, %v191_v31  ;;  %v208_v34 = vadd.f32 1e-05, %v192_v12 }
 0x125   :  { %v153_v35 = vpop.xlane.xlu1 %152  ;;  %v156_v36 = vpop.xlane.xlu0 %155 }
 0x126   :  { %1012 = vrsqrt.f32 %v207_v13  ;;  %v193_v37 = vmul.f32 0.03125, %v153_v35  ;;  %v194_v38 = vmul.f32 0.03125, %v156_v36 }
 0x127   :  { %1014 = vrsqrt.f32 %v208_v34 }
 0x128   :  { %v209_v39 = vadd.f32 1e-05, %v193_v37  ;;  %v210_v40 = vadd.f32 1e-05, %v194_v38 }
 0x129   :  { %v159_v16 = vpop.xlane.xlu1 %158  ;;  %v162_v17 = vpop.xlane.xlu0 %161 }
 0x12a   :  { %1016 = vrsqrt.f32 %v209_v39  ;;  %v195_v43 = vmul.f32 0.03125, %v159_v16  ;;  %v196_v44 = vmul.f32 0.03125, %v162_v17 }
 0x12b   :  { %1018 = vrsqrt.f32 %v210_v40 }
 0x12c   :  { %v211_v47 = vadd.f32 1e-05, %v195_v43  ;;  %v212_v48 = vadd.f32 1e-05, %v196_v44 }
 0x12d   :  { %v165_v49 = vpop.xlane.xlu1 %164  ;;  %v168_v50 = vpop.xlane.xlu0 %167 }
 0x12e   :  { %1020 = vrsqrt.f32 %v211_v47  ;;  %v197_v51 = vmul.f32 0.03125, %v165_v49  ;;  %v198_v20 = vmul.f32 0.03125, %v168_v50 }
 0x12f   :  { %v1011_v21 = vpop.eup %1010  ;;  %1022 = vrsqrt.f32 %v212_v48 }
 0x130   :  { %v213_v57 = vadd.f32 1e-05, %v197_v51  ;;  %v214_v58 = vadd.f32 1e-05, %v198_v20  ;;  %v238_v59 = vmul.f32 %v1011_v21, %v1284_v45 }
 0x131   :  { %v171_v60 = vpop.xlane.xlu1 %170  ;;  %v174_v61 = vpop.xlane.xlu0 %173 }
 0x132   :  { %1024 = vrsqrt.f32 %v213_v57  ;;  %v199_v24 = vmul.f32 0.03125, %v171_v60  ;;  %v200_v25 = vmul.f32 0.03125, %v174_v61  ;;  %v260_v6 = vmul.f32 %v1417_v56, %v238_v59 }
 0x133   :  { %v1013_v7 = vpop.eup %1012  ;;  %1026 = vrsqrt.f32 %v214_v58 }
 0x134   :  { %v1015_v10 = vpop.eup %1014  ;;  %v215_v11 = vadd.f32 1e-05, %v199_v24  ;;  %v216_v28 = vadd.f32 1e-05, %v200_v25  ;;  %v282_v29 = vadd.f32 %v1423_v62, %v260_v6  ;;  %v239_v45 = vmul.f32 %v1013_v7, %v1294_v53 }
 0x135   :  { %v177_v14 = vpop.xlane.xlu1 %176  ;;  %v180_v8 = vpop.xlane.xlu0 %179  ;;  %v240_v19 = vmul.f32 %v1015_v10, %v1287_v46 }
 0x136   :  { %1028 = vrsqrt.f32 %v215_v11  ;;  %v201_v22 = vmul.f32 0.03125, %v177_v14  ;;  %v202_v23 = vmul.f32 0.03125, %v180_v8  ;;  %954 = vmatprep.mubr.msk.f32.mxu0 %vm44_vm0, %v282_v29  ;;  %v261_v26 = vmul.f32 %v1417_v56, %v239_v45 }
 0x137   :  { %v1017_v27 = vpop.eup %1016  ;;  %1030 = vrsqrt.f32 %v216_v28  ;;  %v262_v30 = vmul.f32 %v1417_v56, %v240_v19 }
 0x138   :  { %v1019_v31 = vpop.eup %1018  ;;  %v217_v12 = vadd.f32 1e-05, %v201_v22  ;;  %v218_v13 = vadd.f32 1e-05, %v202_v23  ;;  %v283_v53 = vadd.f32 %v1423_v62, %v261_v26  ;;  %v241_v34 = vmul.f32 %v1017_v27, %v1297_v54 }
 0x139   :  { %v183_v35 = vpop.xlane.xlu1 %182  ;;  %v186_v46 = vpop.xlane.xlu0 %185  ;;  %v284_v36 = vadd.f32 %v1423_v62, %v262_v30  ;;  %v242_v37 = vmul.f32 %v1019_v31, %v1306_v63 }
 0x13a   :  { %1032 = vrsqrt.f32 %v217_v12  ;;  %v203_v38 = vmul.f32 0.03125, %v183_v35  ;;  %v204_v39 = vmul.f32 0.03125, %v186_v46  ;;  %955 = vmatmul.mubr.msk.f32.vlgmr.msra.gmra.mxu0 %vm44_vm0, %v283_v53  ;;  %v263_v40 = vmul.f32 %v1417_v56, %v241_v34 }
 0x13b   :  { %v1021_v16 = vpop.eup %1020  ;;  %1034 = vrsqrt.f32 %v218_v13  ;;  %957 = vmatprep.mubr.msk.f32.mxu0 %vm44_vm0, %v284_v36  ;;  %v264_v17 = vmul.f32 %v1417_v56, %v242_v37  ;;  %v645_v36 = vld [vmem:[%s1670_s5 + $0x18] sm:$0xff]  ;;  %v1503_v37 = vld [vmem:[%s1671_s4] ss:$0 sm:$0xff] }
 0x13c   :  { %v1023_v54 = vpop.eup %1022  ;;  %v219_v43 = vadd.f32 1e-05, %v203_v38  ;;  %v220_v44 = vadd.f32 1e-05, %v204_v39  ;;  %v285_v47 = vadd.f32 %v1423_v62, %v263_v40  ;;  %v243_v63 = vmul.f32 %v1021_v16, %v1309_v1  ;;  %978 = vmatprep.subr.mxu1 %v645_v36 }
 0x13d   :  { %v189_v48 = vpop.xlane.xlu1 %188  ;;  %v286_v49 = vadd.f32 %v1423_v62, %v264_v17  ;;  %v244_v50 = vmul.f32 %v1023_v54, %v1318_v15  ;;  %979 = vmatpush3.xpose.msra.mxu1 %v645_v36 }
 0x13e   :  { %1036 = vrsqrt.f32 %v219_v43  ;;  %v205_v51 = vmul.f32 0.03125, %v189_v48  ;;  %958 = vmatmul.mubr.msk.f32.gmra.mxu0 %vm44_vm0, %v285_v47  ;;  %v265_v20 = vmul.f32 %v1417_v56, %v243_v63 }
 0x13f   :  { %v1025_v21 = vpop.eup %1024  ;;  %1038 = vrsqrt.f32 %v220_v44  ;;  %960 = vmatprep.mubr.msk.f32.mxu0 %vm44_vm0, %v286_v49  ;;  %v266_v57 = vmul.f32 %v1417_v56, %v244_v50 }
 0x140   :  { %v1027_v58 = vpop.eup %1026  ;;  %v221_v59 = vadd.f32 1e-05, %v205_v51  ;;  %v287_v1 = vadd.f32 %v1423_v62, %v265_v20  ;;  %v245_v60 = vmul.f32 %v1025_v21, %v1321_v18 }
 0x141   :  { %v288_v15 = vadd.f32 %v1423_v62, %v266_v57  ;;  %v246_v61 = vmul.f32 %v1027_v58, %v1334_v32 }
 0x142   :  { %1040 = vrsqrt.f32 %v221_v59  ;;  %961 = vmatmul.mubr.msk.f32.gmra.mxu0 %vm44_vm0, %v287_v1  ;;  %v267_v24 = vmul.f32 %v1417_v56, %v245_v60 }
 0x143   :  { %v1029_v25 = vpop.eup %1028  ;;  %963 = vmatprep.mubr.msk.f32.mxu0 %vm44_vm0, %v288_v15  ;;  %v268_v6 = vmul.f32 %v1417_v56, %v246_v61 }
 0x144   :  { %v1031_v7 = vpop.eup %1030  ;;  %v289_v10 = vadd.f32 %v1423_v62, %v267_v24  ;;  %v247_v11 = vmul.f32 %v1029_v25, %v1337_v33 }
 0x145   :  { %v290_v18 = vadd.f32 %v1423_v62, %v268_v6  ;;  %v248_v28 = vmul.f32 %v1031_v7, %v1350_v41 }
 0x146   :  { %964 = vmatmul.mubr.msk.f32.gmra.mxu0 %vm44_vm0, %v289_v10  ;;  %v269_v32 = vmul.f32 %v1417_v56, %v247_v11 }
 0x147   :  { %v1033_v29 = vpop.eup %1032  ;;  %966 = vmatprep.mubr.msk.f32.mxu0 %vm44_vm0, %v290_v18  ;;  %v270_v45 = vmul.f32 %v1417_v56, %v248_v28 }
 0x148   :  { %v1035_v14 = vpop.eup %1034  ;;  %v291_v8 = vadd.f32 %v1423_v62, %v269_v32  ;;  %v249_v19 = vmul.f32 %v1033_v29, %v1353_v42 }
 0x149   :  { %v292_v33 = vadd.f32 %v1423_v62, %v270_v45  ;;  %v250_v22 = vmul.f32 %v1035_v14, %v1367_v52 }
 0x14a   :  { %967 = vmatmul.mubr.msk.f32.gmra.mxu0 %vm44_vm0, %v291_v8  ;;  %v271_v41 = vmul.f32 %v1417_v56, %v249_v19 }
 0x14b   :  { %v1037_v23 = vpop.eup %1036  ;;  %969 = vmatprep.mubr.msk.f32.mxu0 %vm44_vm0, %v292_v33  ;;  %v272_v26 = vmul.f32 %v1417_v56, %v250_v22 }
 0x14c   :  { %v1039_v27 = vpop.eup %1038  ;;  %v293_v30 = vadd.f32 %v1423_v62, %v271_v41  ;;  %v251_v31 = vmul.f32 %v1037_v23, %v1370_v55 }
 0x14d   :  { %v294_v42 = vadd.f32 %v1423_v62, %v272_v26  ;;  %v252_v12 = vmul.f32 %v1039_v27, %v1384_v3 }
 0x14e   :  { %970 = vmatmul.mubr.msk.f32.gmra.mxu0 %vm44_vm0, %v293_v30  ;;  %v273_v52 = vmul.f32 %v1417_v56, %v251_v31 }
 0x14f   :  { %v1041_v13 = vpop.eup %1040  ;;  %972 = vmatprep.mubr.msk.f32.mxu0 %vm44_vm0, %v294_v42  ;;  %v274_v53 = vmul.f32 %v1417_v56, %v252_v12 }
 0x150   :  { %v295_v34 = vadd.f32 %v1423_v62, %v273_v52  ;;  %v253_v35 = vmul.f32 %v1041_v13, %v1387_v4  ;;  %v644_v4 = vld [vmem:[%s1670_s5 + $0x10] sm:$0xff] }
 0x151   :  { %v296_v46 = vadd.f32 %v1423_v62, %v274_v53  ;;  %980 = vmatprep.subr.mxu1 %v644_v4 }
 0x152   :  { %973 = vmatmul.mubr.msk.f32.gmra.mxu0 %vm44_vm0, %v295_v34  ;;  %v275_v55 = vmul.f32 %v1417_v56, %v253_v35  ;;  %981 = vmatpush3.xpose.msra.mxu1 %v644_v4  ;;  %v643_v56 = vld [vmem:[%s1670_s5 + $0x8] sm:$0xff] }
 0x153   :  { %975 = vmatprep.mubr.msk.f32.mxu0 %vm44_vm0, %v296_v46  ;;  %982 = vmatprep.subr.mxu1 %v643_v56 }
 0x154   :  { %v297_v3 = vadd.f32 %v1423_v62, %v275_v55  ;;  %v642_v62 = vld [vmem:[%s1670_s5] sm:$0xff] }
 0x156   :  { %976 = vmatmul.mubr.msk.f32.gmra.mxu0 %vm44_vm0, %v297_v3  ;;  %983 = vmatpush3.xpose.msra.mxu1 %v643_v56 }
 0x157   :  { %984 = vmatprep.subr.mxu1 %v642_v62 }
 0x15a   :  { %985 = vmatpush3.xpose.msra.mxu1 %v642_v62 }
 0x1fa   :  { %v956_v38 = vpop.f32.mrf.mxu0 }
 0x1fb   :  { %v489_v39 = vadd.f32 %v956_v38, %v1503_v37 }
 0x1fc   :  { %v483_v40 = vpop.f32.mrf.mxu0 }
 0x1fd   :  { %v579_v16 = vmul.f32 0.70710677, %v489_v39  ;;  %v484_v17 = vadd.f32 %v1503_v37, %v483_v40  ;;  %v563_v19 = vmul.f32 0.5, %v489_v39 }
 0x1fe   :  { %v959_v54 = vpop.f32.mrf.mxu0 }
 0x1ff   :  { %1042 = verf.f32 %v579_v16  ;;  %v578_v43 = vmul.f32 0.70710677, %v484_v17  ;;  %v499_v44 = vadd.f32 %v959_v54, %v1503_v37  ;;  %v562_v22 = vmul.f32 0.5, %v484_v17 }
 0x200   :  { %v493_v47 = vpop.f32.mrf.mxu0 }
 0x201   :  { %1044 = verf.f32 %v578_v43  ;;  %v581_v63 = vmul.f32 0.70710677, %v499_v44  ;;  %v494_v48 = vadd.f32 %v1503_v37, %v493_v47  ;;  %v565_v55 = vmul.f32 0.5, %v499_v44 }
 0x202   :  { %v962_v49 = vpop.f32.mrf.mxu0 }
 0x203   :  { %1046 = verf.f32 %v581_v63  ;;  %v580_v50 = vmul.f32 0.70710677, %v494_v48  ;;  %v509_v51 = vadd.f32 %v962_v49, %v1503_v37  ;;  %v564_v34 = vmul.f32 0.5, %v494_v48 }
 0x204   :  { %v503_v20 = vpop.f32.mrf.mxu0 }
 0x205   :  { %1048 = verf.f32 %v580_v50  ;;  %v583_v21 = vmul.f32 0.70710677, %v509_v51  ;;  %v504_v57 = vadd.f32 %v1503_v37, %v503_v20  ;;  %v567_v54 = vmul.f32 0.5, %v509_v51 }
 0x206   :  { %v965_v58 = vpop.f32.mrf.mxu0 }
 0x207   :  { %1050 = verf.f32 %v583_v21  ;;  %v582_v59 = vmul.f32 0.70710677, %v504_v57  ;;  %v1512_v1 = vadd.f32 %v965_v58, %v1503_v37  ;;  %v566_v43 = vmul.f32 0.5, %v504_v57 }
 0x208   :  { %v513_v60 = vpop.f32.mrf.mxu0 }
 0x209   :  { %1052 = verf.f32 %v582_v59  ;;  %v585_v15 = vmul.f32 0.70710677, %v1512_v1  ;;  %v514_v61 = vadd.f32 %v1503_v37, %v513_v60  ;;  %v569_v51 = vmul.f32 0.5, %v1512_v1 }
 0x20a   :  { %v968_v24 = vpop.f32.mrf.mxu0 }
 0x20b   :  { %1054 = verf.f32 %v585_v15  ;;  %v584_v25 = vmul.f32 0.70710677, %v514_v61  ;;  %v1517_v6 = vadd.f32 %v968_v24, %v1503_v37  ;;  %v568_v50 = vmul.f32 0.5, %v514_v61 }
 0x20c   :  { %v1043_v7 = vpop.eup %1042  ;;  %v523_v10 = vpop.f32.mrf.mxu0 }
 0x20d   :  { %1056 = verf.f32 %v584_v25  ;;  %v587_v11 = vmul.f32 0.70710677, %v1517_v6  ;;  %v1521_v18 = vadd.f32 %v1503_v37, %v523_v10  ;;  %v611_v29 = vadd.f32 1.0, %v1043_v7 }
 0x20e   :  { %v1045_v28 = vpop.eup %1044  ;;  %v971_v32 = vpop.f32.mrf.mxu0 }
 0x20f   :  { %1058 = verf.f32 %v587_v11  ;;  %v586_v45 = vmul.f32 0.70710677, %v1521_v18  ;;  %v1525_v14 = vadd.f32 %v971_v32, %v1503_v37  ;;  %v610_v41 = vadd.f32 1.0, %v1045_v28 }
 0x210   :  { %v1047_v8 = vpop.eup %1046  ;;  %v533_v33 = vpop.f32.mrf.mxu0  ;;  %v627_v42 = vmul.f32 %v611_v29, %v563_v19  ;;  %v570_v25 = vmul.f32 0.5, %v1521_v18  ;;  %v571_v11 = vmul.f32 0.5, %v1517_v6 }
 0x211   :  { %1060 = verf.f32 %v586_v45  ;;  %v589_v23 = vmul.f32 0.70710677, %v1525_v14  ;;  %v534_v26 = vadd.f32 %v1503_v37, %v533_v33  ;;  %v626_v31 = vmul.f32 %v610_v41, %v562_v22 }
 0x212   :  { %v1049_v27 = vpop.eup %1048  ;;  %v974_v30 = vpop.f32.mrf.mxu0  ;;  %v613_v13 = vadd.f32 1.0, %v1047_v8  ;;  %v573_v33 = vmul.f32 0.5, %v1525_v14 }
 0x213   :  { %1062 = verf.f32 %v589_v23  ;;  %v588_v12 = vmul.f32 0.70710677, %v534_v26  ;;  %v1530_v52 = vadd.f32 %v974_v30, %v1503_v37  ;;  %986 = vmatprep.mubr.f32.mxu1 %v626_v31  ;;  %v612_v46 = vadd.f32 1.0, %v1049_v27 }
 0x214   :  { %v1051_v53 = vpop.eup %1050  ;;  %v543_v35 = vpop.f32.mrf.mxu0  ;;  %987 = vmatmul.mubr.f32.vlgmr.msra.gmra.mxu1 %v627_v42  ;;  %v629_v16 = vmul.f32 %v613_v13, %v565_v55  ;;  %v572_v29 = vmul.f32 0.5, %v534_v26  ;;  %v1544_v55 = vld [vmem:[%s1672_s6] ss:$0 sm:$0xff] }
 0x215   :  { %1064 = verf.f32 %v588_v12  ;;  %v591_v3 = vmul.f32 0.70710677, %v1530_v52  ;;  %v544_v36 = vadd.f32 %v1503_v37, %v543_v35  ;;  %v628_v62 = vmul.f32 %v612_v46, %v564_v34 }
 0x216   :  { %v1053_v4 = vpop.eup %1052  ;;  %v977_v56 = vpop.f32.mrf.mxu0  ;;  %v615_v38 = vadd.f32 1.0, %v1051_v53  ;;  %v575_v31 = vmul.f32 0.5, %v1530_v52 }
 0x217   :  { %1066 = verf.f32 %v591_v3  ;;  %v590_v39 = vmul.f32 0.70710677, %v544_v36  ;;  %v559_v40 = vadd.f32 %v977_v56, %v1503_v37  ;;  %989 = vmatprep.mubr.f32.mxu1 %v628_v62  ;;  %v614_v47 = vadd.f32 1.0, %v1053_v4 }
 0x218   :  { %v1055_v17 = vpop.eup %1054  ;;  %v553_v44 = vpop.f32.mrf.mxu0  ;;  %990 = vmatmul.mubr.f32.gmra.mxu1 %v629_v16  ;;  %v631_v21 = vmul.f32 %v615_v38, %v567_v54  ;;  %v574_v41 = vmul.f32 0.5, %v544_v36 }
 0x219   :  { %1068 = verf.f32 %v590_v39  ;;  %v593_v63 = vmul.f32 0.70710677, %v559_v40  ;;  %v554_v48 = vadd.f32 %v1503_v37, %v553_v44  ;;  %v630_v20 = vmul.f32 %v614_v47, %v566_v43 }
 0x21a   :  { %v1057_v49 = vpop.eup %1056  ;;  %v617_v60 = vadd.f32 1.0, %v1055_v17  ;;  %v577_v14 = vmul.f32 0.5, %v559_v40 }
 0x21b   :  { %1070 = verf.f32 %v593_v63  ;;  %v592_v58 = vmul.f32 0.70710677, %v554_v48  ;;  %v616_v59 = vadd.f32 1.0, %v1057_v49  ;;  %992 = vmatprep.mubr.f32.mxu1 %v630_v20  ;;  %v576_v12 = vmul.f32 0.5, %v554_v48  ;;  %v1075_v48 = vld [vmem:[%s1666_s0 + $0x20] sm:$0xff] }
 0x21c   :  { %v1059_v15 = vpop.eup %1058  ;;  %993 = vmatmul.mubr.f32.gmra.mxu1 %v631_v21  ;;  %v633_v37 = vmul.f32 %v617_v60, %v569_v51  ;;  %v1077_v60 = vld [vmem:[%s1666_s0 + $0x30] sm:$0xff] }
 0x21d   :  { %1072 = verf.f32 %v592_v58  ;;  %v632_v57 = vmul.f32 %v616_v59, %v568_v50  ;;  %v619_v61 = vadd.f32 1.0, %v1059_v15 }
 0x21e   :  { %v1061_v24 = vpop.eup %1060 }
 0x21f   :  { %995 = vmatprep.mubr.f32.mxu1 %v632_v57  ;;  %v618_v7 = vadd.f32 1.0, %v1061_v24  ;;  %v635_v45 = vmul.f32 %v619_v61, %v571_v11  ;;  %v1078_v24 = vld [vmem:[%s1666_s0 + $0x48] sm:$0xff]  ;;  %v1079_v61 = vld [vmem:[%s1666_s0 + $0x40] sm:$0xff] }
 0x220   :  { %v1063_v10 = vpop.eup %1062  ;;  %996 = vmatmul.mubr.f32.gmra.mxu1 %v633_v37 }
 0x221   :  { %v634_v28 = vmul.f32 %v618_v7, %v570_v25  ;;  %v621_v8 = vadd.f32 1.0, %v1063_v10 }
 0x222   :  { %v1065_v32 = vpop.eup %1064 }
 0x223   :  { %998 = vmatprep.mubr.f32.mxu1 %v634_v28  ;;  %v620_v1 = vadd.f32 1.0, %v1065_v32  ;;  %v637_v23 = vmul.f32 %v621_v8, %v573_v33  ;;  %v1080_v32 = vld [vmem:[%s1666_s0 + $0x58] sm:$0xff]  ;;  %v1081_v8 = vld [vmem:[%s1666_s0 + $0x50] sm:$0xff] }
 0x224   :  { %v1067_v19 = vpop.eup %1066  ;;  %999 = vmatmul.mubr.f32.gmra.mxu1 %v635_v45 }
 0x225   :  { %v636_v18 = vmul.f32 %v620_v1, %v572_v29  ;;  %v623_v30 = vadd.f32 1.0, %v1067_v19 }
 0x226   :  { %v1069_v22 = vpop.eup %1068 }
 0x227   :  { %1001 = vmatprep.mubr.f32.mxu1 %v636_v18  ;;  %v622_v27 = vadd.f32 1.0, %v1069_v22  ;;  %v639_v13 = vmul.f32 %v623_v30, %v575_v31  ;;  %v1082_v22 = vld [vmem:[%s1666_s0 + $0x68] sm:$0xff]  ;;  %v1083_v30 = vld [vmem:[%s1666_s0 + $0x60] sm:$0xff] }
 0x228   :  { %v1071_v6 = vpop.eup %1070  ;;  %1002 = vmatmul.mubr.f32.gmra.mxu1 %v637_v23 }
 0x229   :  { %v638_v26 = vmul.f32 %v622_v27, %v574_v41  ;;  %v625_v34 = vadd.f32 1.0, %v1071_v6 }
 0x22a   :  { %v1073_v42 = vpop.eup %1072 }
 0x22b   :  { %1004 = vmatprep.mubr.f32.mxu1 %v638_v26  ;;  %v624_v53 = vadd.f32 1.0, %v1073_v42  ;;  %v641_v46 = vmul.f32 %v625_v34, %v577_v14  ;;  %v1084_v42 = vld [vmem:[%s1666_s0 + $0x78] sm:$0xff] }
 0x22c   :  { %1005 = vmatmul.mubr.f32.gmra.mxu1 %v639_v13 }
 0x22d   :  { %v640_v35 = vmul.f32 %v624_v53, %v576_v12  ;;  %v1085_v53 = vld [vmem:[%s1666_s0 + $0x70] sm:$0xff] }
 0x22f   :  { %1007 = vmatprep.mubr.f32.mxu1 %v640_v35 }
 0x230   :  { %1008 = vmatmul.mubr.f32.gmra.mxu1 %v641_v46 }
 0x2d4   :  { %v988_v52 = vpop.f32.mrf.mxu1 }
 0x2d5   :  { %v725_v3 = vadd.f32 %v988_v52, %v1544_v55 }
 0x2d6   :  { %v719_v36 = vpop.f32.mrf.mxu1 }
 0x2d7   :  { %v799_v4 = vadd.f32 %v725_v3, %v1139_v2  ;;  %v720_v56 = vadd.f32 %v1544_v55, %v719_v36 }
 0x2d8   :  { %v991_v62 = vpop.f32.mrf.mxu1 }
 0x2d9   :  { %815 = vst.msk [vmem:[%s1673_s7 + $0x8] sm:$0xff] %vm44_vm0, %v799_v4  ;;  %v798_v38 = vadd.f32 %v720_v56, %v1129_v0  ;;  %v735_v39 = vadd.f32 %v991_v62, %v1544_v55  ;;  %v1074_v0 = vld [vmem:[%s1666_s0 + $0x10] sm:$0xff] }
 0x2da   :  { %v729_v40 = vpop.f32.mrf.mxu1 }
 0x2db   :  { %814 = vst.msk [vmem:[%s1673_s7] sm:$0xff] %vm44_vm0, %v798_v38  ;;  %v801_v2 = vadd.f32 %v735_v39, %v1148_v5  ;;  %v730_v16 = vadd.f32 %v1544_v55, %v729_v40 }
 0x2dc   :  { %v994_v17 = vpop.f32.mrf.mxu1 }
 0x2dd   :  { %817 = vst.msk [vmem:[%s1673_s7 + $0x18] sm:$0xff] %vm44_vm0, %v801_v2  ;;  %v800_v54 = vadd.f32 %v1074_v0, %v730_v16  ;;  %v745_v43 = vadd.f32 %v994_v17, %v1544_v55 }
 0x2de   :  { %v739_v44 = vpop.f32.mrf.mxu1 }
 0x2df   :  { %816 = vst.msk [vmem:[%s1673_s7 + $0x10] sm:$0xff] %vm44_vm0, %v800_v54  ;;  %v803_v5 = vadd.f32 %v745_v43, %v1162_v9  ;;  %v740_v47 = vadd.f32 %v1544_v55, %v739_v44  ;;  %v1076_v9 = vld [vmem:[%s1666_s0 + $0x38] sm:$0xff] }
 0x2e0   :  { %v997_v63 = vpop.f32.mrf.mxu1 }
 0x2e1   :  { %819 = vst.msk [vmem:[%s1673_s7 + $0x28] sm:$0xff] %vm44_vm0, %v803_v5  ;;  %v802_v49 = vadd.f32 %v1075_v48, %v740_v47  ;;  %v755_v50 = vadd.f32 %v997_v63, %v1544_v55 }
 0x2e2   :  { %v749_v20 = vpop.f32.mrf.mxu1 }
 0x2e3   :  { %818 = vst.msk [vmem:[%s1673_s7 + $0x20] sm:$0xff] %vm44_vm0, %v802_v49  ;;  %v805_v21 = vadd.f32 %v1076_v9, %v755_v50  ;;  %v750_v58 = vadd.f32 %v1544_v55, %v749_v20 }
 0x2e4   :  { %v1000_v59 = vpop.f32.mrf.mxu1 }
 0x2e5   :  { %821 = vst.msk [vmem:[%s1673_s7 + $0x38] sm:$0xff] %vm44_vm0, %v805_v21  ;;  %v804_v15 = vadd.f32 %v1077_v60, %v750_v58  ;;  %v765_v51 = vadd.f32 %v1000_v59, %v1544_v55 }
 0x2e6   :  { %v759_v57 = vpop.f32.mrf.mxu1 }
 0x2e7   :  { %820 = vst.msk [vmem:[%s1673_s7 + $0x30] sm:$0xff] %vm44_vm0, %v804_v15  ;;  %v807_v25 = vadd.f32 %v1078_v24, %v765_v51  ;;  %v760_v37 = vadd.f32 %v1544_v55, %v759_v57 }
 0x2e8   :  { %v1003_v7 = vpop.f32.mrf.mxu1 }
 0x2e9   :  { %823 = vst.msk [vmem:[%s1673_s7 + $0x48] sm:$0xff] %vm44_vm0, %v807_v25  ;;  %v806_v10 = vadd.f32 %v1079_v61, %v760_v37  ;;  %v775_v11 = vadd.f32 %v1003_v7, %v1544_v55 }
 0x2ea   :  { %v769_v28 = vpop.f32.mrf.mxu1 }
 0x2eb   :  { %822 = vst.msk [vmem:[%s1673_s7 + $0x40] sm:$0xff] %vm44_vm0, %v806_v10  ;;  %v809_v29 = vadd.f32 %v1080_v32, %v775_v11  ;;  %v770_v45 = vadd.f32 %v1544_v55, %v769_v28 }
 0x2ec   :  { %v1006_v1 = vpop.f32.mrf.mxu1 }
 0x2ed   :  { %825 = vst.msk [vmem:[%s1673_s7 + $0x58] sm:$0xff] %vm44_vm0, %v809_v29  ;;  %v808_v19 = vadd.f32 %v1081_v8, %v770_v45  ;;  %v785_v33 = vadd.f32 %v1006_v1, %v1544_v55 }
 0x2ee   :  { %v779_v18 = vpop.f32.mrf.mxu1 }
 0x2ef   :  { %824 = vst.msk [vmem:[%s1673_s7 + $0x50] sm:$0xff] %vm44_vm0, %v808_v19  ;;  %v811_v41 = vadd.f32 %v1082_v22, %v785_v33  ;;  %v780_v23 = vadd.f32 %v1544_v55, %v779_v18 }
 0x2f0   :  { %v1009_v27 = vpop.f32.mrf.mxu1 }
 0x2f1   :  { %827 = vst.msk [vmem:[%s1673_s7 + $0x68] sm:$0xff] %vm44_vm0, %v811_v41  ;;  %v810_v6 = vadd.f32 %v1083_v30, %v780_v23  ;;  %v795_v31 = vadd.f32 %v1009_v27, %v1544_v55 }
 0x2f2   :  { %v789_v26 = vpop.f32.mrf.mxu1 }
 0x2f3   :  { %826 = vst.msk [vmem:[%s1673_s7 + $0x60] sm:$0xff] %vm44_vm0, %v810_v6  ;;  %v813_v12 = vadd.f32 %v1084_v42, %v795_v31  ;;  %v790_v13 = vadd.f32 %v1544_v55, %v789_v26 }
 0x2f5   :  { %829 = vst.msk [vmem:[%s1673_s7 + $0x78] sm:$0xff] %vm44_vm0, %v813_v12  ;;  %v812_v34 = vadd.f32 %v1085_v53, %v790_v13 }
 0x2f7   :  { %828 = vst.msk [vmem:[%s1673_s7 + $0x70] sm:$0xff] %vm44_vm0, %v812_v34 }

// kernel: swin_encoder.9
= control target key start
LH: loop header
LB: loop body
LE: loop exit
PB: predicated region body
PF: predicated region fallthrough
CT: control target
= control target key end

     0   :  { %vm81_vm0 = vcmask 64512   ;;  %s8031_s5 = smov 120   ;;  %vm810_vm1 = vcmask 130048   ;;  %s8032_s10 = smov 112   ;;  %vm6771_vm2 = vcmask 195584   ;;  %vm6788_vm3 = vcmask 261120   ;;  %s10585_s1 = inlined_call_operand.vmem [shape: f32[8,16,32], index: 1, kind: input, shape index: {}]   ;;  %s10586_s0 = inlined_call_operand.vmem [shape: f32[8,16,32], index: 0, kind: input, shape index: {}]   ;;  %s10587_s3 = inlined_call_operand.vmem [shape: f32[8,16,16], index: 3, kind: input, shape index: {}]   ;;  %s10588_s2 = inlined_call_operand.vmem [shape: f32[8,16,32], index: 2, kind: input, shape index: {}]   ;;  %s10589_s4 = inlined_call_operand.vmem [shape: f32[8,16,32], index: 4, kind: output, shape index: {}]  }
   0x1   :  { %v8065_v0 = vld [vmem:[%s10585_s1 + $0x8] sm:$0xff]  ;;  %v8070_v1 = vld [vmem:[%s10585_s1 + $0x18] sm:$0xff]  ;;  %v8075_v2 = vld [vmem:[%s10585_s1] sm:$0xff]  ;;  %s8033_s28 = smov 104   ;;  %s8034_s15 = smov 8  }
   0x2   :  { %7257 = vmatprep.subr.msk.mxu0 %vm81_vm0, %v8065_v0  ;;  %7264 = vmatprep.subr.msk.mxu1 %vm81_vm0, %v8070_v1  ;;  %v8084_v3 = vld [vmem:[%s10585_s1 + $0x10] sm:$0xff]  ;;  %v8089_v4 = vld [vmem:[%s10586_s0] sm:$0xff]  ;;  %v8111_v6 = vld [vmem:[%s10585_s1 + $0x38] sm:$0xff]  ;;  %s8035_s16 = smov 16  }
   0x3   :  { %7258 = vmatpush3.xpose.msk.msra.mxu0 %vm81_vm0, %v8065_v0  ;;  %7265 = vmatpush3.xpose.msk.msra.mxu1 %vm81_vm0, %v8070_v1  ;;  %v8098_v5 = vld [vmem:[%s10586_s0 + $0x10] sm:$0xff]  ;;  %v8116_v7 = vld [vmem:[%s10585_s1 + $0x28] sm:$0xff]  ;;  %v8132_v9 = vld [vmem:[%s10586_s0 + $0x18] sm:$0xff] }
   0x4   :  { %7259 = vmatprep.subr.msk.mxu0 %vm81_vm0, %v8075_v2  ;;  %7266 = vmatprep.subr.msk.mxu1 %vm81_vm0, %v8084_v3  ;;  %v8127_v8 = vld [vmem:[%s10586_s0 + $0x8] sm:$0xff]  ;;  %v8141_v10 = vld [vmem:[%s10585_s1 + $0x30] sm:$0xff]  ;;  %v8146_v11 = vld [vmem:[%s10585_s1 + $0x20] sm:$0xff] }
   0x5   :  { %7261 = vmatprep.mubr.msk.f32.mxu0 %vm81_vm0, %v8089_v4  ;;  %7268 = vmatprep.mubr.msk.f32.mxu1 %vm81_vm0, %v8098_v5  ;;  %v8157_v12 = vld [vmem:[%s10586_s0 + $0x30] sm:$0xff]  ;;  %v8162_v13 = vld [vmem:[%s10586_s0 + $0x20] sm:$0xff]  ;;  %v8177_v14 = vld [vmem:[%s10585_s1 + $0x58] sm:$0xff] }
   0x6   :  { %1732 = vrot.lane.b32.xlu1 %v8070_v1, %s8031_s5  ;;  %1641 = vrot.lane.b32.xlu0 %v8065_v0, %s8031_s5  ;;  %v8184_v15 = vld [vmem:[%s10585_s1 + $0x48] sm:$0xff]  ;;  %v8197_v16 = vld [vmem:[%s10586_s0 + $0x38] sm:$0xff] }
   0x7   :  { %7260 = vmatpush3.xpose.msk.msra.mxu0 %vm81_vm0, %v8075_v2  ;;  %7267 = vmatpush3.xpose.msk.msra.mxu1 %vm81_vm0, %v8084_v3  ;;  %v8202_v17 = vld [vmem:[%s10586_s0 + $0x28] sm:$0xff]  ;;  %v8211_v18 = vld [vmem:[%s10585_s1 + $0x50] sm:$0xff]  ;;  %v8216_v19 = vld [vmem:[%s10585_s1 + $0x40] sm:$0xff] }
   0x8   :  { %7278 = vmatprep.subr.msk.mxu1 %vm81_vm0, %v8111_v6  ;;  %7271 = vmatprep.subr.msk.mxu0 %vm81_vm0, %v8116_v7  ;;  %v8225_v20 = vld [vmem:[%s10586_s0 + $0x50] sm:$0xff]  ;;  %v8230_v21 = vld [vmem:[%s10586_s0 + $0x40] sm:$0xff]  ;;  %v8245_v22 = vld [vmem:[%s10585_s1 + $0x78] sm:$0xff] }
   0x9   :  { %v8252_v23 = vld [vmem:[%s10585_s1 + $0x68] sm:$0xff]  ;;  %v8265_v24 = vld [vmem:[%s10586_s0 + $0x58] sm:$0xff]  ;;  %v8279_v26 = vld [vmem:[%s10585_s1 + $0x70] sm:$0xff] }
   0xa   :  { %7262 = vmatmul.mubr.msk.f32.vlgmr.msra.gmra.mxu0 %vm81_vm0, %v8127_v8  ;;  %7269 = vmatmul.mubr.msk.f32.vlgmr.msra.gmra.mxu1 %vm81_vm0, %v8132_v9  ;;  %v8270_v25 = vld [vmem:[%s10586_s0 + $0x48] sm:$0xff]  ;;  %v8284_v27 = vld [vmem:[%s10585_s1 + $0x60] sm:$0xff]  ;;  %v8293_v28 = vld [vmem:[%s10586_s0 + $0x70] sm:$0xff] }
   0xb   :  { %7279 = vmatpush3.xpose.msk.msra.mxu1 %vm81_vm0, %v8111_v6  ;;  %7272 = vmatpush3.xpose.msk.msra.mxu0 %vm81_vm0, %v8116_v7  ;;  %v8298_v29 = vld [vmem:[%s10586_s0 + $0x60] sm:$0xff]  ;;  %v8321_v30 = vld [vmem:[%s10586_s0 + $0x78] sm:$0xff]  ;;  %v8326_v31 = vld [vmem:[%s10586_s0 + $0x68] sm:$0xff] }
   0xc   :  { %7280 = vmatprep.subr.msk.mxu1 %vm81_vm0, %v8141_v10  ;;  %7273 = vmatprep.subr.msk.mxu0 %vm81_vm0, %v8146_v11  ;;  %v8337_v34 = vld [vmem:[%s10587_s3 + $0x8] sm:$0xff]  ;;  %v8342_v35 = vld [vmem:[%s10587_s3 + $0x18] sm:$0xff]  ;;  %v8347_v40 = vld [vmem:[%s10587_s3] sm:$0xff] }
   0xd   :  { %7282 = vmatprep.mubr.msk.f32.mxu1 %vm81_vm0, %v8157_v12  ;;  %7275 = vmatprep.mubr.msk.f32.mxu0 %vm81_vm0, %v8162_v13  ;;  %10635 = vst [vmem:[#allocation2_spill] sm:$0xff] %v8337_v34  ;;  %10636 = vst [vmem:[#allocation3_spill] sm:$0xff] %v8342_v35  ;;  %v8358_v45 = vld [vmem:[%s10587_s3 + $0x10] sm:$0xff]  ;;  %v8375_v53 = vld [vmem:[%s10587_s3 + $0x38] sm:$0xff] }
   0xe   :  { %1639 = vrot.lane.b32.xlu1 %v8075_v2, %s8031_s5  ;;  %1635 = vrot.lane.b32.xlu0 %v8089_v4, %s8031_s5  ;;  %10637 = vst [vmem:[#allocation4_spill] sm:$0xff] %v8347_v40  ;;  %10638 = vst [vmem:[#allocation5_spill] sm:$0xff] %v8358_v45  ;;  %v8380_v54 = vld [vmem:[%s10587_s3 + $0x28] sm:$0xff]  ;;  %v8387_v60 = vld [vmem:[%s10587_s3 + $0x30] sm:$0xff] }
   0xf   :  { %7281 = vmatpush3.xpose.msk.msra.mxu1 %vm81_vm0, %v8141_v10  ;;  %7274 = vmatpush3.xpose.msk.msra.mxu0 %vm81_vm0, %v8146_v11  ;;  %10639 = vst [vmem:[#allocation6_spill] sm:$0xff] %v8375_v53  ;;  %10640 = vst [vmem:[#allocation7_spill] sm:$0xff] %v8380_v54  ;;  %v8392_v61 = vld [vmem:[%s10587_s3 + $0x20] sm:$0xff] }
  0x10   :  { %7292 = vmatprep.subr.msk.mxu1 %vm81_vm0, %v8177_v14  ;;  %7285 = vmatprep.subr.msk.mxu0 %vm81_vm0, %v8184_v15  ;;  %10641 = vst [vmem:[#allocation8_spill] sm:$0xff] %v8387_v60  ;;  %10642 = vst [vmem:[#allocation9_spill] sm:$0xff] %v8392_v61 }
  0x12   :  { %7283 = vmatmul.mubr.msk.f32.vlgmr.msra.gmra.mxu1 %vm81_vm0, %v8197_v16  ;;  %7276 = vmatmul.mubr.msk.f32.vlgmr.msra.gmra.mxu0 %vm81_vm0, %v8202_v17 }
  0x13   :  { %7293 = vmatpush3.xpose.msk.msra.mxu1 %vm81_vm0, %v8177_v14  ;;  %7286 = vmatpush3.xpose.msk.msra.mxu0 %vm81_vm0, %v8184_v15 }
  0x14   :  { %7294 = vmatprep.subr.msk.mxu1 %vm81_vm0, %v8211_v18  ;;  %7287 = vmatprep.subr.msk.mxu0 %vm81_vm0, %v8216_v19 }
  0x15   :  { %7296 = vmatprep.mubr.msk.f32.mxu1 %vm81_vm0, %v8225_v20  ;;  %7289 = vmatprep.mubr.msk.f32.mxu0 %vm81_vm0, %v8230_v21 }
  0x16   :  { %1730 = vrot.lane.b32.xlu1 %v8084_v3, %s8031_s5  ;;  %1823 = vrot.lane.b32.xlu0 %v8116_v7, %s8031_s5 }
  0x17   :  { %7295 = vmatpush3.xpose.msk.msra.mxu1 %vm81_vm0, %v8211_v18  ;;  %7288 = vmatpush3.xpose.msk.msra.mxu0 %vm81_vm0, %v8216_v19 }
  0x18   :  { %7306 = vmatprep.subr.msk.mxu1 %vm81_vm0, %v8245_v22  ;;  %7299 = vmatprep.subr.msk.mxu0 %vm81_vm0, %v8252_v23 }
  0x1a   :  { %7297 = vmatmul.mubr.msk.f32.vlgmr.msra.gmra.mxu1 %vm81_vm0, %v8265_v24  ;;  %7290 = vmatmul.mubr.msk.f32.vlgmr.msra.gmra.mxu0 %vm81_vm0, %v8270_v25 }
  0x1b   :  { %7307 = vmatpush3.xpose.msk.msra.mxu1 %vm81_vm0, %v8245_v22  ;;  %7300 = vmatpush3.xpose.msk.msra.mxu0 %vm81_vm0, %v8252_v23 }
  0x1c   :  { %7308 = vmatprep.subr.msk.mxu1 %vm81_vm0, %v8279_v26  ;;  %7301 = vmatprep.subr.msk.mxu0 %vm81_vm0, %v8284_v27 }
  0x1d   :  { %7310 = vmatprep.mubr.msk.f32.mxu1 %vm81_vm0, %v8293_v28  ;;  %7303 = vmatprep.mubr.msk.f32.mxu0 %vm81_vm0, %v8298_v29 }
  0x1e   :  { %1726 = vrot.lane.b32.xlu1 %v8098_v5, %s8031_s5 }
  0x1f   :  { %7309 = vmatpush3.xpose.msk.msra.mxu1 %vm81_vm0, %v8279_v26  ;;  %7302 = vmatpush3.xpose.msk.msra.mxu0 %vm81_vm0, %v8284_v27 }
  0x22   :  { %7311 = vmatmul.mubr.msk.f32.vlgmr.msra.gmra.mxu1 %vm81_vm0, %v8321_v30  ;;  %7304 = vmatmul.mubr.msk.f32.vlgmr.msra.gmra.mxu0 %vm81_vm0, %v8326_v31 }
  0x23   :  { %1914 = vrot.lane.b32.xlu1 %v8111_v6, %s8031_s5 }
  0xca   :  { %v7263_v32 = vpop.f32.mrf.mxu0  ;;  %v7270_v33 = vpop.f32.mrf.mxu1 }
  0xcb   :  { %v779_v36 = vmul.f32 0.35355338, %v7263_v32  ;;  %v781_v37 = vmul.f32 0.35355338, %v7270_v33 }
  0xcc   :  { %v160_v38 = vpop.f32.mrf.mxu0  ;;  %v247_v39 = vpop.f32.mrf.mxu1 }
  0xcd   :  { %v778_v41 = vmul.f32 0.35355338, %v160_v38  ;;  %v780_v42 = vmul.f32 0.35355338, %v247_v39  ;;  %v8350_v43 = vadd.f32 %v779_v36, %v8337_v34  ;;  %v8353_v44 = vadd.f32 %v781_v37, %v8342_v35 }
  0xcf   :  { %v814_v46 = vsel %vm810_vm1, %v8350_v43, -inf  ;;  %v8363_v47 = vadd.f32 %v778_v41, %v8347_v40  ;;  %v8366_v48 = vadd.f32 %v780_v42, %v8358_v45  ;;  %v820_v50 = vsel %vm810_vm1, %v8353_v44, -inf }
  0xd0   :  { %815 = vmax.xlane.f32.xlu1 %v814_v46 }
  0xd1   :  { %v811_v49 = vsel %vm810_vm1, %v8363_v47, -inf  ;;  %v817_v58 = vsel %vm810_vm1, %v8366_v48, -inf }
  0xd2   :  { %v7284_v51 = vpop.f32.mrf.mxu1  ;;  %812 = vmax.xlane.f32.xlu0 %v811_v49  ;;  %v7277_v52 = vpop.f32.mrf.mxu0  ;;  %v8415_v49 = vld [vmem:[%s10587_s3 + $0x58] sm:$0xff] }
  0xd3   :  { %v785_v55 = vmul.f32 0.35355338, %v7284_v51  ;;  %v783_v56 = vmul.f32 0.35355338, %v7277_v52  ;;  %10643 = vst [vmem:[#allocation10_spill] sm:$0xff] %v8415_v49 }
  0xd4   :  { %821 = vmax.xlane.f32.xlu1 %v820_v50  ;;  %v421_v57 = vpop.f32.mrf.mxu1  ;;  %v334_v59 = vpop.f32.mrf.mxu0  ;;  %v8420_v50 = vld [vmem:[%s10587_s3 + $0x48] sm:$0xff] }
  0xd5   :  { %v784_v62 = vmul.f32 0.35355338, %v421_v57  ;;  %v8395_v63 = vadd.f32 %v785_v55, %v8375_v53  ;;  %v782_v32 = vmul.f32 0.35355338, %v334_v59  ;;  %v8398_v33 = vadd.f32 %v783_v56, %v8380_v54  ;;  %10644 = vst [vmem:[#allocation11_spill] sm:$0xff] %v8420_v50  ;;  %v8432_v59 = vld [vmem:[%s10587_s3 + $0x40] sm:$0xff] }
  0xd6   :  { %818 = vmax.xlane.f32.xlu0 %v817_v58  ;;  %v8427_v58 = vld [vmem:[%s10587_s3 + $0x50] sm:$0xff]  ;;  %10646 = vst [vmem:[#allocation13_spill] sm:$0xff] %v8432_v59 }
  0xd7   :  { %v832_v36 = vsel %vm810_vm1, %v8395_v63, -inf  ;;  %v826_v37 = vsel %vm810_vm1, %v8398_v33, -inf  ;;  %v8405_v38 = vadd.f32 %v784_v62, %v8387_v60  ;;  %v8408_v39 = vadd.f32 %v782_v32, %v8392_v61  ;;  %10645 = vst [vmem:[#allocation12_spill] sm:$0xff] %v8427_v58 }
  0xd8   :  { %833 = vmax.xlane.f32.xlu1 %v832_v36 }
  0xd9   :  { %v829_v41 = vsel %vm810_vm1, %v8405_v38, -inf  ;;  %v823_v55 = vsel %vm810_vm1, %v8408_v39, -inf }
  0xda   :  { %v7298_v42 = vpop.f32.mrf.mxu1  ;;  %827 = vmax.xlane.f32.xlu0 %v826_v37  ;;  %v7291_v46 = vpop.f32.mrf.mxu0 }
  0xdb   :  { %v789_v51 = vmul.f32 0.35355338, %v7298_v42  ;;  %v787_v52 = vmul.f32 0.35355338, %v7291_v46 }
  0xdc   :  { %830 = vmax.xlane.f32.xlu1 %v829_v41  ;;  %v595_v56 = vpop.f32.mrf.mxu1  ;;  %v508_v57 = vpop.f32.mrf.mxu0 }
  0xdd   :  { %v788_v62 = vmul.f32 0.35355338, %v595_v56  ;;  %v8435_v32 = vadd.f32 %v789_v51, %v8415_v49  ;;  %v786_v36 = vmul.f32 0.35355338, %v508_v57  ;;  %v8438_v37 = vadd.f32 %v787_v52, %v8420_v50  ;;  %v8460_v57 = vld [vmem:[%s10587_s3 + $0x68] sm:$0xff] }
  0xde   :  { %824 = vmax.xlane.f32.xlu0 %v823_v55  ;;  %v8455_v55 = vld [vmem:[%s10587_s3 + $0x78] sm:$0xff]  ;;  %10648 = vst [vmem:[#allocation15_spill] sm:$0xff] %v8460_v57 }
  0xdf   :  { %v844_v41 = vsel %vm810_vm1, %v8435_v32, -inf  ;;  %v838_v42 = vsel %vm810_vm1, %v8438_v37, -inf  ;;  %v8445_v46 = vadd.f32 %v788_v62, %v8427_v58  ;;  %v8448_v60 = vadd.f32 %v786_v36, %v8432_v59  ;;  %10647 = vst [vmem:[#allocation14_spill] sm:$0xff] %v8455_v55 }
  0xe0   :  { %845 = vmax.xlane.f32.xlu1 %v844_v41 }
  0xe1   :  { %v841_v51 = vsel %vm810_vm1, %v8445_v46, -inf  ;;  %v835_v41 = vsel %vm810_vm1, %v8448_v60, -inf }
  0xe2   :  { %v7312_v56 = vpop.f32.mrf.mxu1  ;;  %839 = vmax.xlane.f32.xlu0 %v838_v42  ;;  %v7305_v52 = vpop.f32.mrf.mxu0  ;;  %v8467_v42 = vld [vmem:[%s10587_s3 + $0x60] sm:$0xff] }
  0xe3   :  { %v793_v62 = vmul.f32 0.35355338, %v7312_v56  ;;  %v791_v36 = vmul.f32 0.35355338, %v7305_v52  ;;  %10649 = vst [vmem:[#allocation16_spill] sm:$0xff] %v8467_v42 }
  0xe4   :  { %842 = vmax.xlane.f32.xlu1 %v841_v51  ;;  %v682_v58 = vpop.f32.mrf.mxu0 }
  0xe5   :  { %v8470_v59 = vadd.f32 %v793_v62, %v8455_v55  ;;  %v790_v49 = vmul.f32 0.35355338, %v682_v58  ;;  %v8473_v50 = vadd.f32 %v791_v36, %v8460_v57  ;;  %v8497_v36 = vld [vmem:[%s10587_s3 + $0x70] sm:$0xff] }
  0xe6   :  { %836 = vmax.xlane.f32.xlu0 %v835_v41  ;;  %10650 = vst [vmem:[#allocation17_spill] sm:$0xff] %v8497_v36  ;;  %v8512_v41 = vpop.permute.xlu0 %1641 }
  0xe7   :  { %v856_v56 = vsel %vm810_vm1, %v8470_v59, -inf  ;;  %v850_v51 = vsel %vm810_vm1, %v8473_v50, -inf  ;;  %v8480_v52 = vadd.f32 %v790_v49, %v8467_v42  ;;  %v769_v49 = vpop.f32.mrf.mxu1 }
  0xe8   :  { %857 = vmax.xlane.f32.xlu1 %v856_v56  ;;  %v792_v58 = vmul.f32 0.35355338, %v769_v49 }
  0xe9   :  { %v847_v62 = vsel %vm810_vm1, %v8480_v52, -inf }
  0xea   :  { %851 = vmax.xlane.f32.xlu0 %v850_v51  ;;  %v8516_v51 = vpop.permute.xlu0 %1635 }
  0xee   :  { %848 = vmax.xlane.f32.xlu0 %v847_v62  ;;  %v8520_v49 = vpop.permute.xlu0 %1823 }
  0xf9   :  { %1728 = vrot.lane.b32.xlu1 %v8132_v9, %s8031_s5  ;;  %v8500_v9 = vadd.f32 %v792_v58, %v8497_v36 }
  0xfd   :  { %1912 = vrot.lane.b32.xlu1 %v8141_v10, %s8031_s5  ;;  %v853_v10 = vsel %vm810_vm1, %v8500_v9, -inf }
 0x104   :  { %1637 = vrot.lane.b32.xlu0 %v8127_v8, %s8031_s5  ;;  %v8506_v8 = vpop.permute.xlu1 %1732 }
 0x108   :  { %1821 = vrot.lane.b32.xlu0 %v8146_v11, %s8031_s5  ;;  %v8508_v11 = vpop.permute.xlu1 %1639 }
 0x10c   :  { %1817 = vrot.lane.b32.xlu0 %v8162_v13, %s8031_s5  ;;  %v8510_v13 = vpop.permute.xlu1 %1730 }
 0x110   :  { %v8514_v56 = vpop.permute.xlu1 %1726 }
 0x114   :  { %v8518_v62 = vpop.permute.xlu1 %1914 }
 0x121   :  { %854 = vmax.xlane.f32.xlu1 %v853_v10 }
 0x132   :  { %1908 = vrot.lane.b32.xlu1 %v8157_v12, %s8031_s5 }
 0x159   :  { %v816_v58 = vpop.xlane.xlu1 %815 }
 0x15a   :  { %v860_v10 = vsub.f32 %v8350_v43, %v816_v58 }
 0x15b   :  { %v813_v12 = vpop.xlane.xlu0 %812 }
 0x15c   :  { %v877_v36 = vmul.f32 1.442695, %v860_v10  ;;  %v859_v42 = vsub.f32 %v8363_v47, %v813_v12 }
 0x15d   :  { %v822_v55 = vpop.xlane.xlu1 %821 }
 0x15e   :  { %7711 = vpow2.f32 %v877_v36  ;;  %v875_v57 = vmul.f32 1.442695, %v859_v42  ;;  %v862_v61 = vsub.f32 %v8353_v44, %v822_v55 }
 0x15f   :  { %v819_v53 = vpop.xlane.xlu0 %818 }
 0x160   :  { %7713 = vpow2.f32 %v875_v57  ;;  %v881_v54 = vmul.f32 1.442695, %v862_v61  ;;  %v861_v40 = vsub.f32 %v8366_v48, %v819_v53 }
 0x161   :  { %v834_v45 = vpop.xlane.xlu1 %833 }
 0x162   :  { %7715 = vpow2.f32 %v881_v54  ;;  %v879_v35 = vmul.f32 1.442695, %v861_v40  ;;  %v866_v34 = vsub.f32 %v8395_v63, %v834_v45 }
 0x163   :  { %v828_v43 = vpop.xlane.xlu0 %827 }
 0x164   :  { %7717 = vpow2.f32 %v879_v35  ;;  %v889_v58 = vmul.f32 1.442695, %v866_v34  ;;  %v864_v47 = vsub.f32 %v8398_v33, %v828_v43 }
 0x165   :  { %v831_v10 = vpop.xlane.xlu1 %830 }
 0x166   :  { %v885_v36 = vmul.f32 1.442695, %v864_v47  ;;  %v865_v42 = vsub.f32 %v8405_v38, %v831_v10  ;;  %7719 = vpow2.f32 %v889_v58 }
 0x167   :  { %v825_v44 = vpop.xlane.xlu0 %824 }
 0x168   :  { %7721 = vpow2.f32 %v885_v36  ;;  %v887_v61 = vmul.f32 1.442695, %v865_v42  ;;  %v863_v48 = vsub.f32 %v8408_v39, %v825_v44 }
 0x169   :  { %v846_v53 = vpop.xlane.xlu1 %845 }
 0x16a   :  { %v883_v54 = vmul.f32 1.442695, %v863_v48  ;;  %v870_v40 = vsub.f32 %v8435_v32, %v846_v53  ;;  %7723 = vpow2.f32 %v887_v61 }
 0x16b   :  { %v8531_v45 = vpop.eup %7711  ;;  %v840_v34 = vpop.xlane.xlu0 %839 }
 0x16c   :  { %7725 = vpow2.f32 %v883_v54  ;;  %v897_v35 = vmul.f32 1.442695, %v870_v40  ;;  %v868_v63 = vsub.f32 %v8438_v37, %v840_v34  ;;  %v910_v33 = vsel %vm810_vm1, %v8531_v45, 0.0 }
 0x16d   :  { %v8536_v38 = vpop.eup %7713  ;;  %v843_v55 = vpop.xlane.xlu1 %842  ;;  %911 = vadd.xlane.f32.xlu0 %v910_v33 }
 0x16e   :  { %v893_v39 = vmul.f32 1.442695, %v868_v63  ;;  %v869_v57 = vsub.f32 %v8445_v46, %v843_v55  ;;  %7727 = vpow2.f32 %v897_v35  ;;  %v907_v43 = vsel %vm810_vm1, %v8536_v38, 0.0 }
 0x16f   :  { %v8539_v12 = vpop.eup %7715  ;;  %v837_v32 = vpop.xlane.xlu0 %836 }
 0x170   :  { %7729 = vpow2.f32 %v893_v39  ;;  %v895_v58 = vmul.f32 1.442695, %v869_v57  ;;  %v867_v37 = vsub.f32 %v8448_v60, %v837_v32  ;;  %v916_v47 = vsel %vm810_vm1, %v8539_v12, 0.0 }
 0x171   :  { %v8546_v10 = vpop.eup %7717  ;;  %917 = vadd.xlane.f32.xlu1 %v916_v47  ;;  %v858_v36 = vpop.xlane.xlu1 %857  ;;  %908 = vadd.xlane.f32.xlu0 %v907_v43 }
 0x172   :  { %v891_v46 = vmul.f32 1.442695, %v867_v37  ;;  %v874_v42 = vsub.f32 %v8470_v59, %v858_v36  ;;  %7731 = vpow2.f32 %v895_v58  ;;  %v913_v60 = vsel %vm810_vm1, %v8546_v10, 0.0 }
 0x173   :  { %v852_v44 = vpop.xlane.xlu0 %851  ;;  %v8549_v61 = vpop.eup %7719 }
 0x174   :  { %7733 = vpow2.f32 %v891_v46  ;;  %v905_v48 = vmul.f32 1.442695, %v874_v42  ;;  %v872_v53 = vsub.f32 %v8473_v50, %v852_v44  ;;  %v928_v50 = vsel %vm810_vm1, %v8549_v61, 0.0 }
 0x175   :  { %v8554_v54 = vpop.eup %7721  ;;  %914 = vadd.xlane.f32.xlu1 %v913_v60  ;;  %v50_v60 = vld [vmem:[%s10588_s2 + $0x8] sm:$0xff] }
 0x176   :  { %v901_v40 = vmul.f32 1.442695, %v872_v53  ;;  %v922_v34 = vsel %vm810_vm1, %v8554_v54, 0.0  ;;  %7735 = vpow2.f32 %v905_v48  ;;  %7313 = vmatprep.subr.mxu0 %v50_v60 }
 0x177   :  { %923 = vadd.xlane.f32.xlu0 %v922_v34  ;;  %v849_v59 = vpop.xlane.xlu0 %848  ;;  %v8558_v35 = vpop.eup %7723  ;;  %v49_v34 = vld [vmem:[%s10588_s2] sm:$0xff]  ;;  %7314 = vmatpush3.msra.mxu0 %v50_v60 }
 0x178   :  { %7737 = vpow2.f32 %v901_v40  ;;  %v871_v63 = vsub.f32 %v8480_v52, %v849_v59  ;;  %v925_v32 = vsel %vm810_vm1, %v8558_v35, 0.0  ;;  %7315 = vmatprep.subr.mxu0 %v49_v34 }
 0x179   :  { %v8563_v33 = vpop.eup %7725  ;;  %929 = vadd.xlane.f32.xlu1 %v928_v50  ;;  %7316 = vmatpush3.msra.mxu0 %v49_v34  ;;  %v51_v50 = vld [vmem:[%s10588_s2 + $0x10] sm:$0xff] }
 0x17a   :  { %v899_v55 = vmul.f32 1.442695, %v871_v63  ;;  %v919_v39 = vsel %vm810_vm1, %v8563_v33, 0.0  ;;  %v52_v63 = vld [vmem:[%s10588_s2 + $0x18] sm:$0xff] }
 0x17b   :  { %920 = vadd.xlane.f32.xlu0 %v919_v39  ;;  %v8567_v57 = vpop.eup %7727  ;;  %7320 = vmatprep.subr.mxu1 %v52_v63  ;;  %v8618_v39 = vld [vmem:[%s10588_s2 + $0x38] sm:$0xff] }
 0x17c   :  { %7739 = vpow2.f32 %v899_v55  ;;  %v940_v37 = vsel %vm810_vm1, %v8567_v57, 0.0  ;;  %7321 = vmatpush3.msra.mxu1 %v52_v63  ;;  %v8612_v55 = vld [vmem:[%s10588_s2 + $0x28] sm:$0xff] }
 0x17d   :  { %v8571_v43 = vpop.eup %7729  ;;  %926 = vadd.xlane.f32.xlu1 %v925_v32  ;;  %7322 = vmatprep.subr.mxu1 %v51_v50  ;;  %v8625_v32 = vpop.permute.xlu1 %1728 }
 0x17e   :  { %v934_v52 = vsel %vm810_vm1, %v8571_v43, 0.0  ;;  %7323 = vmatpush3.msra.mxu1 %v51_v50  ;;  %7327 = vmatprep.subr.mxu0 %v8612_v55 }
 0x17f   :  { %935 = vadd.xlane.f32.xlu0 %v934_v52  ;;  %v8575_v58 = vpop.eup %7731  ;;  %7334 = vmatprep.subr.mxu1 %v8618_v39 }
 0x180   :  { %v937_v42 = vsel %vm810_vm1, %v8575_v58, 0.0 }
 0x181   :  { %v8579_v47 = vpop.eup %7733  ;;  %941 = vadd.xlane.f32.xlu1 %v940_v37  ;;  %v8631_v52 = vpop.permute.xlu1 %1912 }
 0x182   :  { %v931_v36 = vsel %vm810_vm1, %v8579_v47, 0.0 }
 0x183   :  { %932 = vadd.xlane.f32.xlu0 %v931_v36  ;;  %v8583_v46 = vpop.eup %7735 }
 0x184   :  { %v952_v53 = vsel %vm810_vm1, %v8583_v46, 0.0 }
 0x185   :  { %v8587_v44 = vpop.eup %7737  ;;  %938 = vadd.xlane.f32.xlu1 %v937_v42  ;;  %v8729_v42 = vld [vmem:[%s10588_s2 + $0x58] sm:$0xff] }
 0x186   :  { %v946_v48 = vsel %vm810_vm1, %v8587_v44, 0.0 }
 0x187   :  { %947 = vadd.xlane.f32.xlu0 %v946_v48 }
 0x189   :  { %v8596_v40 = vpop.eup %7739  ;;  %953 = vadd.xlane.f32.xlu1 %v952_v53  ;;  %v8738_v53 = vld [vmem:[%s10588_s2 + $0x50] sm:$0xff] }
 0x18a   :  { %v943_v59 = vsel %vm810_vm1, %v8596_v40, 0.0 }
 0x18b   :  { %944 = vadd.xlane.f32.xlu0 %v943_v59 }
 0x19a   :  { %2096 = vrot.lane.b32.xlu1 %v8177_v14, %s8031_s5 }
 0x19e   :  { %1910 = vrot.lane.b32.xlu1 %v8197_v16, %s8031_s5 }
 0x1a1   :  { %2005 = vrot.lane.b32.xlu0 %v8184_v15, %s8031_s5 }
 0x1a5   :  { %1819 = vrot.lane.b32.xlu0 %v8202_v17, %s8031_s5  ;;  %v8658_v17 = vld [vmem:[%s10588_s2 + $0x20] sm:$0xff] }
 0x1a9   :  { %2003 = vrot.lane.b32.xlu0 %v8216_v19, %s8031_s5  ;;  %v8665_v19 = vld [vmem:[%s10588_s2 + $0x48] sm:$0xff] }
 0x1aa   :  { %v855_v37 = vpop.xlane.xlu1 %854 }
 0x1ab   :  { %v873_v36 = vsub.f32 %v8500_v9, %v855_v37 }
 0x1ad   :  { %v903_v14 = vmul.f32 1.442695, %v873_v36  ;;  %1999 = vrot.lane.b32.xlu0 %v8230_v21, %s8031_s5  ;;  %v8674_v21 = vld [vmem:[%s10588_s2 + $0x40] sm:$0xff] }
 0x1af   :  { %7741 = vpow2.f32 %v903_v14 }
 0x1b1   :  { %2187 = vrot.lane.b32.xlu0 %v8252_v23, %s8031_s5  ;;  %v8683_v23 = vld [vmem:[%s10588_s2 + $0x68] sm:$0xff] }
 0x1b5   :  { %2001 = vrot.lane.b32.xlu0 %v8270_v25, %s8031_s5 }
 0x1b9   :  { %2185 = vrot.lane.b32.xlu0 %v8284_v27, %s8031_s5 }
 0x1bc   :  { %v8646_v15 = vpop.eup %7741 }
 0x1bd   :  { %2181 = vrot.lane.b32.xlu0 %v8298_v29, %s8031_s5  ;;  %v949_v16 = vsel %vm810_vm1, %v8646_v15, 0.0 }
 0x1c1   :  { %2183 = vrot.lane.b32.xlu0 %v8326_v31, %s8031_s5 }
 0x1c2   :  { %950 = vadd.xlane.f32.xlu1 %v949_v16 }
 0x1c5   :  { %2575 = vrot.lane.b32.xlu0 %v50_v60, %s8031_s5 }
 0x1c9   :  { %2753 = vrot.lane.b32.xlu0 %v8612_v55, %s8031_s5 }
 0x1cd   :  { %2751 = vrot.lane.b32.xlu0 %v8658_v17, %s8031_s5 }
 0x1d1   :  { %2931 = vrot.lane.b32.xlu0 %v8665_v19, %s8031_s5 }
 0x1d3   :  { %2094 = vrot.lane.b32.xlu1 %v8211_v18, %s8031_s5  ;;  %v8692_v18 = vld [vmem:[%s10588_s2 + $0x60] sm:$0xff] }
 0x1d5   :  { %2929 = vrot.lane.b32.xlu0 %v8674_v21, %s8031_s5 }
 0x1d7   :  { %2090 = vrot.lane.b32.xlu1 %v8225_v20, %s8031_s5  ;;  %v8700_v20 = vpop.permute.xlu0 %1637 }
 0x1d9   :  { %3109 = vrot.lane.b32.xlu0 %v8683_v23, %s8031_s5 }
 0x1db   :  { %2278 = vrot.lane.b32.xlu1 %v8245_v22, %s8031_s5  ;;  %v8704_v22 = vpop.permute.xlu0 %1821 }
 0x1dd   :  { %3107 = vrot.lane.b32.xlu0 %v8692_v18, %s8031_s5 }
 0x1df   :  { %2092 = vrot.lane.b32.xlu1 %v8265_v24, %s8031_s5  ;;  %v8709_v25 = vpop.permute.xlu0 %1817  ;;  %v8712_v24 = vpop.permute.xlu1 %1908 }
 0x1e1   :  { %3289 = vrot.lane.b32.xlu0 %v8065_v0, %s8032_s10 }
 0x1e3   :  { %2276 = vrot.lane.b32.xlu1 %v8279_v26, %s8031_s5 }
 0x1e5   :  { %3287 = vrot.lane.b32.xlu0 %v8075_v2, %s8032_s10 }
 0x1e7   :  { %2272 = vrot.lane.b32.xlu1 %v8293_v28, %s8031_s5 }
 0x1e9   :  { %3283 = vrot.lane.b32.xlu0 %v8089_v4, %s8032_s10 }
 0x1eb   :  { %2274 = vrot.lane.b32.xlu1 %v8321_v30, %s8031_s5  ;;  %v8720_v30 = vld [vmem:[%s10588_s2 + $0x30] sm:$0xff] }
 0x1ed   :  { %3471 = vrot.lane.b32.xlu0 %v8116_v7, %s8032_s10 }
 0x1ef   :  { %2664 = vrot.lane.b32.xlu1 %v52_v63, %s8031_s5 }
 0x1f3   :  { %2573 = vrot.lane.b32.xlu1 %v49_v34, %s8031_s5 }
 0x1f6   :  { %v912_v27 = vpop.xlane.xlu0 %911 }
 0x1f7   :  { %2662 = vrot.lane.b32.xlu1 %v51_v50, %s8031_s5  ;;  %7743 = vrcp.f32 %v912_v27  ;;  %v8748_v50 = vld [vmem:[%s10588_s2 + $0x78] sm:$0xff] }
 0x1fa   :  { %v918_v26 = vpop.xlane.xlu1 %917  ;;  %v909_v29 = vpop.xlane.xlu0 %908 }
 0x1fb   :  { %2842 = vrot.lane.b32.xlu1 %v8618_v39, %s8031_s5  ;;  %7745 = vrcp.f32 %v909_v29 }
 0x1fc   :  { %7747 = vrcp.f32 %v918_v26 }
 0x1fe   :  { %v915_v28 = vpop.xlane.xlu1 %914 }
 0x1ff   :  { %7749 = vrcp.f32 %v915_v28  ;;  %2840 = vrot.lane.b32.xlu1 %v8720_v30, %s8031_s5 }
 0x200   :  { %v924_v31 = vpop.xlane.xlu0 %923 }
 0x201   :  { %7751 = vrcp.f32 %v924_v31 }
 0x202   :  { %v930_v9 = vpop.xlane.xlu1 %929 }
 0x203   :  { %3020 = vrot.lane.b32.xlu1 %v8729_v42, %s8031_s5 }
 0x204   :  { %v921_v48 = vpop.xlane.xlu0 %920  ;;  %v7744_v2 = vpop.eup %7743 }
 0x205   :  { %7753 = vrcp.f32 %v921_v48  ;;  %v972_v4 = vmul.f32 %v7744_v2, %v8531_v45 }
 0x206   :  { %7755 = vrcp.f32 %v930_v9  ;;  %v927_v0 = vpop.xlane.xlu1 %926 }
 0x207   :  { %7757 = vrcp.f32 %v927_v0  ;;  %3018 = vrot.lane.b32.xlu1 %v8738_v53, %s8031_s5 }
 0x208   :  { %v936_v60 = vpop.xlane.xlu0 %935  ;;  %v7746_v34 = vpop.eup %7745 }
 0x209   :  { %v971_v63 = vmul.f32 %v7746_v34, %v8536_v38  ;;  %v7748_v37 = vpop.eup %7747  ;;  %7759 = vrcp.f32 %v936_v60 }
 0x20a   :  { %v942_v59 = vpop.xlane.xlu1 %941  ;;  %v974_v7 = vmul.f32 %v7748_v37, %v8539_v12  ;;  %v8769_v12 = vld [vmem:[%s10588_s2 + $0x70] sm:$0xff] }
 0x20b   :  { %3198 = vrot.lane.b32.xlu1 %v8748_v50, %s8031_s5  ;;  %7317 = vmatprep.mubr.msk.f32.mxu0 %vm810_vm1, %v971_v63 }
 0x20c   :  { %v7750_v36 = vpop.eup %7749  ;;  %v933_v14 = vpop.xlane.xlu0 %932  ;;  %7318 = vmatmul.mubr.msk.f32.vlgmr.msra.gmra.mxu0 %vm810_vm1, %v972_v4 }
 0x20d   :  { %7761 = vrcp.f32 %v933_v14  ;;  %v973_v38 = vmul.f32 %v7750_v36, %v8546_v10  ;;  %7328 = vmatpush3.msra.mxu0 %v8612_v55 }
 0x20e   :  { %7763 = vrcp.f32 %v942_v59  ;;  %v939_v16 = vpop.xlane.xlu1 %938  ;;  %7329 = vmatprep.subr.mxu0 %v8658_v17  ;;  %v7752_v27 = vpop.eup %7751 }
 0x20f   :  { %7765 = vrcp.f32 %v939_v16  ;;  %7324 = vmatprep.mubr.msk.f32.mxu1 %vm810_vm1, %v973_v38  ;;  %7330 = vmatpush3.msra.mxu0 %v8658_v17  ;;  %v976_v31 = vmul.f32 %v7752_v27, %v8554_v54 }
 0x210   :  { %7325 = vmatmul.mubr.msk.f32.vlgmr.msra.gmra.mxu1 %vm810_vm1, %v974_v7  ;;  %v948_v45 = vpop.xlane.xlu0 %947  ;;  %7341 = vmatprep.subr.mxu0 %v8665_v19 }
 0x211   :  { %7335 = vmatpush3.msra.mxu1 %v8618_v39  ;;  %3196 = vrot.lane.b32.xlu1 %v8769_v12, %s8031_s5  ;;  %7767 = vrcp.f32 %v948_v45 }
 0x212   :  { %v7754_v10 = vpop.eup %7753  ;;  %7336 = vmatprep.subr.mxu1 %v8720_v30 }
 0x213   :  { %v7756_v26 = vpop.eup %7755  ;;  %v975_v29 = vmul.f32 %v7754_v10, %v8563_v33  ;;  %7337 = vmatpush3.msra.mxu1 %v8720_v30 }
 0x214   :  { %v7758_v28 = vpop.eup %7757  ;;  %v945_v39 = vpop.xlane.xlu0 %944  ;;  %7348 = vmatprep.subr.mxu1 %v8729_v42  ;;  %v978_v48 = vmul.f32 %v7756_v26, %v8549_v61 }
 0x215   :  { %7769 = vrcp.f32 %v945_v39  ;;  %7331 = vmatprep.mubr.msk.f32.mxu0 %vm810_vm1, %v975_v29  ;;  %v977_v9 = vmul.f32 %v7758_v28, %v8558_v35  ;;  %3380 = vrot.lane.b32.xlu1 %v8070_v1, %s8032_s10 }
 0x216   :  { %7332 = vmatmul.mubr.msk.f32.vlgmr.msra.gmra.mxu0 %vm810_vm1, %v976_v31  ;;  %v7760_v33 = vpop.eup %7759 }
 0x217   :  { %7338 = vmatprep.mubr.msk.f32.mxu1 %vm810_vm1, %v977_v9  ;;  %7342 = vmatpush3.msra.mxu0 %v8665_v19  ;;  %v980_v2 = vmul.f32 %v7760_v33, %v8571_v43 }
 0x218   :  { %7339 = vmatmul.mubr.msk.f32.vlgmr.msra.gmra.mxu1 %vm810_vm1, %v978_v48  ;;  %7343 = vmatprep.subr.mxu0 %v8674_v21  ;;  %v2006_v54 = vpop.permute.xlu0 %2005  ;;  %v10659_v48 = vld [vmem:[#allocation2_spill] sm:$0xff] }
 0x219   :  { %7344 = vmatpush3.msra.mxu0 %v8674_v21  ;;  %7349 = vmatpush3.msra.mxu1 %v8729_v42 }
 0x21a   :  { %v7762_v35 = vpop.eup %7761  ;;  %7350 = vmatprep.subr.mxu1 %v8738_v53  ;;  %7355 = vmatprep.subr.mxu0 %v8683_v23 }
 0x21b   :  { %v7764_v1 = vpop.eup %7763  ;;  %v979_v61 = vmul.f32 %v7762_v35, %v8579_v47  ;;  %7351 = vmatpush3.msra.mxu1 %v8738_v53  ;;  %3378 = vrot.lane.b32.xlu1 %v8084_v3, %s8032_s10 }
 0x21c   :  { %v7766_v0 = vpop.eup %7765  ;;  %7362 = vmatprep.subr.mxu1 %v8748_v50  ;;  %v1820_v60 = vpop.permute.xlu0 %1819  ;;  %v982_v59 = vmul.f32 %v7764_v1, %v8567_v57 }
 0x21d   :  { %7345 = vmatprep.mubr.msk.f32.mxu0 %vm810_vm1, %v979_v61  ;;  %v981_v34 = vmul.f32 %v7766_v0, %v8575_v58 }
 0x21e   :  { %7346 = vmatmul.mubr.msk.f32.vlgmr.msra.gmra.mxu0 %vm810_vm1, %v980_v2  ;;  %v7768_v43 = vpop.eup %7767 }
 0x21f   :  { %7356 = vmatpush3.msra.mxu0 %v8683_v23  ;;  %7352 = vmatprep.mubr.msk.f32.mxu1 %vm810_vm1, %v981_v34  ;;  %v984_v58 = vmul.f32 %v7768_v43, %v8587_v44 }
 0x220   :  { %7357 = vmatprep.subr.mxu0 %v8692_v18  ;;  %7353 = vmatmul.mubr.msk.f32.vlgmr.msra.gmra.mxu1 %vm810_vm1, %v982_v59  ;;  %v2004_v3 = vpop.permute.xlu0 %2003 }
 0x221   :  { %7358 = vmatpush3.msra.mxu0 %v8692_v18  ;;  %7363 = vmatpush3.msra.mxu1 %v8748_v50 }
 0x222   :  { %v7770_v47 = vpop.eup %7769  ;;  %7364 = vmatprep.subr.mxu1 %v8769_v12  ;;  %7369 = vmatprep.subr.msk.mxu0 %vm81_vm0, %v8512_v41 }
 0x223   :  { %7365 = vmatpush3.msra.mxu1 %v8769_v12  ;;  %v983_v57 = vmul.f32 %v7770_v47, %v8596_v40  ;;  %3374 = vrot.lane.b32.xlu1 %v8098_v5, %s8032_s10 }
 0x224   :  { %7376 = vmatprep.subr.msk.mxu1 %vm81_vm0, %v8506_v8  ;;  %v2000_v63 = vpop.permute.xlu0 %1999 }
 0x225   :  { %7359 = vmatprep.mubr.msk.f32.mxu0 %vm810_vm1, %v983_v57 }
 0x226   :  { %7360 = vmatmul.mubr.msk.f32.vlgmr.msra.gmra.mxu0 %vm810_vm1, %v984_v58 }
 0x227   :  { %7370 = vmatpush3.xpose.msk.msra.mxu0 %vm81_vm0, %v8512_v41  ;;  %7373 = vmatprep.mubr.msk.f32.mxu0 %vm81_vm0, %v8516_v51  ;;  %v954_v41 = vpop.xlane.xlu1 %953 }
 0x228   :  { %7371 = vmatprep.subr.msk.mxu0 %vm81_vm0, %v8508_v11  ;;  %3562 = vrot.lane.b32.xlu1 %v8111_v6, %s8032_s10  ;;  %v2188_v5 = vpop.permute.xlu0 %2187  ;;  %7771 = vrcp.f32 %v954_v41 }
 0x22b   :  { %7372 = vmatpush3.xpose.msk.msra.mxu0 %vm81_vm0, %v8508_v11 }
 0x22c   :  { %7383 = vmatprep.subr.msk.mxu0 %vm81_vm0, %v8520_v49  ;;  %v2002_v6 = vpop.permute.xlu0 %2001 }
 0x22e   :  { %7374 = vmatmul.mubr.msk.f32.vlgmr.msra.gmra.mxu0 %vm81_vm0, %v8700_v20 }
 0x22f   :  { %7384 = vmatpush3.xpose.msk.msra.mxu0 %vm81_vm0, %v8520_v49  ;;  %7387 = vmatprep.mubr.msk.f32.mxu0 %vm81_vm0, %v8709_v25  ;;  %v2097_v49 = vpop.permute.xlu1 %2096 }
 0x230   :  { %7385 = vmatprep.subr.msk.mxu0 %vm81_vm0, %v8704_v22  ;;  %v2186_v11 = vpop.permute.xlu0 %2185 }
 0x233   :  { %7386 = vmatpush3.xpose.msk.msra.mxu0 %vm81_vm0, %v8704_v22  ;;  %v1911_v40 = vpop.permute.xlu1 %1910 }
 0x234   :  { %7397 = vmatprep.subr.msk.mxu0 %vm81_vm0, %v2006_v54  ;;  %v2182_v51 = vpop.permute.xlu0 %2181 }
 0x235   :  { %v7772_v25 = vpop.eup %7771 }
 0x236   :  { %7388 = vmatmul.mubr.msk.f32.vlgmr.msra.gmra.mxu0 %vm81_vm0, %v1820_v60  ;;  %v986_v36 = vmul.f32 %v7772_v25, %v8583_v46 }
 0x237   :  { %7398 = vmatpush3.xpose.msk.msra.mxu0 %vm81_vm0, %v2006_v54  ;;  %7401 = vmatprep.mubr.msk.f32.mxu0 %vm81_vm0, %v2000_v63 }
 0x238   :  { %7399 = vmatprep.subr.msk.mxu0 %vm81_vm0, %v2004_v3  ;;  %v2184_v44 = vpop.permute.xlu0 %2183 }
 0x23b   :  { %7400 = vmatpush3.xpose.msk.msra.mxu0 %vm81_vm0, %v2004_v3 }
 0x23c   :  { %7411 = vmatprep.subr.msk.mxu0 %vm81_vm0, %v2188_v5 }
 0x23e   :  { %7402 = vmatmul.mubr.msk.f32.vlgmr.msra.gmra.mxu0 %vm81_vm0, %v2002_v6  ;;  %v10668_v6 = vld [vmem:[#allocation3_spill] sm:$0xff] }
 0x23f   :  { %7412 = vmatpush3.xpose.msk.msra.mxu0 %vm81_vm0, %v2188_v5  ;;  %7415 = vmatprep.mubr.msk.f32.mxu0 %vm81_vm0, %v2182_v51 }
 0x240   :  { %7413 = vmatprep.subr.msk.mxu0 %vm81_vm0, %v2186_v11 }
 0x243   :  { %7414 = vmatpush3.xpose.msk.msra.mxu0 %vm81_vm0, %v2186_v11 }
 0x246   :  { %7416 = vmatmul.mubr.msk.f32.vlgmr.msra.gmra.mxu0 %vm81_vm0, %v2184_v44  ;;  %v10669_v44 = vld [vmem:[#allocation5_spill] sm:$0xff] }
 0x24b   :  { %v951_v20 = vpop.xlane.xlu1 %950 }
 0x24c   :  { %7773 = vrcp.f32 %v951_v20  ;;  %v10670_v20 = vld [vmem:[#allocation4_spill] sm:$0xff] }
 0x24f   :  { %v2095_v22 = vpop.permute.xlu1 %2094 }
 0x253   :  { %v2091_v14 = vpop.permute.xlu1 %2090 }
 0x257   :  { %v2279_v38 = vpop.permute.xlu1 %2278 }
 0x259   :  { %v7774_v37 = vpop.eup %7773 }
 0x25a   :  { %v985_v4 = vmul.f32 %v7774_v37, %v8646_v15 }
 0x25c   :  { %7366 = vmatprep.mubr.msk.f32.mxu1 %vm810_vm1, %v985_v4  ;;  %v10671_v4 = vld [vmem:[#allocation7_spill] sm:$0xff] }
 0x25d   :  { %7367 = vmatmul.mubr.msk.f32.vlgmr.msra.gmra.mxu1 %vm810_vm1, %v986_v36 }
 0x25e   :  { %7377 = vmatpush3.xpose.msk.msra.mxu1 %vm81_vm0, %v8506_v8  ;;  %7380 = vmatprep.mubr.msk.f32.mxu1 %vm81_vm0, %v8514_v56  ;;  %v2093_v8 = vpop.permute.xlu1 %2092 }
 0x25f   :  { %7378 = vmatprep.subr.msk.mxu1 %vm81_vm0, %v8510_v13 }
 0x262   :  { %7379 = vmatpush3.xpose.msk.msra.mxu1 %vm81_vm0, %v8510_v13  ;;  %v2277_v13 = vpop.permute.xlu1 %2276 }
 0x263   :  { %7390 = vmatprep.subr.msk.mxu1 %vm81_vm0, %v8518_v62 }
 0x265   :  { %7381 = vmatmul.mubr.msk.f32.vlgmr.msra.gmra.mxu1 %vm81_vm0, %v8625_v32  ;;  %v2576_v32 = vpop.permute.xlu0 %2575 }
 0x266   :  { %7391 = vmatpush3.xpose.msk.msra.mxu1 %vm81_vm0, %v8518_v62  ;;  %7394 = vmatprep.mubr.msk.f32.mxu1 %vm81_vm0, %v8712_v24  ;;  %v2273_v56 = vpop.permute.xlu1 %2272 }
 0x267   :  { %7392 = vmatprep.subr.msk.mxu1 %vm81_vm0, %v8631_v52  ;;  %7425 = vmatprep.subr.mxu0 %v2576_v32 }
 0x268   :  { %7426 = vmatpush3.msra.mxu0 %v2576_v32  ;;  %v10672_v32 = vld [vmem:[#allocation6_spill] sm:$0xff] }
 0x269   :  { %v8892_v24 = vpop.permute.xlu0 %2753 }
 0x26a   :  { %7393 = vmatpush3.xpose.msk.msra.mxu1 %vm81_vm0, %v8631_v52  ;;  %v2275_v62 = vpop.permute.xlu1 %2274 }
 0x26b   :  { %7404 = vmatprep.subr.msk.mxu1 %vm81_vm0, %v2097_v49 }
 0x26d   :  { %7395 = vmatmul.mubr.msk.f32.vlgmr.msra.gmra.mxu1 %vm81_vm0, %v1911_v40 }
 0x26e   :  { %7405 = vmatpush3.xpose.msk.msra.mxu1 %vm81_vm0, %v2097_v49  ;;  %7408 = vmatprep.mubr.msk.f32.mxu1 %vm81_vm0, %v2091_v14  ;;  %v2665_v46 = vpop.permute.xlu1 %2664 }
 0x26f   :  { %7406 = vmatprep.subr.msk.mxu1 %vm81_vm0, %v2095_v22 }
 0x272   :  { %7407 = vmatpush3.xpose.msk.msra.mxu1 %vm81_vm0, %v2095_v22  ;;  %v2574_v52 = vpop.permute.xlu1 %2573 }
 0x273   :  { %7418 = vmatprep.subr.msk.mxu1 %vm81_vm0, %v2279_v38  ;;  %7427 = vmatprep.subr.mxu0 %v2574_v52 }
 0x274   :  { %7428 = vmatpush3.msra.mxu0 %v2574_v52 }
 0x275   :  { %7409 = vmatmul.mubr.msk.f32.vlgmr.msra.gmra.mxu1 %vm81_vm0, %v2093_v8  ;;  %7439 = vmatprep.subr.mxu0 %v8892_v24 }
 0x276   :  { %7419 = vmatpush3.xpose.msk.msra.mxu1 %vm81_vm0, %v2279_v38  ;;  %7422 = vmatprep.mubr.msk.f32.mxu1 %vm81_vm0, %v2273_v56  ;;  %v2663_v15 = vpop.permute.xlu1 %2662 }
 0x277   :  { %7420 = vmatprep.subr.msk.mxu1 %vm81_vm0, %v2277_v13 }
 0x27a   :  { %7421 = vmatpush3.xpose.msk.msra.mxu1 %vm81_vm0, %v2277_v13  ;;  %v8897_v7 = vpop.permute.xlu1 %2842 }
 0x27b   :  { %7432 = vmatprep.subr.mxu1 %v2665_v46 }
 0x27d   :  { %7423 = vmatmul.mubr.msk.f32.vlgmr.msra.gmra.mxu1 %vm81_vm0, %v2275_v62 }
 0x27e   :  { %7433 = vmatpush3.msra.mxu1 %v2665_v46 }
 0x27f   :  { %7434 = vmatprep.subr.mxu1 %v2663_v15 }
 0x280   :  { %7435 = vmatpush3.msra.mxu1 %v2663_v15 }
 0x281   :  { %7446 = vmatprep.subr.mxu1 %v8897_v7 }
 0x2cc   :  { %v8895_v16 = vpop.f32.mrf.mxu0 }
 0x2cd   :  { %10651 = vst [vmem:[#allocation18_spill] sm:$0xff] %v8895_v16 }
 0x2ce   :  { %v8899_v45 = vpop.f32.mrf.mxu0 }
 0x2cf   :  { %10652 = vst [vmem:[#allocation19_spill] sm:$0xff] %v8899_v45 }
 0x2d0   :  { %v8919_v35 = vpop.f32.mrf.mxu1 }
 0x2d1   :  { %10660 = vst [vmem:[#allocation2_spill] sm:$0xff] %v8919_v35 }
 0x2d2   :  { %v8921_v1 = vpop.f32.mrf.mxu1 }
 0x2d3   :  { %10661 = vst [vmem:[#allocation26_spill] sm:$0xff] %v8921_v1 }
 0x2d6   :  { %v8902_v27 = vpop.f32.mrf.mxu0 }
 0x2d7   :  { %10653 = vst [vmem:[#allocation20_spill] sm:$0xff] %v8902_v27 }
 0x2d8   :  { %v8904_v10 = vpop.f32.mrf.mxu0  ;;  %v8923_v61 = vpop.f32.mrf.mxu1 }
 0x2d9   :  { %10654 = vst [vmem:[#allocation21_spill] sm:$0xff] %v8904_v10  ;;  %10662 = vst [vmem:[#allocation27_spill] sm:$0xff] %v8923_v61 }
 0x2da   :  { %v8925_v0 = vpop.f32.mrf.mxu1 }
 0x2db   :  { %10663 = vst [vmem:[#allocation28_spill] sm:$0xff] %v8925_v0 }
 0x2de   :  { %v8906_v26 = vpop.f32.mrf.mxu0 }
 0x2df   :  { %10655 = vst [vmem:[#allocation22_spill] sm:$0xff] %v8906_v26 }
 0x2e0   :  { %v8908_v29 = vpop.f32.mrf.mxu0  ;;  %v8927_v2 = vpop.f32.mrf.mxu1 }
 0x2e1   :  { %10656 = vst [vmem:[#allocation23_spill] sm:$0xff] %v8908_v29  ;;  %10664 = vst [vmem:[#allocation29_spill] sm:$0xff] %v8927_v2 }
 0x2e2   :  { %v8929_v60 = vpop.f32.mrf.mxu1 }
 0x2e3   :  { %10665 = vst [vmem:[#allocation30_spill] sm:$0xff] %v8929_v60 }
 0x2e6   :  { %v8910_v28 = vpop.f32.mrf.mxu0 }
 0x2e7   :  { %10657 = vst [vmem:[#allocation24_spill] sm:$0xff] %v8910_v28 }
 0x2e8   :  { %v8912_v39 = vpop.f32.mrf.mxu0 }
 0x2e9   :  { %10658 = vst [vmem:[#allocation25_spill] sm:$0xff] %v8912_v39  ;;  %v9064_v39 = vpop.permute.xlu1 %2840 }
 0x2ed   :  { %v9066_v28 = vpop.permute.xlu1 %3020 }
 0x2ee   :  { %v7375_v31 = vpop.f32.mrf.mxu0 }
 0x2ef   :  { %v2364_v9 = vmul.f32 0.35355338, %v7375_v31  ;;  %v10673_v31 = vld [vmem:[#allocation9_spill] sm:$0xff] }
 0x2f0   :  { %v1717_v59 = vpop.f32.mrf.mxu0 }
 0x2f1   :  { %v8915_v54 = vadd.f32 %v2364_v9, %v10659_v48  ;;  %v2363_v57 = vmul.f32 0.35355338, %v1717_v59  ;;  %v10674_v59 = vld [vmem:[#allocation8_spill] sm:$0xff] }
 0x2f3   :  { %v2398_v33 = vsel %vm810_vm1, %v8915_v54, -inf  ;;  %v8944_v22 = vadd.f32 %v2363_v57, %v10670_v20  ;;  %v10676_v20 = vld [vmem:[#allocation10_spill] sm:$0xff] }
 0x2f4   :  { %2399 = vmax.xlane.f32.xlu0 %v2398_v33 }
 0x2f5   :  { %v2395_v13 = vsel %vm810_vm1, %v8944_v22, -inf }
 0x2f6   :  { %v7389_v47 = vpop.f32.mrf.mxu0 }
 0x2f7   :  { %v2368_v41 = vmul.f32 0.35355338, %v7389_v47  ;;  %v10675_v47 = vld [vmem:[#allocation11_spill] sm:$0xff] }
 0x2f8   :  { %v1899_v51 = vpop.f32.mrf.mxu0 }
 0x2f9   :  { %v2367_v37 = vmul.f32 0.35355338, %v1899_v51  ;;  %v8949_v36 = vadd.f32 %v2368_v41, %v10671_v4 }
 0x2fb   :  { %v2410_v15 = vsel %vm810_vm1, %v8949_v36, -inf  ;;  %v8959_v9 = vadd.f32 %v2367_v37, %v10673_v31 }
 0x2fe   :  { %v7403_v14 = vpop.f32.mrf.mxu0 }
 0x2ff   :  { %v2372_v62 = vmul.f32 0.35355338, %v7403_v14  ;;  %v10677_v14 = vld [vmem:[#allocation13_spill] sm:$0xff] }
 0x300   :  { %v2081_v48 = vpop.f32.mrf.mxu0 }
 0x301   :  { %v8967_v57 = vadd.f32 %v2372_v62, %v10675_v47  ;;  %v10680_v47 = vld [vmem:[#allocation14_spill] sm:$0xff] }
 0x31d   :  { %v8931_v34 = vpop.f32.mrf.mxu1 }
 0x31e   :  { %10666 = vst [vmem:[#allocation31_spill] sm:$0xff] %v8931_v34 }
 0x31f   :  { %v8933_v3 = vpop.f32.mrf.mxu1 }
 0x320   :  { %10667 = vst [vmem:[#allocation32_spill] sm:$0xff] %v8933_v3 }
 0x325   :  { %v7382_v43 = vpop.f32.mrf.mxu1 }
 0x326   :  { %v2366_v58 = vmul.f32 0.35355338, %v7382_v43 }
 0x327   :  { %v1808_v63 = vpop.f32.mrf.mxu1 }
 0x328   :  { %v2365_v5 = vmul.f32 0.35355338, %v1808_v63  ;;  %v8936_v11 = vadd.f32 %v2366_v58, %v10668_v6  ;;  %v2407_v58 = vsel %vm810_vm1, %v8959_v9, -inf  ;;  %v2371_v63 = vmul.f32 0.35355338, %v2081_v48  ;;  %v7417_v6 = vpop.f32.mrf.mxu0 }
 0x329   :  { %v2376_v4 = vmul.f32 0.35355338, %v7417_v6 }
 0x32a   :  { %v2404_v49 = vsel %vm810_vm1, %v8936_v11, -inf  ;;  %v8941_v40 = vadd.f32 %v2365_v5, %v10669_v44  ;;  %v2422_v44 = vsel %vm810_vm1, %v8967_v57, -inf }
 0x32b   :  { %2405 = vmax.xlane.f32.xlu0 %v2404_v49 }
 0x32c   :  { %v2401_v25 = vsel %vm810_vm1, %v8941_v40, -inf }
 0x32d   :  { %2402 = vmax.xlane.f32.xlu1 %v2401_v25  ;;  %v7396_v38 = vpop.f32.mrf.mxu1 }
 0x32e   :  { %v2370_v8 = vmul.f32 0.35355338, %v7396_v38  ;;  %v8979_v38 = vadd.f32 %v2371_v63, %v10677_v14  ;;  %v10681_v63 = vld [vmem:[#allocation16_spill] sm:$0xff] }
 0x32f   :  { %v1990_v56 = vpop.f32.mrf.mxu1  ;;  %2396 = vmax.xlane.f32.xlu0 %v2395_v13  ;;  %v10678_v13 = vld [vmem:[#allocation12_spill] sm:$0xff] }
 0x330   :  { %v2369_v46 = vmul.f32 0.35355338, %v1990_v56  ;;  %v8954_v52 = vadd.f32 %v2370_v8, %v10672_v32  ;;  %v2263_v8 = vpop.f32.mrf.mxu0 }
 0x331   :  { %v2375_v31 = vmul.f32 0.35355338, %v2263_v8  ;;  %v9030_v8 = vld [vmem:[%s10586_s0 + $0x8] sm:$0xff] }
 0x332   :  { %v2416_v33 = vsel %vm810_vm1, %v8954_v52, -inf  ;;  %v8964_v43 = vadd.f32 %v2369_v46, %v10674_v59  ;;  %v10679_v46 = vld [vmem:[#allocation15_spill] sm:$0xff] }
 0x333   :  { %2417 = vmax.xlane.f32.xlu1 %v2416_v33  ;;  %2411 = vmax.xlane.f32.xlu0 %v2410_v15  ;;  %v8987_v32 = vadd.f32 %v2376_v4, %v10679_v46  ;;  %v2419_v15 = vsel %vm810_vm1, %v8979_v38, -inf  ;;  %v9021_v4 = vld [vmem:[%s10585_s1 + $0x30] sm:$0xff] }
 0x334   :  { %v2413_v51 = vsel %vm810_vm1, %v8964_v43, -inf }
 0x335   :  { %v7410_v5 = vpop.f32.mrf.mxu1  ;;  %v2434_v6 = vsel %vm810_vm1, %v8987_v32, -inf }
 0x336   :  { %v2374_v41 = vmul.f32 0.35355338, %v7410_v5  ;;  %v8997_v5 = vadd.f32 %v2375_v31, %v10681_v63 }
 0x337   :  { %2414 = vmax.xlane.f32.xlu1 %v2413_v51  ;;  %v2172_v49 = vpop.f32.mrf.mxu1  ;;  %2408 = vmax.xlane.f32.xlu0 %v2407_v58 }
 0x338   :  { %v8976_v25 = vadd.f32 %v2374_v41, %v10676_v20  ;;  %v2373_v37 = vmul.f32 0.35355338, %v2172_v49  ;;  %v2431_v51 = vsel %vm810_vm1, %v8997_v5, -inf  ;;  %v9005_v49 = vpop.permute.xlu0 %2751 }
 0x33a   :  { %v8982_v56 = vadd.f32 %v2373_v37, %v10678_v13  ;;  %v2428_v62 = vsel %vm810_vm1, %v8976_v25, -inf  ;;  %v9014_v37 = vld [vmem:[%s10586_s0 + $0x18] sm:$0xff] }
 0x33b   :  { %2429 = vmax.xlane.f32.xlu1 %v2428_v62  ;;  %2423 = vmax.xlane.f32.xlu0 %v2422_v44  ;;  %v9039_v62 = vld [vmem:[%s10585_s1 + $0x20] sm:$0xff] }
 0x33c   :  { %v2425_v59 = vsel %vm810_vm1, %v8982_v56, -inf  ;;  %v9007_v44 = vpop.permute.xlu0 %2931  ;;  %10682 = vst [vmem:[#allocation3_spill] sm:$0xff] %v9039_v62 }
 0x33d   :  { %v7424_v48 = vpop.f32.mrf.mxu1 }
 0x33e   :  { %v2378_v33 = vmul.f32 0.35355338, %v7424_v48 }
 0x33f   :  { %2426 = vmax.xlane.f32.xlu1 %v2425_v59  ;;  %2420 = vmax.xlane.f32.xlu0 %v2419_v15  ;;  %v9048_v15 = vld [vmem:[%s10586_s0 + $0x20] sm:$0xff]  ;;  %v2354_v48 = vpop.f32.mrf.mxu1 }
 0x340   :  { %v8994_v58 = vadd.f32 %v2378_v33, %v10680_v47  ;;  %v9009_v20 = vpop.permute.xlu0 %2929  ;;  %10683 = vst [vmem:[#allocation5_spill] sm:$0xff] %v9048_v15  ;;  %v2377_v59 = vmul.f32 0.35355338, %v2354_v48  ;;  %v10684_v47 = vld [vmem:[#allocation17_spill] sm:$0xff]  ;;  %v9071_v48 = vld [vmem:[%s10586_s0 + $0x30] sm:$0xff] }
 0x341   :  { %10685 = vst [vmem:[#allocation4_spill] sm:$0xff] %v9071_v48 }
 0x342   :  { %v2440_v41 = vsel %vm810_vm1, %v8994_v58, -inf  ;;  %v9057_v63 = vadd.f32 %v2377_v59, %v10684_v47  ;;  %v9075_v59 = vpop.permute.xlu1 %3018 }
 0x343   :  { %2441 = vmax.xlane.f32.xlu1 %v2440_v41  ;;  %2435 = vmax.xlane.f32.xlu0 %v2434_v6 }
 0x344   :  { %v9025_v14 = vpop.permute.xlu0 %3109  ;;  %v2437_v41 = vsel %vm810_vm1, %v9057_v63, -inf }
 0x347   :  { %2432 = vmax.xlane.f32.xlu0 %v2431_v51 }
 0x348   :  { %v9034_v13 = vpop.permute.xlu0 %3107 }
 0x34c   :  { %v9043_v46 = vpop.permute.xlu0 %3289 }
 0x350   :  { %v9052_v31 = vpop.permute.xlu0 %3287 }
 0x354   :  { %3376 = vrot.lane.b32.xlu1 %v9014_v37, %s8032_s10  ;;  %v9054_v33 = vpop.permute.xlu0 %3283 }
 0x358   :  { %3560 = vrot.lane.b32.xlu1 %v9021_v4, %s8032_s10  ;;  %v9059_v6 = vpop.permute.xlu0 %3471 }
 0x35d   :  { %3285 = vrot.lane.b32.xlu0 %v9030_v8, %s8032_s10 }
 0x361   :  { %3469 = vrot.lane.b32.xlu0 %v9039_v62, %s8032_s10 }
 0x365   :  { %3465 = vrot.lane.b32.xlu0 %v9048_v15, %s8032_s10 }
 0x37c   :  { %2438 = vmax.xlane.f32.xlu1 %v2437_v41 }
 0x37d   :  { %v2400_v51 = vpop.xlane.xlu0 %2399 }
 0x37e   :  { %v2444_v3 = vsub.f32 %v8915_v54, %v2400_v51 }
 0x380   :  { %v2461_v34 = vmul.f32 1.442695, %v2444_v3  ;;  %v9081_v3 = vpop.permute.xlu1 %3198 }
 0x382   :  { %7775 = vpow2.f32 %v2461_v34 }
 0x384   :  { %v9083_v34 = vpop.permute.xlu1 %3196 }
 0x388   :  { %v9085_v41 = vpop.permute.xlu1 %3380 }
 0x38c   :  { %v9087_v51 = vpop.permute.xlu1 %3378 }
 0x38d   :  { %3556 = vrot.lane.b32.xlu1 %v9071_v48, %s8032_s10 }
 0x38f   :  { %v9077_v47 = vpop.eup %7775 }
 0x390   :  { %v2494_v54 = vsel %vm810_vm1, %v9077_v47, 0.0  ;;  %v9089_v60 = vpop.permute.xlu1 %3374 }
 0x391   :  { %2495 = vadd.xlane.f32.xlu0 %v2494_v54 }
 0x394   :  { %v9091_v2 = vpop.permute.xlu1 %3562 }
 0x3b4   :  { %v2406_v29 = vpop.xlane.xlu0 %2405 }
 0x3b5   :  { %v2446_v26 = vsub.f32 %v8936_v11, %v2406_v29 }
 0x3b6   :  { %v2403_v0 = vpop.xlane.xlu1 %2402 }
 0x3b7   :  { %v2465_v61 = vmul.f32 1.442695, %v2446_v26  ;;  %v2445_v10 = vsub.f32 %v8941_v40, %v2403_v0 }
 0x3b8   :  { %v2397_v54 = vpop.xlane.xlu0 %2396 }
 0x3b9   :  { %7777 = vpow2.f32 %v2465_v61  ;;  %v2463_v27 = vmul.f32 1.442695, %v2445_v10  ;;  %v2443_v1 = vsub.f32 %v8944_v22, %v2397_v54 }
 0x3bb   :  { %7779 = vpow2.f32 %v2463_v27  ;;  %v2459_v35 = vmul.f32 1.442695, %v2443_v1 }
 0x3bc   :  { %v2418_v45 = vpop.xlane.xlu1 %2417  ;;  %v2412_v16 = vpop.xlane.xlu0 %2411 }
 0x3bd   :  { %7781 = vpow2.f32 %v2459_v35  ;;  %v2450_v48 = vsub.f32 %v8954_v52, %v2418_v45  ;;  %v2448_v15 = vsub.f32 %v8949_v36, %v2412_v16 }
 0x3bf   :  { %v2473_v62 = vmul.f32 1.442695, %v2450_v48  ;;  %v2469_v29 = vmul.f32 1.442695, %v2448_v15 }
 0x3c0   :  { %v2415_v11 = vpop.xlane.xlu1 %2414  ;;  %v2409_v26 = vpop.xlane.xlu0 %2408 }
 0x3c1   :  { %7783 = vpow2.f32 %v2473_v62  ;;  %v2449_v0 = vsub.f32 %v8964_v43, %v2415_v11  ;;  %v2447_v10 = vsub.f32 %v8959_v9, %v2409_v26 }
 0x3c2   :  { %7785 = vpow2.f32 %v2469_v29 }
 0x3c3   :  { %v2471_v61 = vmul.f32 1.442695, %v2449_v0  ;;  %v2467_v27 = vmul.f32 1.442695, %v2447_v10 }
 0x3c4   :  { %v2430_v1 = vpop.xlane.xlu1 %2429  ;;  %v2424_v40 = vpop.xlane.xlu0 %2423 }
 0x3c5   :  { %7787 = vpow2.f32 %v2471_v61  ;;  %v2454_v35 = vsub.f32 %v8976_v25, %v2430_v1  ;;  %v2452_v45 = vsub.f32 %v8967_v57, %v2424_v40 }
 0x3c6   :  { %v9102_v16 = vpop.eup %7777  ;;  %7789 = vpow2.f32 %v2467_v27 }
 0x3c7   :  { %v2481_v22 = vmul.f32 1.442695, %v2454_v35  ;;  %v2477_v36 = vmul.f32 1.442695, %v2452_v45  ;;  %v2500_v52 = vsel %vm810_vm1, %v9102_v16, 0.0 }
 0x3c8   :  { %v9106_v43 = vpop.eup %7779  ;;  %v2427_v9 = vpop.xlane.xlu1 %2426  ;;  %2501 = vadd.xlane.f32.xlu1 %v2500_v52 }
 0x3c9   :  { %v2421_v62 = vpop.xlane.xlu0 %2420  ;;  %7791 = vpow2.f32 %v2481_v22  ;;  %v2453_v15 = vsub.f32 %v8982_v56, %v2427_v9  ;;  %v2497_v29 = vsel %vm810_vm1, %v9106_v43, 0.0 }
 0x3ca   :  { %v2451_v25 = vsub.f32 %v8979_v38, %v2421_v62  ;;  %v9110_v48 = vpop.eup %7781  ;;  %7793 = vpow2.f32 %v2477_v36 }
 0x3cb   :  { %v2479_v57 = vmul.f32 1.442695, %v2453_v15  ;;  %v2491_v11 = vsel %vm810_vm1, %v9110_v48, 0.0 }
 0x3cc   :  { %v2475_v54 = vmul.f32 1.442695, %v2451_v25  ;;  %v2442_v26 = vpop.xlane.xlu1 %2441  ;;  %2498 = vadd.xlane.f32.xlu1 %v2497_v29  ;;  %2492 = vadd.xlane.f32.xlu0 %v2491_v11 }
 0x3cd   :  { %v2436_v0 = vpop.xlane.xlu0 %2435  ;;  %7795 = vpow2.f32 %v2479_v57  ;;  %v2458_v56 = vsub.f32 %v8994_v58, %v2442_v26 }
 0x3ce   :  { %v2456_v38 = vsub.f32 %v8987_v32, %v2436_v0  ;;  %v9118_v10 = vpop.eup %7783  ;;  %7797 = vpow2.f32 %v2475_v54 }
 0x3cf   :  { %v9120_v61 = vpop.eup %7785  ;;  %v2489_v27 = vmul.f32 1.442695, %v2458_v56  ;;  %v2512_v40 = vsel %vm810_vm1, %v9118_v10, 0.0 }
 0x3d0   :  { %v2485_v1 = vmul.f32 1.442695, %v2456_v38  ;;  %2513 = vadd.xlane.f32.xlu1 %v2512_v40  ;;  %v2506_v35 = vsel %vm810_vm1, %v9120_v61, 0.0  ;;  %v9166_v40 = vld [vmem:[%s10585_s1 + $0x58] sm:$0xff] }
 0x3d1   :  { %v2433_v45 = vpop.xlane.xlu0 %2432  ;;  %7799 = vpow2.f32 %v2489_v27  ;;  %2507 = vadd.xlane.f32.xlu0 %v2506_v35  ;;  %v9173_v35 = vld [vmem:[%s10586_s0 + $0x38] sm:$0xff] }
 0x3d2   :  { %v2455_v58 = vsub.f32 %v8997_v5, %v2433_v45  ;;  %v9127_v32 = vpop.eup %7787  ;;  %7801 = vpow2.f32 %v2485_v1  ;;  %v9177_v45 = vpop.permute.xlu1 %3376 }
 0x3d3   :  { %v9129_v22 = vpop.eup %7789  ;;  %v2509_v52 = vsel %vm810_vm1, %v9127_v32, 0.0 }
 0x3d4   :  { %v2483_v36 = vmul.f32 1.442695, %v2455_v58  ;;  %2510 = vadd.xlane.f32.xlu1 %v2509_v52  ;;  %v2503_v9 = vsel %vm810_vm1, %v9129_v22, 0.0  ;;  %v9182_v58 = vld [vmem:[%s10585_s1 + $0x48] sm:$0xff] }
 0x3d5   :  { %2504 = vadd.xlane.f32.xlu0 %v2503_v9  ;;  %v9198_v9 = vld [vmem:[%s10585_s1 + $0x40] sm:$0xff] }
 0x3d6   :  { %7803 = vpow2.f32 %v2483_v36  ;;  %v9135_v62 = vpop.eup %7791  ;;  %v9189_v36 = vld [vmem:[%s10586_s0 + $0x28] sm:$0xff]  ;;  %v9193_v52 = vpop.permute.xlu1 %3560 }
 0x3d7   :  { %v9137_v15 = vpop.eup %7793  ;;  %v2524_v5 = vsel %vm810_vm1, %v9135_v62, 0.0 }
 0x3d8   :  { %2525 = vadd.xlane.f32.xlu1 %v2524_v5  ;;  %v2518_v25 = vsel %vm810_vm1, %v9137_v15, 0.0 }
 0x3d9   :  { %2519 = vadd.xlane.f32.xlu0 %v2518_v25 }
 0x3da   :  { %v9143_v57 = vpop.eup %7795 }
 0x3db   :  { %v9145_v54 = vpop.eup %7797  ;;  %v2521_v29 = vsel %vm810_vm1, %v9143_v57, 0.0 }
 0x3dc   :  { %2522 = vadd.xlane.f32.xlu1 %v2521_v29  ;;  %v2515_v11 = vsel %vm810_vm1, %v9145_v54, 0.0  ;;  %v9206_v29 = vld [vmem:[%s10586_s0 + $0x40] sm:$0xff] }
 0x3dd   :  { %2516 = vadd.xlane.f32.xlu0 %v2515_v11  ;;  %10686 = vst [vmem:[#allocation7_spill] sm:$0xff] %v9206_v29 }
 0x3de   :  { %v9151_v26 = vpop.eup %7799 }
 0x3df   :  { %v9153_v0 = vpop.eup %7801  ;;  %v2536_v56 = vsel %vm810_vm1, %v9151_v26, 0.0 }
 0x3e0   :  { %2537 = vadd.xlane.f32.xlu1 %v2536_v56  ;;  %v2530_v38 = vsel %vm810_vm1, %v9153_v0, 0.0  ;;  %v9213_v56 = vld [vmem:[%s10585_s1 + $0x68] sm:$0xff] }
 0x3e1   :  { %2531 = vadd.xlane.f32.xlu0 %v2530_v38  ;;  %10687 = vst [vmem:[#allocation6_spill] sm:$0xff] %v9213_v56  ;;  %v9227_v38 = vld [vmem:[%s10585_s1 + $0x60] sm:$0xff] }
 0x3e2   :  { %10689 = vst [vmem:[#allocation8_spill] sm:$0xff] %v9227_v38 }
 0x3e3   :  { %v9159_v27 = vpop.eup %7803 }
 0x3e4   :  { %v2527_v1 = vsel %vm810_vm1, %v9159_v27, 0.0 }
 0x3e5   :  { %2528 = vadd.xlane.f32.xlu0 %v2527_v1 }
 0x3f1   :  { %3744 = vrot.lane.b32.xlu1 %v9166_v40, %s8032_s10 }
 0x3f5   :  { %3558 = vrot.lane.b32.xlu1 %v9173_v35, %s8032_s10 }
 0x3fb   :  { %3653 = vrot.lane.b32.xlu0 %v9182_v58, %s8032_s10 }
 0x3ff   :  { %3467 = vrot.lane.b32.xlu0 %v9189_v36, %s8032_s10 }
 0x403   :  { %3651 = vrot.lane.b32.xlu0 %v9198_v9, %s8032_s10 }
 0x405   :  { %v2439_v5 = vpop.xlane.xlu1 %2438 }
 0x406   :  { %v2457_v25 = vsub.f32 %v9057_v63, %v2439_v5  ;;  %v9220_v63 = vld [vmem:[%s10586_s0 + $0x48] sm:$0xff]  ;;  %v9236_v5 = vld [vmem:[%s10586_s0 + $0x60] sm:$0xff] }
 0x407   :  { %3647 = vrot.lane.b32.xlu0 %v9206_v29, %s8032_s10  ;;  %10688 = vst [vmem:[#allocation9_spill] sm:$0xff] %v9220_v63  ;;  %10690 = vst [vmem:[#allocation11_spill] sm:$0xff] %v9236_v5 }
 0x408   :  { %v2487_v11 = vmul.f32 1.442695, %v2457_v25 }
 0x40a   :  { %7805 = vpow2.f32 %v2487_v11  ;;  %v9245_v11 = vld [vmem:[%s10586_s0 + $0x68] sm:$0xff] }
 0x40b   :  { %3835 = vrot.lane.b32.xlu0 %v9213_v56, %s8032_s10  ;;  %10691 = vst [vmem:[#allocation10_spill] sm:$0xff] %v9245_v11 }
 0x40f   :  { %3649 = vrot.lane.b32.xlu0 %v9220_v63, %s8032_s10  ;;  %v7996_v63 = vld [vmem:[%s10585_s1 + $0x8] sm:$0xff] }
 0x413   :  { %3833 = vrot.lane.b32.xlu0 %v9227_v38, %s8032_s10  ;;  %v9252_v38 = vld [vmem:[%s10588_s2 + $0x8] sm:$0xff] }
 0x414   :  { %10692 = vst [vmem:[#allocation13_spill] sm:$0xff] %v9252_v38 }
 0x417   :  { %v9231_v1 = vpop.eup %7805  ;;  %3829 = vrot.lane.b32.xlu0 %v9236_v5, %s8032_s10 }
 0x418   :  { %v2533_v25 = vsel %vm810_vm1, %v9231_v1, 0.0 }
 0x419   :  { %2534 = vadd.xlane.f32.xlu1 %v2533_v25  ;;  %v9263_v25 = vld [vmem:[%s10585_s1 + $0x50] sm:$0xff] }
 0x41a   :  { %10693 = vst [vmem:[#allocation12_spill] sm:$0xff] %v9263_v25 }
 0x41b   :  { %3831 = vrot.lane.b32.xlu0 %v9245_v11, %s8032_s10  ;;  %v9349_v11 = vld [vmem:[%s10588_s2 + $0x38] sm:$0xff] }
 0x41c   :  { %10703 = vst [vmem:[#allocation38_spill] sm:$0xff] %v9349_v11 }
 0x41f   :  { %4221 = vrot.lane.b32.xlu0 %v9252_v38, %s8032_s10  ;;  %v9272_v38 = vld [vmem:[%s10586_s0 + $0x50] sm:$0xff] }
 0x420   :  { %10694 = vst [vmem:[#allocation15_spill] sm:$0xff] %v9272_v38 }
 0x423   :  { %4395 = vrot.lane.b32.xlu0 %v8612_v55, %s8032_s10  ;;  %v9281_v55 = vld [vmem:[%s10585_s1 + $0x78] sm:$0xff] }
 0x424   :  { %10695 = vst [vmem:[#allocation14_spill] sm:$0xff] %v9281_v55 }
 0x427   :  { %4393 = vrot.lane.b32.xlu0 %v8658_v17, %s8032_s10  ;;  %v9290_v17 = vld [vmem:[%s10586_s0 + $0x58] sm:$0xff] }
 0x428   :  { %10696 = vst [vmem:[#allocation16_spill] sm:$0xff] %v9290_v17 }
 0x42a   :  { %3742 = vrot.lane.b32.xlu1 %v9263_v25, %s8032_s10 }
 0x42b   :  { %4569 = vrot.lane.b32.xlu0 %v8665_v19, %s8032_s10  ;;  %v9299_v19 = vld [vmem:[%s10585_s1 + $0x70] sm:$0xff] }
 0x42c   :  { %10697 = vst [vmem:[#allocation17_spill] sm:$0xff] %v9299_v19 }
 0x42e   :  { %3738 = vrot.lane.b32.xlu1 %v9272_v38, %s8032_s10  ;;  %v9342_v38 = vld [vmem:[%s10588_s2 + $0x10] sm:$0xff] }
 0x42f   :  { %4567 = vrot.lane.b32.xlu0 %v8674_v21, %s8032_s10  ;;  %v9306_v21 = vld [vmem:[%s10586_s0 + $0x70] sm:$0xff]  ;;  %10702 = vst [vmem:[#allocation37_spill] sm:$0xff] %v9342_v38 }
 0x430   :  { %10698 = vst [vmem:[#allocation33_spill] sm:$0xff] %v9306_v21 }
 0x432   :  { %3926 = vrot.lane.b32.xlu1 %v9281_v55, %s8032_s10 }
 0x433   :  { %4743 = vrot.lane.b32.xlu0 %v8683_v23, %s8032_s10  ;;  %v9310_v23 = vpop.permute.xlu0 %3285 }
 0x436   :  { %3740 = vrot.lane.b32.xlu1 %v9290_v17, %s8032_s10 }
 0x437   :  { %4741 = vrot.lane.b32.xlu0 %v8692_v18, %s8032_s10  ;;  %v9315_v18 = vld [vmem:[%s10586_s0 + $0x78] sm:$0xff]  ;;  %v9319_v17 = vpop.permute.xlu0 %3469 }
 0x438   :  { %10699 = vst [vmem:[#allocation34_spill] sm:$0xff] %v9315_v18 }
 0x43a   :  { %3924 = vrot.lane.b32.xlu1 %v9299_v19, %s8032_s10  ;;  %v9324_v19 = vld [vmem:[%s10588_s2 + $0x18] sm:$0xff] }
 0x43b   :  { %10700 = vst [vmem:[#allocation35_spill] sm:$0xff] %v9324_v19  ;;  %v9335_v55 = vpop.permute.xlu0 %3465  ;;  %4921 = vrot.lane.b32.xlu0 %v7996_v63, %s8033_s28  ;;  %v7998_v63 = vld [vmem:[%s10586_s0] sm:$0xff] }
 0x43e   :  { %3920 = vrot.lane.b32.xlu1 %v9306_v21, %s8032_s10  ;;  %v9331_v21 = vld [vmem:[%s10588_s2] sm:$0xff] }
 0x43f   :  { %10701 = vst [vmem:[#allocation36_spill] sm:$0xff] %v9331_v21 }
 0x442   :  { %3922 = vrot.lane.b32.xlu1 %v9315_v18, %s8032_s10  ;;  %v9337_v18 = vpop.permute.xlu1 %3556 }
 0x446   :  { %4308 = vrot.lane.b32.xlu1 %v9324_v19, %s8032_s10  ;;  %v2496_v19 = vpop.xlane.xlu0 %2495 }
 0x447   :  { %7807 = vrcp.f32 %v2496_v19  ;;  %v7997_v19 = vld [vmem:[%s10585_s1] sm:$0xff] }
 0x448   :  { %4919 = vrot.lane.b32.xlu0 %v7997_v19, %s8033_s28 }
 0x44a   :  { %4219 = vrot.lane.b32.xlu1 %v9331_v21, %s8032_s10 }
 0x44c   :  { %4915 = vrot.lane.b32.xlu0 %v7998_v63, %s8033_s28 }
 0x44e   :  { %4306 = vrot.lane.b32.xlu1 %v9342_v38, %s8032_s10 }
 0x451   :  { %v2502_v25 = vpop.xlane.xlu1 %2501 }
 0x452   :  { %4482 = vrot.lane.b32.xlu1 %v9349_v11, %s8032_s10  ;;  %7809 = vrcp.f32 %v2502_v25 }
 0x455   :  { %v2499_v21 = vpop.xlane.xlu1 %2498  ;;  %v2493_v5 = vpop.xlane.xlu0 %2492 }
 0x456   :  { %7811 = vrcp.f32 %v2499_v21  ;;  %4480 = vrot.lane.b32.xlu1 %v8720_v30, %s8032_s10 }
 0x457   :  { %7813 = vrcp.f32 %v2493_v5  ;;  %v7808_v5 = vpop.eup %7807 }
 0x459   :  { %v2514_v38 = vpop.xlane.xlu1 %2513 }
 0x45a   :  { %v2508_v25 = vpop.xlane.xlu0 %2507  ;;  %4656 = vrot.lane.b32.xlu1 %v8729_v42, %s8032_s10  ;;  %7815 = vrcp.f32 %v2514_v38  ;;  %v7999_v42 = vld [vmem:[%s10585_s1 + $0x28] sm:$0xff] }
 0x45b   :  { %7817 = vrcp.f32 %v2508_v25  ;;  %5103 = vrot.lane.b32.xlu0 %v7999_v42, %s8033_s28  ;;  %v2556_v42 = vmul.f32 %v7808_v5, %v9077_v47 }
 0x45d   :  { %v2511_v11 = vpop.xlane.xlu1 %2510 }
 0x45e   :  { %7819 = vrcp.f32 %v2511_v11  ;;  %v2505_v30 = vpop.xlane.xlu0 %2504  ;;  %4654 = vrot.lane.b32.xlu1 %v8738_v53, %s8032_s10 }
 0x45f   :  { %7821 = vrcp.f32 %v2505_v30  ;;  %v7810_v38 = vpop.eup %7809 }
 0x460   :  { %v2558_v56 = vmul.f32 %v7810_v38, %v9102_v16 }
 0x461   :  { %v2526_v21 = vpop.xlane.xlu1 %2525 }
 0x462   :  { %v2520_v19 = vpop.xlane.xlu0 %2519  ;;  %4830 = vrot.lane.b32.xlu1 %v8748_v50, %s8032_s10  ;;  %7823 = vrcp.f32 %v2526_v21 }
 0x463   :  { %v7812_v25 = vpop.eup %7811  ;;  %7825 = vrcp.f32 %v2520_v19 }
 0x464   :  { %v7814_v11 = vpop.eup %7813  ;;  %v2557_v63 = vmul.f32 %v7812_v25, %v9106_v43 }
 0x465   :  { %v2523_v53 = vpop.xlane.xlu1 %2522  ;;  %v2555_v30 = vmul.f32 %v7814_v11, %v9110_v48 }
 0x466   :  { %7827 = vrcp.f32 %v2523_v53  ;;  %v2517_v29 = vpop.xlane.xlu0 %2516  ;;  %7436 = vmatprep.mubr.msk.f32.mxu1 %vm810_vm1, %v2557_v63  ;;  %4828 = vrot.lane.b32.xlu1 %v8769_v12, %s8032_s10 }
 0x467   :  { %7829 = vrcp.f32 %v2517_v29  ;;  %7429 = vmatprep.mubr.msk.f32.mxu0 %vm810_vm1, %v2555_v30  ;;  %7437 = vmatmul.mubr.msk.f32.vlgmr.msra.gmra.mxu1 %vm810_vm1, %v2558_v56  ;;  %v7816_v50 = vpop.eup %7815 }
 0x468   :  { %7430 = vmatmul.mubr.msk.f32.vlgmr.msra.gmra.mxu0 %vm810_vm1, %v2556_v42  ;;  %7447 = vmatpush3.msra.mxu1 %v8897_v7  ;;  %v7818_v16 = vpop.eup %7817 }
 0x469   :  { %7440 = vmatpush3.msra.mxu0 %v8892_v24  ;;  %7448 = vmatprep.subr.mxu1 %v9064_v39  ;;  %v8000_v24 = vld [vmem:[%s10585_s1 + $0x18] sm:$0xff] }
 0x46a   :  { %7441 = vmatprep.subr.mxu0 %v9005_v49  ;;  %7449 = vmatpush3.msra.mxu1 %v9064_v39  ;;  %v2532_v12 = vpop.xlane.xlu0 %2531  ;;  %v2562_v39 = vmul.f32 %v7816_v50, %v9118_v10 }
 0x46b   :  { %v7820_v47 = vpop.eup %7819  ;;  %7442 = vmatpush3.msra.mxu0 %v9005_v49  ;;  %7460 = vmatprep.subr.mxu1 %v9066_v28  ;;  %7831 = vrcp.f32 %v2532_v12  ;;  %v2560_v49 = vmul.f32 %v7818_v16, %v9120_v61 }
 0x46c   :  { %v7822_v43 = vpop.eup %7821  ;;  %7453 = vmatprep.subr.mxu0 %v9007_v44  ;;  %v2561_v7 = vmul.f32 %v7820_v47, %v9127_v32  ;;  %5012 = vrot.lane.b32.xlu1 %v8000_v24, %s8033_s28 }
 0x46d   :  { %v2559_v48 = vmul.f32 %v7822_v43, %v9129_v22 }
 0x46e   :  { %v2529_v29 = vpop.xlane.xlu0 %2528  ;;  %7450 = vmatprep.mubr.msk.f32.mxu1 %vm810_vm1, %v2561_v7 }
 0x46f   :  { %7833 = vrcp.f32 %v2529_v29  ;;  %7443 = vmatprep.mubr.msk.f32.mxu0 %vm810_vm1, %v2559_v48  ;;  %7451 = vmatmul.mubr.msk.f32.vlgmr.msra.gmra.mxu1 %vm810_vm1, %v2562_v39  ;;  %v7824_v32 = vpop.eup %7823 }
 0x470   :  { %7444 = vmatmul.mubr.msk.f32.vlgmr.msra.gmra.mxu0 %vm810_vm1, %v2560_v49  ;;  %7461 = vmatpush3.msra.mxu1 %v9066_v28  ;;  %v7826_v10 = vpop.eup %7825  ;;  %v9544_v49 = vld [vmem:[%s10587_s3 + $0x8] sm:$0xff] }
 0x471   :  { %7454 = vmatpush3.msra.mxu0 %v9007_v44  ;;  %7462 = vmatprep.subr.mxu1 %v9075_v59  ;;  %v8001_v44 = vld [vmem:[%s10585_s1 + $0x10] sm:$0xff] }
 0x472   :  { %7455 = vmatprep.subr.mxu0 %v9009_v20  ;;  %7463 = vmatpush3.msra.mxu1 %v9075_v59  ;;  %v3654_v61 = vpop.permute.xlu0 %3653  ;;  %v2566_v59 = vmul.f32 %v7824_v32, %v9135_v62 }
 0x473   :  { %v7828_v22 = vpop.eup %7827  ;;  %7456 = vmatpush3.msra.mxu0 %v9009_v20  ;;  %7474 = vmatprep.subr.mxu1 %v9081_v3  ;;  %v2564_v20 = vmul.f32 %v7826_v10, %v9137_v15 }
 0x474   :  { %v7830_v56 = vpop.eup %7829  ;;  %7467 = vmatprep.subr.mxu0 %v9025_v14  ;;  %v2565_v28 = vmul.f32 %v7828_v22, %v9143_v57  ;;  %5010 = vrot.lane.b32.xlu1 %v8001_v44, %s8033_s28 }
 0x475   :  { %v2563_v5 = vmul.f32 %v7830_v56, %v9145_v54  ;;  %v8003_v54 = vld [vmem:[%s10585_s1 + $0x38] sm:$0xff] }
 0x476   :  { %7464 = vmatprep.mubr.msk.f32.mxu1 %vm810_vm1, %v2565_v28  ;;  %v3468_v21 = vpop.permute.xlu0 %3467 }
 0x477   :  { %7457 = vmatprep.mubr.msk.f32.mxu0 %vm810_vm1, %v2563_v5  ;;  %7465 = vmatmul.mubr.msk.f32.vlgmr.msra.gmra.mxu1 %vm810_vm1, %v2566_v59 }
 0x478   :  { %7458 = vmatmul.mubr.msk.f32.vlgmr.msra.gmra.mxu0 %vm810_vm1, %v2564_v20  ;;  %7475 = vmatpush3.msra.mxu1 %v9081_v3  ;;  %v7832_v57 = vpop.eup %7831 }
 0x479   :  { %7468 = vmatpush3.msra.mxu0 %v9025_v14  ;;  %7476 = vmatprep.subr.mxu1 %v9083_v34  ;;  %v8002_v14 = vld [vmem:[%s10586_s0 + $0x10] sm:$0xff] }
 0x47a   :  { %7469 = vmatprep.subr.mxu0 %v9034_v13  ;;  %7477 = vmatpush3.msra.mxu1 %v9083_v34  ;;  %v3652_v62 = vpop.permute.xlu0 %3651  ;;  %v2568_v34 = vmul.f32 %v7832_v57, %v9153_v0 }
 0x47b   :  { %7470 = vmatpush3.msra.mxu0 %v9034_v13  ;;  %7488 = vmatprep.subr.msk.mxu1 %vm81_vm0, %v9085_v41 }
 0x47c   :  { %v7834_v15 = vpop.eup %7833  ;;  %7481 = vmatprep.subr.msk.mxu0 %vm81_vm0, %v9043_v46  ;;  %5006 = vrot.lane.b32.xlu1 %v8002_v14, %s8033_s28 }
 0x47d   :  { %v2567_v3 = vmul.f32 %v7834_v15, %v9159_v27 }
 0x47e   :  { %v3648_v13 = vpop.permute.xlu0 %3647 }
 0x47f   :  { %7471 = vmatprep.mubr.msk.f32.mxu0 %vm810_vm1, %v2567_v3 }
 0x480   :  { %7472 = vmatmul.mubr.msk.f32.vlgmr.msra.gmra.mxu0 %vm810_vm1, %v2568_v34  ;;  %5194 = vrot.lane.b32.xlu1 %v8003_v54, %s8033_s28  ;;  %v9570_v34 = vld [vmem:[%s10587_s3 + $0x18] sm:$0xff] }
 0x481   :  { %7482 = vmatpush3.xpose.msk.msra.mxu0 %vm81_vm0, %v9043_v46  ;;  %7485 = vmatprep.mubr.msk.f32.mxu0 %vm81_vm0, %v9054_v33  ;;  %v2538_v33 = vpop.xlane.xlu1 %2537 }
 0x482   :  { %7483 = vmatprep.subr.msk.mxu0 %vm81_vm0, %v9052_v31  ;;  %v3836_v0 = vpop.permute.xlu0 %3835  ;;  %7835 = vrcp.f32 %v2538_v33 }
 0x485   :  { %7484 = vmatpush3.xpose.msk.msra.mxu0 %vm81_vm0, %v9052_v31  ;;  %v3745_v27 = vpop.permute.xlu1 %3744 }
 0x486   :  { %7495 = vmatprep.subr.msk.mxu0 %vm81_vm0, %v9059_v6  ;;  %v3650_v46 = vpop.permute.xlu0 %3649 }
 0x488   :  { %7486 = vmatmul.mubr.msk.f32.vlgmr.msra.gmra.mxu0 %vm81_vm0, %v9310_v23 }
 0x489   :  { %7496 = vmatpush3.xpose.msk.msra.mxu0 %vm81_vm0, %v9059_v6  ;;  %7499 = vmatprep.mubr.msk.f32.mxu0 %vm81_vm0, %v9335_v55 }
 0x48a   :  { %7497 = vmatprep.subr.msk.mxu0 %vm81_vm0, %v9319_v17  ;;  %v3834_v31 = vpop.permute.xlu0 %3833 }
 0x48d   :  { %7498 = vmatpush3.xpose.msk.msra.mxu0 %vm81_vm0, %v9319_v17  ;;  %v3559_v17 = vpop.permute.xlu1 %3558 }
 0x48e   :  { %7509 = vmatprep.subr.msk.mxu0 %vm81_vm0, %v3654_v61  ;;  %v3830_v6 = vpop.permute.xlu0 %3829 }
 0x48f   :  { %v7836_v19 = vpop.eup %7835 }
 0x490   :  { %7500 = vmatmul.mubr.msk.f32.vlgmr.msra.gmra.mxu0 %vm81_vm0, %v3468_v21  ;;  %v2570_v63 = vmul.f32 %v7836_v19, %v9151_v26 }
 0x491   :  { %7510 = vmatpush3.xpose.msk.msra.mxu0 %vm81_vm0, %v3654_v61  ;;  %7513 = vmatprep.mubr.msk.f32.mxu0 %vm81_vm0, %v3648_v13 }
 0x492   :  { %7511 = vmatprep.subr.msk.mxu0 %vm81_vm0, %v3652_v62  ;;  %v3832_v55 = vpop.permute.xlu0 %3831 }
 0x495   :  { %7512 = vmatpush3.xpose.msk.msra.mxu0 %vm81_vm0, %v3652_v62 }
 0x496   :  { %7523 = vmatprep.subr.msk.mxu0 %vm81_vm0, %v3836_v0 }
 0x498   :  { %7514 = vmatmul.mubr.msk.f32.vlgmr.msra.gmra.mxu0 %vm81_vm0, %v3650_v46 }
 0x499   :  { %7524 = vmatpush3.xpose.msk.msra.mxu0 %vm81_vm0, %v3836_v0  ;;  %7527 = vmatprep.mubr.msk.f32.mxu0 %vm81_vm0, %v3830_v6  ;;  %v9586_v6 = vld [vmem:[%s10587_s3 + $0x10] sm:$0xff] }
 0x49a   :  { %7525 = vmatprep.subr.msk.mxu0 %vm81_vm0, %v3834_v31 }
 0x49d   :  { %7526 = vmatpush3.xpose.msk.msra.mxu0 %vm81_vm0, %v3834_v31  ;;  %v9578_v31 = vld [vmem:[%s10587_s3] sm:$0xff] }
 0x4a0   :  { %7528 = vmatmul.mubr.msk.f32.vlgmr.msra.gmra.mxu0 %vm81_vm0, %v3832_v55 }
 0x4a2   :  { %v2535_v23 = vpop.xlane.xlu1 %2534 }
 0x4a3   :  { %7837 = vrcp.f32 %v2535_v23 }
 0x4a6   :  { %v3743_v38 = vpop.permute.xlu1 %3742 }
 0x4aa   :  { %v3739_v53 = vpop.permute.xlu1 %3738 }
 0x4ae   :  { %v3927_v30 = vpop.permute.xlu1 %3926 }
 0x4b0   :  { %v7838_v25 = vpop.eup %7837 }
 0x4b1   :  { %v2569_v11 = vmul.f32 %v7838_v25, %v9231_v1 }
 0x4b3   :  { %7478 = vmatprep.mubr.msk.f32.mxu1 %vm810_vm1, %v2569_v11 }
 0x4b4   :  { %7479 = vmatmul.mubr.msk.f32.vlgmr.msra.gmra.mxu1 %vm810_vm1, %v2570_v63 }
 0x4b5   :  { %7489 = vmatpush3.xpose.msk.msra.mxu1 %vm81_vm0, %v9085_v41  ;;  %7492 = vmatprep.mubr.msk.f32.mxu1 %vm81_vm0, %v9089_v60  ;;  %v3741_v60 = vpop.permute.xlu1 %3740 }
 0x4b6   :  { %7490 = vmatprep.subr.msk.mxu1 %vm81_vm0, %v9087_v51 }
 0x4b9   :  { %7491 = vmatpush3.xpose.msk.msra.mxu1 %vm81_vm0, %v9087_v51  ;;  %v3925_v41 = vpop.permute.xlu1 %3924 }
 0x4ba   :  { %7502 = vmatprep.subr.msk.mxu1 %vm81_vm0, %v9091_v2 }
 0x4bc   :  { %7493 = vmatmul.mubr.msk.f32.vlgmr.msra.gmra.mxu1 %vm81_vm0, %v9177_v45  ;;  %v4222_v45 = vpop.permute.xlu0 %4221 }
 0x4bd   :  { %7503 = vmatpush3.xpose.msk.msra.mxu1 %vm81_vm0, %v9091_v2  ;;  %7506 = vmatprep.mubr.msk.f32.mxu1 %vm81_vm0, %v9337_v18  ;;  %v3921_v2 = vpop.permute.xlu1 %3920 }
 0x4be   :  { %7504 = vmatprep.subr.msk.mxu1 %vm81_vm0, %v9193_v52  ;;  %7537 = vmatprep.subr.mxu0 %v4222_v45 }
 0x4bf   :  { %7538 = vmatpush3.msra.mxu0 %v4222_v45 }
 0x4c0   :  { %v9519_v18 = vpop.permute.xlu0 %4395 }
 0x4c1   :  { %7505 = vmatpush3.xpose.msk.msra.mxu1 %vm81_vm0, %v9193_v52  ;;  %v3923_v51 = vpop.permute.xlu1 %3922 }
 0x4c2   :  { %7516 = vmatprep.subr.msk.mxu1 %vm81_vm0, %v3745_v27 }
 0x4c4   :  { %7507 = vmatmul.mubr.msk.f32.vlgmr.msra.gmra.mxu1 %vm81_vm0, %v3559_v17 }
 0x4c5   :  { %7517 = vmatpush3.xpose.msk.msra.mxu1 %vm81_vm0, %v3745_v27  ;;  %7520 = vmatprep.mubr.msk.f32.mxu1 %vm81_vm0, %v3739_v53  ;;  %v4309_v26 = vpop.permute.xlu1 %4308 }
 0x4c6   :  { %7518 = vmatprep.subr.msk.mxu1 %vm81_vm0, %v3743_v38 }
 0x4c9   :  { %7519 = vmatpush3.xpose.msk.msra.mxu1 %vm81_vm0, %v3743_v38  ;;  %v4220_v52 = vpop.permute.xlu1 %4219  ;;  %v9598_v38 = vld [vmem:[%s10587_s3 + $0x28] sm:$0xff] }
 0x4ca   :  { %7530 = vmatprep.subr.msk.mxu1 %vm81_vm0, %v3927_v30  ;;  %7539 = vmatprep.subr.mxu0 %v4220_v52 }
 0x4cb   :  { %7540 = vmatpush3.msra.mxu0 %v4220_v52 }
 0x4cc   :  { %7521 = vmatmul.mubr.msk.f32.vlgmr.msra.gmra.mxu1 %vm81_vm0, %v3741_v60  ;;  %7551 = vmatprep.subr.mxu0 %v9519_v18  ;;  %v9608_v60 = vld [vmem:[%s10587_s3 + $0x20] sm:$0xff] }
 0x4cd   :  { %7531 = vmatpush3.xpose.msk.msra.mxu1 %vm81_vm0, %v3927_v30  ;;  %7534 = vmatprep.mubr.msk.f32.mxu1 %vm81_vm0, %v3921_v2  ;;  %v4307_v1 = vpop.permute.xlu1 %4306  ;;  %v9616_v2 = vld [vmem:[%s10587_s3 + $0x38] sm:$0xff] }
 0x4ce   :  { %7532 = vmatprep.subr.msk.mxu1 %vm81_vm0, %v3925_v41 }
 0x4d1   :  { %7533 = vmatpush3.xpose.msk.msra.mxu1 %vm81_vm0, %v3925_v41  ;;  %v9522_v42 = vpop.permute.xlu1 %4482 }
 0x4d2   :  { %7544 = vmatprep.subr.mxu1 %v4309_v26 }
 0x4d4   :  { %7535 = vmatmul.mubr.msk.f32.vlgmr.msra.gmra.mxu1 %vm81_vm0, %v3923_v51 }
 0x4d5   :  { %7545 = vmatpush3.msra.mxu1 %v4309_v26 }
 0x4d6   :  { %7546 = vmatprep.subr.mxu1 %v4307_v1 }
 0x4d7   :  { %7547 = vmatpush3.msra.mxu1 %v4307_v1 }
 0x4d8   :  { %7558 = vmatprep.subr.mxu1 %v9522_v42 }
 0x527   :  { %v9551_v61 = vpop.f32.mrf.mxu1 }
 0x528   :  { %v9524_v50 = vpop.f32.mrf.mxu0  ;;  %10712 = vst [vmem:[#allocation47_spill] sm:$0xff] %v9551_v61 }
 0x529   :  { %10704 = vst [vmem:[#allocation39_spill] sm:$0xff] %v9524_v50  ;;  %v9553_v22 = vpop.f32.mrf.mxu1  ;;  %v10730_v50 = vld [vmem:[#allocation4_spill] sm:$0xff] }
 0x52a   :  { %v9527_v16 = vpop.f32.mrf.mxu0  ;;  %10713 = vst [vmem:[#allocation48_spill] sm:$0xff] %v9553_v22 }
 0x52b   :  { %10705 = vst [vmem:[#allocation40_spill] sm:$0xff] %v9527_v16 }
 0x52f   :  { %v9555_v56 = vpop.f32.mrf.mxu1 }
 0x530   :  { %v9529_v12 = vpop.f32.mrf.mxu0  ;;  %10714 = vst [vmem:[#allocation49_spill] sm:$0xff] %v9555_v56 }
 0x531   :  { %10706 = vst [vmem:[#allocation41_spill] sm:$0xff] %v9529_v12  ;;  %v9557_v28 = vpop.f32.mrf.mxu1 }
 0x532   :  { %v9531_v47 = vpop.f32.mrf.mxu0  ;;  %10715 = vst [vmem:[#allocation50_spill] sm:$0xff] %v9557_v28 }
 0x533   :  { %10707 = vst [vmem:[#allocation42_spill] sm:$0xff] %v9531_v47 }
 0x537   :  { %v9559_v44 = vpop.f32.mrf.mxu1 }
 0x538   :  { %v9533_v43 = vpop.f32.mrf.mxu0  ;;  %10716 = vst [vmem:[#allocation51_spill] sm:$0xff] %v9559_v44 }
 0x539   :  { %10708 = vst [vmem:[#allocation43_spill] sm:$0xff] %v9533_v43  ;;  %v9561_v5 = vpop.f32.mrf.mxu1 }
 0x53a   :  { %v9535_v7 = vpop.f32.mrf.mxu0  ;;  %10717 = vst [vmem:[#allocation52_spill] sm:$0xff] %v9561_v5 }
 0x53b   :  { %10709 = vst [vmem:[#allocation44_spill] sm:$0xff] %v9535_v7 }
 0x540   :  { %v9537_v24 = vpop.f32.mrf.mxu0 }
 0x541   :  { %10710 = vst [vmem:[#allocation45_spill] sm:$0xff] %v9537_v24 }
 0x542   :  { %v9539_v48 = vpop.f32.mrf.mxu0 }
 0x543   :  { %10711 = vst [vmem:[#allocation46_spill] sm:$0xff] %v9539_v48 }
 0x548   :  { %v7487_v39 = vpop.f32.mrf.mxu0 }
 0x549   :  { %v4012_v29 = vmul.f32 0.35355338, %v7487_v39  ;;  %v9626_v39 = vld [vmem:[%s10587_s3 + $0x30] sm:$0xff] }
 0x54a   :  { %v3365_v20 = vpop.f32.mrf.mxu0 }
 0x54b   :  { %v9547_v32 = vadd.f32 %v9544_v49, %v4012_v29  ;;  %v4011_v15 = vmul.f32 0.35355338, %v3365_v20 }
 0x54d   :  { %v4046_v10 = vsel %vm810_vm1, %v9547_v32, -inf  ;;  %v9581_v33 = vadd.f32 %v9578_v31, %v4011_v15 }
 0x54e   :  { %4047 = vmax.xlane.f32.xlu0 %v4046_v10 }
 0x54f   :  { %v4043_v53 = vsel %vm810_vm1, %v9581_v33, -inf }
 0x550   :  { %v7501_v57 = vpop.f32.mrf.mxu0 }
 0x551   :  { %v4016_v0 = vmul.f32 0.35355338, %v7501_v57 }
 0x552   :  { %v3547_v46 = vpop.f32.mrf.mxu0 }
 0x553   :  { %v4015_v17 = vmul.f32 0.35355338, %v3547_v46  ;;  %v9601_v19 = vadd.f32 %v9598_v38, %v4016_v0 }
 0x555   :  { %v9611_v41 = vadd.f32 %v9608_v60, %v4015_v17  ;;  %v4058_v45 = vsel %vm810_vm1, %v9601_v19, -inf }
 0x557   :  { %v4055_v15 = vsel %vm810_vm1, %v9611_v41, -inf }
 0x558   :  { %v7515_v11 = vpop.f32.mrf.mxu0 }
 0x559   :  { %v4020_v52 = vmul.f32 0.35355338, %v7515_v11 }
 0x55a   :  { %v3729_v1 = vpop.f32.mrf.mxu0 }
 0x55b   :  { %v4019_v20 = vmul.f32 0.35355338, %v3729_v1  ;;  %v9676_v1 = vld [vmem:[%s10587_s3 + $0x68] sm:$0xff] }
 0x55c   :  { %10724 = vst [vmem:[#allocation59_spill] sm:$0xff] %v9676_v1 }
 0x574   :  { %v9563_v59 = vpop.f32.mrf.mxu1 }
 0x575   :  { %10718 = vst [vmem:[#allocation53_spill] sm:$0xff] %v9563_v59 }
 0x576   :  { %v9565_v21 = vpop.f32.mrf.mxu1 }
 0x577   :  { %10719 = vst [vmem:[#allocation54_spill] sm:$0xff] %v9565_v21 }
 0x57c   :  { %v7494_v62 = vpop.f32.mrf.mxu1 }
 0x57d   :  { %v4014_v14 = vmul.f32 0.35355338, %v7494_v62  ;;  %v9636_v62 = vld [vmem:[%s10587_s3 + $0x48] sm:$0xff] }
 0x57e   :  { %v3456_v3 = vpop.f32.mrf.mxu1  ;;  %10720 = vst [vmem:[#allocation55_spill] sm:$0xff] %v9636_v62  ;;  %v9639_v57 = vadd.f32 %v9636_v62, %v4020_v52 }
 0x57f   :  { %v9573_v13 = vadd.f32 %v9570_v34, %v4014_v14  ;;  %v4013_v54 = vmul.f32 0.35355338, %v3456_v3  ;;  %v7529_v3 = vpop.f32.mrf.mxu0 }
 0x581   :  { %v9589_v27 = vadd.f32 %v9586_v6, %v4013_v54  ;;  %v4052_v55 = vsel %vm810_vm1, %v9573_v13, -inf }
 0x582   :  { %4053 = vmax.xlane.f32.xlu0 %v4052_v55  ;;  %v9648_v55 = vld [vmem:[%s10587_s3 + $0x40] sm:$0xff] }
 0x583   :  { %v4049_v23 = vsel %vm810_vm1, %v9589_v27, -inf  ;;  %10721 = vst [vmem:[#allocation56_spill] sm:$0xff] %v9648_v55  ;;  %v9651_v17 = vadd.f32 %v9648_v55, %v4019_v20 }
 0x584   :  { %4050 = vmax.xlane.f32.xlu1 %v4049_v23  ;;  %v7508_v25 = vpop.f32.mrf.mxu1  ;;  %v9656_v23 = vld [vmem:[%s10587_s3 + $0x58] sm:$0xff] }
 0x585   :  { %v4018_v63 = vmul.f32 0.35355338, %v7508_v25  ;;  %10722 = vst [vmem:[#allocation57_spill] sm:$0xff] %v9656_v23  ;;  %v4067_v20 = vsel %vm810_vm1, %v9651_v17, -inf }
 0x586   :  { %v3638_v30 = vpop.f32.mrf.mxu1  ;;  %4044 = vmax.xlane.f32.xlu0 %v4043_v53  ;;  %v4024_v53 = vmul.f32 0.35355338, %v7529_v3 }
 0x587   :  { %v9619_v51 = vadd.f32 %v9616_v2, %v4018_v63  ;;  %v4017_v26 = vmul.f32 0.35355338, %v3638_v30  ;;  %v4070_v63 = vsel %vm810_vm1, %v9639_v57, -inf  ;;  %v3911_v30 = vpop.f32.mrf.mxu0 }
 0x589   :  { %v9629_v29 = vadd.f32 %v9626_v39, %v4017_v26  ;;  %v4064_v10 = vsel %vm810_vm1, %v9619_v51, -inf  ;;  %v9666_v26 = vld [vmem:[%s10587_s3 + $0x50] sm:$0xff] }
 0x58a   :  { %4065 = vmax.xlane.f32.xlu1 %v4064_v10  ;;  %4059 = vmax.xlane.f32.xlu0 %v4058_v45  ;;  %10723 = vst [vmem:[#allocation58_spill] sm:$0xff] %v9666_v26  ;;  %v9679_v10 = vadd.f32 %v9676_v1, %v4024_v53 }
 0x58b   :  { %v4061_v0 = vsel %vm810_vm1, %v9629_v29, -inf }
 0x58c   :  { %v7522_v14 = vpop.f32.mrf.mxu1  ;;  %v4082_v53 = vsel %vm810_vm1, %v9679_v10, -inf }
 0x58d   :  { %v4022_v54 = vmul.f32 0.35355338, %v7522_v14 }
 0x58e   :  { %4062 = vmax.xlane.f32.xlu1 %v4061_v0  ;;  %v3820_v46 = vpop.f32.mrf.mxu1  ;;  %4056 = vmax.xlane.f32.xlu0 %v4055_v15  ;;  %v4023_v15 = vmul.f32 0.35355338, %v3911_v30  ;;  %v9688_v0 = vld [vmem:[%s10587_s3 + $0x78] sm:$0xff] }
 0x58f   :  { %v9659_v25 = vadd.f32 %v9656_v23, %v4022_v54  ;;  %v4021_v11 = vmul.f32 0.35355338, %v3820_v46  ;;  %10725 = vst [vmem:[#allocation60_spill] sm:$0xff] %v9688_v0 }
 0x591   :  { %v9669_v45 = vadd.f32 %v9666_v26, %v4021_v11  ;;  %v4076_v52 = vsel %vm810_vm1, %v9659_v25, -inf  ;;  %v9696_v11 = vld [vmem:[%s10587_s3 + $0x60] sm:$0xff] }
 0x592   :  { %4077 = vmax.xlane.f32.xlu1 %v4076_v52  ;;  %4071 = vmax.xlane.f32.xlu0 %v4070_v63  ;;  %10726 = vst [vmem:[#allocation61_spill] sm:$0xff] %v9696_v11  ;;  %v9699_v63 = vadd.f32 %v9696_v11, %v4023_v15 }
 0x593   :  { %v4073_v54 = vsel %vm810_vm1, %v9669_v45, -inf }
 0x594   :  { %v7536_v14 = vpop.f32.mrf.mxu1  ;;  %v4079_v52 = vsel %vm810_vm1, %v9699_v63, -inf }
 0x595   :  { %v4026_v3 = vmul.f32 0.35355338, %v7536_v14 }
 0x596   :  { %4074 = vmax.xlane.f32.xlu1 %v4073_v54  ;;  %4068 = vmax.xlane.f32.xlu0 %v4067_v20  ;;  %v9707_v20 = vpop.permute.xlu0 %4393  ;;  %v10727_v54 = vld [vmem:[#allocation3_spill] sm:$0xff]  ;;  %v4002_v59 = vpop.f32.mrf.mxu1 }
 0x597   :  { %v9691_v46 = vadd.f32 %v9688_v0, %v4026_v3  ;;  %v4025_v24 = vmul.f32 0.35355338, %v4002_v59  ;;  %v9746_v59 = vpop.permute.xlu1 %4480 }
 0x599   :  { %v4088_v30 = vsel %vm810_vm1, %v9691_v46, -inf }
 0x59a   :  { %4089 = vmax.xlane.f32.xlu1 %v4088_v30  ;;  %4083 = vmax.xlane.f32.xlu0 %v4082_v53  ;;  %v9709_v14 = vpop.permute.xlu0 %4569  ;;  %v10728_v30 = vld [vmem:[#allocation5_spill] sm:$0xff] }
 0x59b   :  { %v9748_v61 = vpop.permute.xlu1 %4656 }
 0x59e   :  { %4080 = vmax.xlane.f32.xlu0 %v4079_v52  ;;  %v9713_v15 = vpop.permute.xlu0 %4567 }
 0x5a2   :  { %v9717_v3 = vpop.permute.xlu0 %4743 }
 0x5a6   :  { %v9723_v53 = vpop.permute.xlu0 %4741 }
 0x5aa   :  { %v9727_v52 = vpop.permute.xlu0 %4921 }
 0x5ab   :  { %5008 = vrot.lane.b32.xlu1 %v9014_v37, %s8033_s28 }
 0x5ae   :  { %v9729_v37 = vpop.permute.xlu0 %4919 }
 0x5af   :  { %5192 = vrot.lane.b32.xlu1 %v9021_v4, %s8033_s28 }
 0x5b2   :  { %v9731_v4 = vpop.permute.xlu0 %4915 }
 0x5b4   :  { %4917 = vrot.lane.b32.xlu0 %v9030_v8, %s8033_s28  ;;  %v9736_v8 = vld [vmem:[%s10587_s3 + $0x70] sm:$0xff] }
 0x5b5   :  { %10729 = vst [vmem:[#allocation3_spill] sm:$0xff] %v9736_v8 }
 0x5b6   :  { %v9741_v44 = vpop.permute.xlu0 %5103 }
 0x5b8   :  { %5101 = vrot.lane.b32.xlu0 %v10727_v54, %s8033_s28  ;;  %v9739_v54 = vadd.f32 %v9736_v8, %v4025_v24  ;;  %v9752_v24 = vpop.permute.xlu1 %4654 }
 0x5bc   :  { %5097 = vrot.lane.b32.xlu0 %v10728_v30, %s8033_s28  ;;  %v4085_v30 = vsel %vm810_vm1, %v9739_v54, -inf }
 0x5d3   :  { %4086 = vmax.xlane.f32.xlu1 %v4085_v30  ;;  %v9758_v30 = vpop.permute.xlu1 %4830 }
 0x5d7   :  { %v4048_v43 = vpop.xlane.xlu0 %4047 }
 0x5d8   :  { %v4092_v56 = vsub.f32 %v9547_v32, %v4048_v43  ;;  %v9760_v43 = vpop.permute.xlu1 %4828 }
 0x5da   :  { %v4109_v12 = vmul.f32 1.442695, %v4092_v56 }
 0x5dc   :  { %7839 = vpow2.f32 %v4109_v12  ;;  %v9762_v32 = vpop.permute.xlu1 %5012 }
 0x5e0   :  { %v9764_v12 = vpop.permute.xlu1 %5010 }
 0x5e4   :  { %5188 = vrot.lane.b32.xlu1 %v10730_v50, %s8033_s28  ;;  %v9766_v56 = vpop.permute.xlu1 %5006 }
 0x5e8   :  { %v9768_v5 = vpop.permute.xlu1 %5194 }
 0x5e9   :  { %v9754_v21 = vpop.eup %7839 }
 0x5ea   :  { %v4142_v48 = vsel %vm810_vm1, %v9754_v21, 0.0 }
 0x5eb   :  { %4143 = vadd.xlane.f32.xlu0 %v4142_v48 }
 0x60b   :  { %v4054_v50 = vpop.xlane.xlu0 %4053 }
 0x60c   :  { %v4094_v7 = vsub.f32 %v9573_v13, %v4054_v50 }
 0x60d   :  { %v4051_v28 = vpop.xlane.xlu1 %4050 }
 0x60e   :  { %v4113_v47 = vmul.f32 1.442695, %v4094_v7  ;;  %v4093_v22 = vsub.f32 %v9589_v27, %v4051_v28 }
 0x60f   :  { %v4045_v16 = vpop.xlane.xlu0 %4044 }
 0x610   :  { %7841 = vpow2.f32 %v4113_v47  ;;  %v4111_v48 = vmul.f32 1.442695, %v4093_v22  ;;  %v4091_v8 = vsub.f32 %v9581_v33, %v4045_v16 }
 0x612   :  { %7843 = vpow2.f32 %v4111_v48  ;;  %v4107_v11 = vmul.f32 1.442695, %v4091_v8 }
 0x613   :  { %v4066_v0 = vpop.xlane.xlu1 %4065  ;;  %v4060_v1 = vpop.xlane.xlu0 %4059 }
 0x614   :  { %7845 = vpow2.f32 %v4107_v11  ;;  %v4098_v26 = vsub.f32 %v9619_v51, %v4066_v0  ;;  %v4096_v23 = vsub.f32 %v9601_v19, %v4060_v1 }
 0x616   :  { %v4121_v55 = vmul.f32 1.442695, %v4098_v26  ;;  %v4117_v13 = vmul.f32 1.442695, %v4096_v23 }
 0x617   :  { %v4063_v50 = vpop.xlane.xlu1 %4062  ;;  %v4057_v7 = vpop.xlane.xlu0 %4056 }
 0x618   :  { %7847 = vpow2.f32 %v4121_v55  ;;  %v4097_v28 = vsub.f32 %v9629_v29, %v4063_v50  ;;  %v4095_v47 = vsub.f32 %v9611_v41, %v4057_v7 }
 0x619   :  { %7849 = vpow2.f32 %v4117_v13 }
 0x61a   :  { %v4119_v16 = vmul.f32 1.442695, %v4097_v28  ;;  %v4115_v22 = vmul.f32 1.442695, %v4095_v47 }
 0x61b   :  { %v4078_v33 = vpop.xlane.xlu1 %4077  ;;  %v4072_v27 = vpop.xlane.xlu0 %4071 }
 0x61c   :  { %7851 = vpow2.f32 %v4119_v16  ;;  %v4102_v11 = vsub.f32 %v9659_v25, %v4078_v33  ;;  %v4100_v51 = vsub.f32 %v9639_v57, %v4072_v27 }
 0x61d   :  { %v9779_v19 = vpop.eup %7841  ;;  %7853 = vpow2.f32 %v4115_v22 }
 0x61e   :  { %v4129_v23 = vmul.f32 1.442695, %v4102_v11  ;;  %v4125_v26 = vmul.f32 1.442695, %v4100_v51  ;;  %v4148_v29 = vsel %vm810_vm1, %v9779_v19, 0.0 }
 0x61f   :  { %v9783_v55 = vpop.eup %7843  ;;  %v4075_v41 = vpop.xlane.xlu1 %4074  ;;  %4149 = vadd.xlane.f32.xlu1 %v4148_v29 }
 0x620   :  { %v4069_v1 = vpop.xlane.xlu0 %4068  ;;  %7855 = vpow2.f32 %v4129_v23  ;;  %v4101_v0 = vsub.f32 %v9669_v45, %v4075_v41  ;;  %v4145_v13 = vsel %vm810_vm1, %v9783_v55, 0.0 }
 0x621   :  { %v4099_v25 = vsub.f32 %v9651_v17, %v4069_v1  ;;  %v9787_v8 = vpop.eup %7845  ;;  %7857 = vpow2.f32 %v4125_v26 }
 0x622   :  { %v4127_v57 = vmul.f32 1.442695, %v4101_v0  ;;  %v4139_v50 = vsel %vm810_vm1, %v9787_v8, 0.0 }
 0x623   :  { %v4123_v48 = vmul.f32 1.442695, %v4099_v25  ;;  %v4090_v7 = vpop.xlane.xlu1 %4089  ;;  %4146 = vadd.xlane.f32.xlu1 %v4145_v13  ;;  %4140 = vadd.xlane.f32.xlu0 %v4139_v50 }
 0x624   :  { %v4084_v28 = vpop.xlane.xlu0 %4083  ;;  %7859 = vpow2.f32 %v4127_v57  ;;  %v4106_v45 = vsub.f32 %v9691_v46, %v4090_v7 }
 0x625   :  { %v4104_v17 = vsub.f32 %v9679_v10, %v4084_v28  ;;  %v9795_v47 = vpop.eup %7847  ;;  %7861 = vpow2.f32 %v4123_v48 }
 0x626   :  { %v9797_v16 = vpop.eup %7849  ;;  %v4137_v22 = vmul.f32 1.442695, %v4106_v45  ;;  %v4160_v27 = vsel %vm810_vm1, %v9795_v47, 0.0 }
 0x627   :  { %v4133_v33 = vmul.f32 1.442695, %v4104_v17  ;;  %4161 = vadd.xlane.f32.xlu1 %v4160_v27  ;;  %v4154_v11 = vsel %vm810_vm1, %v9797_v16, 0.0  ;;  %v9844_v27 = vpop.permute.xlu1 %5008 }
 0x628   :  { %v4081_v51 = vpop.xlane.xlu0 %4080  ;;  %7863 = vpow2.f32 %v4137_v22  ;;  %4155 = vadd.xlane.f32.xlu0 %v4154_v11 }
 0x629   :  { %v4103_v46 = vsub.f32 %v9699_v63, %v4081_v51  ;;  %v9804_v10 = vpop.eup %7851  ;;  %7865 = vpow2.f32 %v4133_v33 }
 0x62a   :  { %v9806_v23 = vpop.eup %7853  ;;  %v4157_v29 = vsel %vm810_vm1, %v9804_v10, 0.0 }
 0x62b   :  { %v4131_v26 = vmul.f32 1.442695, %v4103_v46  ;;  %4158 = vadd.xlane.f32.xlu1 %v4157_v29  ;;  %v4151_v41 = vsel %vm810_vm1, %v9806_v23, 0.0  ;;  %v9850_v11 = vpop.permute.xlu1 %5192 }
 0x62c   :  { %4152 = vadd.xlane.f32.xlu0 %v4151_v41  ;;  %v10736_v41 = vld [vmem:[#allocation10_spill] sm:$0xff] }
 0x62d   :  { %7867 = vpow2.f32 %v4131_v26  ;;  %v9812_v1 = vpop.eup %7855  ;;  %v10732_v26 = vld [vmem:[#allocation6_spill] sm:$0xff] }
 0x62e   :  { %v9814_v0 = vpop.eup %7857  ;;  %v4172_v63 = vsel %vm810_vm1, %v9812_v1, 0.0 }
 0x62f   :  { %4173 = vadd.xlane.f32.xlu1 %v4172_v63  ;;  %v4166_v25 = vsel %vm810_vm1, %v9814_v0, 0.0  ;;  %v10737_v63 = vld [vmem:[#allocation13_spill] sm:$0xff] }
 0x630   :  { %4167 = vadd.xlane.f32.xlu0 %v4166_v25  ;;  %v8020_v25 = vld [vmem:[%s10588_s2 + $0x28] sm:$0xff] }
 0x631   :  { %v9820_v57 = vpop.eup %7859 }
 0x632   :  { %v9822_v48 = vpop.eup %7861  ;;  %v4169_v13 = vsel %vm810_vm1, %v9820_v57, 0.0 }
 0x633   :  { %4170 = vadd.xlane.f32.xlu1 %v4169_v13  ;;  %v4163_v50 = vsel %vm810_vm1, %v9822_v48, 0.0  ;;  %v8021_v13 = vld [vmem:[%s10588_s2 + $0x20] sm:$0xff] }
 0x634   :  { %4164 = vadd.xlane.f32.xlu0 %v4163_v50  ;;  %v10738_v50 = vld [vmem:[#allocation12_spill] sm:$0xff] }
 0x635   :  { %v9828_v7 = vpop.eup %7863 }
 0x636   :  { %v9830_v28 = vpop.eup %7865  ;;  %v4184_v45 = vsel %vm810_vm1, %v9828_v7, 0.0 }
 0x637   :  { %4185 = vadd.xlane.f32.xlu1 %v4184_v45  ;;  %v4178_v17 = vsel %vm810_vm1, %v9830_v28, 0.0  ;;  %v8022_v45 = vld [vmem:[%s10588_s2 + $0x48] sm:$0xff] }
 0x638   :  { %4179 = vadd.xlane.f32.xlu0 %v4178_v17  ;;  %v10739_v17 = vld [vmem:[#allocation15_spill] sm:$0xff] }
 0x63a   :  { %v9836_v22 = vpop.eup %7867 }
 0x63b   :  { %v4175_v33 = vsel %vm810_vm1, %v9836_v22, 0.0 }
 0x63c   :  { %4176 = vadd.xlane.f32.xlu0 %v4175_v33  ;;  %v10740_v33 = vld [vmem:[#allocation14_spill] sm:$0xff] }
 0x648   :  { %5376 = vrot.lane.b32.xlu1 %v9166_v40, %s8033_s28  ;;  %v10731_v40 = vld [vmem:[#allocation7_spill] sm:$0xff] }
 0x64c   :  { %5190 = vrot.lane.b32.xlu1 %v9173_v35, %s8033_s28 }
 0x652   :  { %5285 = vrot.lane.b32.xlu0 %v9182_v58, %s8033_s28  ;;  %v10733_v58 = vld [vmem:[#allocation9_spill] sm:$0xff] }
 0x656   :  { %5099 = vrot.lane.b32.xlu0 %v9189_v36, %s8033_s28  ;;  %v10734_v36 = vld [vmem:[#allocation8_spill] sm:$0xff] }
 0x65a   :  { %5283 = vrot.lane.b32.xlu0 %v9198_v9, %s8033_s28  ;;  %v10735_v9 = vld [vmem:[#allocation11_spill] sm:$0xff] }
 0x65c   :  { %v4087_v51 = vpop.xlane.xlu1 %4086 }
 0x65d   :  { %v4105_v46 = vsub.f32 %v9739_v54, %v4087_v51  ;;  %v10741_v51 = vld [vmem:[#allocation16_spill] sm:$0xff] }
 0x65e   :  { %5279 = vrot.lane.b32.xlu0 %v10731_v40, %s8033_s28  ;;  %v10743_v40 = vld [vmem:[#allocation33_spill] sm:$0xff] }
 0x65f   :  { %v4135_v35 = vmul.f32 1.442695, %v4105_v46  ;;  %v10742_v46 = vld [vmem:[#allocation17_spill] sm:$0xff] }
 0x661   :  { %7869 = vpow2.f32 %v4135_v35  ;;  %v9897_v35 = vpop.permute.xlu0 %4917 }
 0x662   :  { %5467 = vrot.lane.b32.xlu0 %v10732_v26, %s8033_s28  ;;  %v10744_v26 = vld [vmem:[#allocation34_spill] sm:$0xff] }
 0x666   :  { %5281 = vrot.lane.b32.xlu0 %v10733_v58, %s8033_s28  ;;  %v9901_v58 = vpop.permute.xlu0 %5101 }
 0x66a   :  { %5465 = vrot.lane.b32.xlu0 %v10734_v36, %s8033_s28  ;;  %v10745_v36 = vld [vmem:[#allocation35_spill] sm:$0xff] }
 0x66e   :  { %v9863_v29 = vpop.eup %7869  ;;  %5461 = vrot.lane.b32.xlu0 %v10735_v9, %s8033_s28  ;;  %v10746_v9 = vld [vmem:[#allocation36_spill] sm:$0xff] }
 0x66f   :  { %v4181_v54 = vsel %vm810_vm1, %v9863_v29, 0.0 }
 0x670   :  { %4182 = vadd.xlane.f32.xlu1 %v4181_v54  ;;  %v9907_v54 = vpop.permute.xlu0 %5097 }
 0x672   :  { %5463 = vrot.lane.b32.xlu0 %v10736_v41, %s8033_s28  ;;  %v9909_v41 = vpop.permute.xlu1 %5188 }
 0x676   :  { %5853 = vrot.lane.b32.xlu0 %v10737_v63, %s8033_s28  ;;  %v10747_v63 = vld [vmem:[#allocation37_spill] sm:$0xff] }
 0x67a   :  { %6027 = vrot.lane.b32.xlu0 %v8020_v25, %s8033_s28  ;;  %v4144_v25 = vpop.xlane.xlu0 %4143 }
 0x67b   :  { %7871 = vrcp.f32 %v4144_v25 }
 0x67e   :  { %6025 = vrot.lane.b32.xlu0 %v8021_v13, %s8033_s28 }
 0x681   :  { %5374 = vrot.lane.b32.xlu1 %v10738_v50, %s8033_s28  ;;  %v10748_v50 = vld [vmem:[#allocation38_spill] sm:$0xff] }
 0x682   :  { %6201 = vrot.lane.b32.xlu0 %v8022_v45, %s8033_s28 }
 0x685   :  { %5370 = vrot.lane.b32.xlu1 %v10739_v17, %s8033_s28 }
 0x689   :  { %5558 = vrot.lane.b32.xlu1 %v10740_v33, %s8033_s28  ;;  %v8023_v33 = vld [vmem:[%s10588_s2 + $0x30] sm:$0xff] }
 0x68d   :  { %5372 = vrot.lane.b32.xlu1 %v10741_v51, %s8033_s28 }
 0x691   :  { %5556 = vrot.lane.b32.xlu1 %v10742_v46, %s8033_s28 }
 0x695   :  { %5552 = vrot.lane.b32.xlu1 %v10743_v40, %s8033_s28  ;;  %v8024_v40 = vld [vmem:[%s10588_s2 + $0x58] sm:$0xff] }
 0x699   :  { %5554 = vrot.lane.b32.xlu1 %v10744_v26, %s8033_s28 }
 0x69d   :  { %5940 = vrot.lane.b32.xlu1 %v10745_v36, %s8033_s28 }
 0x6a1   :  { %5851 = vrot.lane.b32.xlu1 %v10746_v9, %s8033_s28  ;;  %v7872_v9 = vpop.eup %7871 }
 0x6a5   :  { %5938 = vrot.lane.b32.xlu1 %v10747_v63, %s8033_s28 }
 0x6a8   :  { %v4150_v13 = vpop.xlane.xlu1 %4149 }
 0x6a9   :  { %6114 = vrot.lane.b32.xlu1 %v10748_v50, %s8033_s28  ;;  %7873 = vrcp.f32 %v4150_v13 }
 0x6ac   :  { %v4147_v45 = vpop.xlane.xlu1 %4146  ;;  %v4141_v17 = vpop.xlane.xlu0 %4140 }
 0x6ad   :  { %7875 = vrcp.f32 %v4147_v45  ;;  %6112 = vrot.lane.b32.xlu1 %v8023_v33, %s8033_s28 }
 0x6ae   :  { %7877 = vrcp.f32 %v4141_v17 }
 0x6b0   :  { %v4162_v51 = vpop.xlane.xlu1 %4161 }
 0x6b1   :  { %v4156_v46 = vpop.xlane.xlu0 %4155  ;;  %6288 = vrot.lane.b32.xlu1 %v8024_v40, %s8033_s28  ;;  %7879 = vrcp.f32 %v4162_v51  ;;  %v4204_v40 = vmul.f32 %v7872_v9, %v9754_v21 }
 0x6b2   :  { %7881 = vrcp.f32 %v4156_v46 }
 0x6b4   :  { %v4159_v26 = vpop.xlane.xlu1 %4158 }
 0x6b5   :  { %7883 = vrcp.f32 %v4159_v26  ;;  %v4153_v36 = vpop.xlane.xlu0 %4152 }
 0x6b6   :  { %7885 = vrcp.f32 %v4153_v36  ;;  %v7874_v25 = vpop.eup %7873 }
 0x6b7   :  { %v4206_v51 = vmul.f32 %v7874_v25, %v9779_v19 }
 0x6b8   :  { %v4174_v63 = vpop.xlane.xlu1 %4173 }
 0x6b9   :  { %v4168_v13 = vpop.xlane.xlu0 %4167  ;;  %7887 = vrcp.f32 %v4174_v63 }
 0x6ba   :  { %v7876_v50 = vpop.eup %7875  ;;  %7889 = vrcp.f32 %v4168_v13 }
 0x6bb   :  { %v7878_v45 = vpop.eup %7877  ;;  %v4205_v17 = vmul.f32 %v7876_v50, %v9783_v55 }
 0x6bc   :  { %v4171_v33 = vpop.xlane.xlu1 %4170  ;;  %v4203_v62 = vmul.f32 %v7878_v45, %v9787_v8 }
 0x6bd   :  { %7891 = vrcp.f32 %v4171_v33  ;;  %v4165_v46 = vpop.xlane.xlu0 %4164  ;;  %7548 = vmatprep.mubr.msk.f32.mxu1 %vm810_vm1, %v4205_v17 }
 0x6be   :  { %7893 = vrcp.f32 %v4165_v46  ;;  %7541 = vmatprep.mubr.msk.f32.mxu0 %vm810_vm1, %v4203_v62  ;;  %7549 = vmatmul.mubr.msk.f32.vlgmr.msra.gmra.mxu1 %vm810_vm1, %v4206_v51  ;;  %v7880_v55 = vpop.eup %7879 }
 0x6bf   :  { %7542 = vmatmul.mubr.msk.f32.vlgmr.msra.gmra.mxu0 %vm810_vm1, %v4204_v40  ;;  %7559 = vmatpush3.msra.mxu1 %v9522_v42  ;;  %v7882_v19 = vpop.eup %7881  ;;  %v4210_v26 = vmul.f32 %v7880_v55, %v9795_v47 }
 0x6c0   :  { %7552 = vmatpush3.msra.mxu0 %v9519_v18  ;;  %7560 = vmatprep.subr.mxu1 %v9746_v59 }
 0x6c1   :  { %7553 = vmatprep.subr.mxu0 %v9707_v20  ;;  %7561 = vmatpush3.msra.mxu1 %v9746_v59  ;;  %v4180_v21 = vpop.xlane.xlu0 %4179  ;;  %v4208_v59 = vmul.f32 %v7882_v19, %v9797_v16 }
 0x6c2   :  { %v7884_v8 = vpop.eup %7883  ;;  %7554 = vmatpush3.msra.mxu0 %v9707_v20  ;;  %7572 = vmatprep.subr.mxu1 %v9748_v61  ;;  %7895 = vrcp.f32 %v4180_v21 }
 0x6c3   :  { %v7886_v62 = vpop.eup %7885  ;;  %7565 = vmatprep.subr.mxu0 %v9709_v14  ;;  %v4209_v42 = vmul.f32 %v7884_v8, %v9804_v10 }
 0x6c4   :  { %v4207_v18 = vmul.f32 %v7886_v62, %v9806_v23 }
 0x6c5   :  { %v4177_v36 = vpop.xlane.xlu0 %4176  ;;  %7562 = vmatprep.mubr.msk.f32.mxu1 %vm810_vm1, %v4209_v42 }
 0x6c6   :  { %7897 = vrcp.f32 %v4177_v36  ;;  %7555 = vmatprep.mubr.msk.f32.mxu0 %vm810_vm1, %v4207_v18  ;;  %7563 = vmatmul.mubr.msk.f32.vlgmr.msra.gmra.mxu1 %vm810_vm1, %v4210_v26  ;;  %v7888_v20 = vpop.eup %7887 }
 0x6c7   :  { %7556 = vmatmul.mubr.msk.f32.vlgmr.msra.gmra.mxu0 %vm810_vm1, %v4208_v59  ;;  %7573 = vmatpush3.msra.mxu1 %v9748_v61  ;;  %v7890_v47 = vpop.eup %7889  ;;  %v4214_v9 = vmul.f32 %v7888_v20, %v9812_v1 }
 0x6c8   :  { %7566 = vmatpush3.msra.mxu0 %v9709_v14  ;;  %7574 = vmatprep.subr.mxu1 %v9752_v24  ;;  %v4212_v63 = vmul.f32 %v7890_v47, %v9814_v0 }
 0x6c9   :  { %7567 = vmatprep.subr.mxu0 %v9713_v15  ;;  %7575 = vmatpush3.msra.mxu1 %v9752_v24  ;;  %v5286_v16 = vpop.permute.xlu0 %5285 }
 0x6ca   :  { %v7892_v10 = vpop.eup %7891  ;;  %7568 = vmatpush3.msra.mxu0 %v9713_v15  ;;  %7586 = vmatprep.subr.mxu1 %v9758_v30 }
 0x6cb   :  { %v7894_v23 = vpop.eup %7893  ;;  %7579 = vmatprep.subr.mxu0 %v9717_v3  ;;  %v4213_v61 = vmul.f32 %v7892_v10, %v9820_v57 }
 0x6cc   :  { %v4211_v14 = vmul.f32 %v7894_v23, %v9822_v48 }
 0x6cd   :  { %7576 = vmatprep.mubr.msk.f32.mxu1 %vm810_vm1, %v4213_v61  ;;  %v5100_v24 = vpop.permute.xlu0 %5099 }
 0x6ce   :  { %7569 = vmatprep.mubr.msk.f32.mxu0 %vm810_vm1, %v4211_v14  ;;  %7577 = vmatmul.mubr.msk.f32.vlgmr.msra.gmra.mxu1 %vm810_vm1, %v4214_v9 }
 0x6cf   :  { %7570 = vmatmul.mubr.msk.f32.vlgmr.msra.gmra.mxu0 %vm810_vm1, %v4212_v63  ;;  %7587 = vmatpush3.msra.mxu1 %v9758_v30  ;;  %v7896_v1 = vpop.eup %7895 }
 0x6d0   :  { %7580 = vmatpush3.msra.mxu0 %v9717_v3  ;;  %7588 = vmatprep.subr.mxu1 %v9760_v43  ;;  %v4216_v3 = vmul.f32 %v7896_v1, %v9830_v28 }
 0x6d1   :  { %7581 = vmatprep.subr.mxu0 %v9723_v53  ;;  %7589 = vmatpush3.msra.mxu1 %v9760_v43  ;;  %v5284_v15 = vpop.permute.xlu0 %5283 }
 0x6d2   :  { %7582 = vmatpush3.msra.mxu0 %v9723_v53  ;;  %7600 = vmatprep.subr.msk.mxu1 %vm81_vm0, %v9762_v32 }
 0x6d3   :  { %v7898_v0 = vpop.eup %7897  ;;  %7593 = vmatprep.subr.msk.mxu0 %vm81_vm0, %v9727_v52 }
 0x6d4   :  { %v4215_v30 = vmul.f32 %v7898_v0, %v9836_v22 }
 0x6d5   :  { %v5280_v57 = vpop.permute.xlu0 %5279 }
 0x6d6   :  { %7583 = vmatprep.mubr.msk.f32.mxu0 %vm810_vm1, %v4215_v30 }
 0x6d7   :  { %7584 = vmatmul.mubr.msk.f32.vlgmr.msra.gmra.mxu0 %vm810_vm1, %v4216_v3 }
 0x6d8   :  { %7594 = vmatpush3.xpose.msk.msra.mxu0 %vm81_vm0, %v9727_v52  ;;  %7597 = vmatprep.mubr.msk.f32.mxu0 %vm81_vm0, %v9731_v4 }
 0x6d9   :  { %7595 = vmatprep.subr.msk.mxu0 %vm81_vm0, %v9729_v37  ;;  %v5468_v53 = vpop.permute.xlu0 %5467 }
 0x6dc   :  { %7596 = vmatpush3.xpose.msk.msra.mxu0 %vm81_vm0, %v9729_v37 }
 0x6dd   :  { %7607 = vmatprep.subr.msk.mxu0 %vm81_vm0, %v9741_v44  ;;  %v5282_v52 = vpop.permute.xlu0 %5281 }
 0x6df   :  { %7598 = vmatmul.mubr.msk.f32.vlgmr.msra.gmra.mxu0 %vm81_vm0, %v9897_v35 }
 0x6e0   :  { %7608 = vmatpush3.xpose.msk.msra.mxu0 %vm81_vm0, %v9741_v44  ;;  %7611 = vmatprep.mubr.msk.f32.mxu0 %vm81_vm0, %v9907_v54  ;;  %v4186_v44 = vpop.xlane.xlu1 %4185 }
 0x6e1   :  { %7609 = vmatprep.subr.msk.mxu0 %vm81_vm0, %v9901_v58  ;;  %v5466_v37 = vpop.permute.xlu0 %5465  ;;  %7899 = vrcp.f32 %v4186_v44 }
 0x6e4   :  { %7610 = vmatpush3.xpose.msk.msra.mxu0 %vm81_vm0, %v9901_v58  ;;  %v5377_v43 = vpop.permute.xlu1 %5376 }
 0x6e5   :  { %7621 = vmatprep.subr.msk.mxu0 %vm81_vm0, %v5286_v16  ;;  %v5462_v4 = vpop.permute.xlu0 %5461 }
 0x6e7   :  { %7612 = vmatmul.mubr.msk.f32.vlgmr.msra.gmra.mxu0 %vm81_vm0, %v5100_v24 }
 0x6e8   :  { %7622 = vmatpush3.xpose.msk.msra.mxu0 %vm81_vm0, %v5286_v16  ;;  %7625 = vmatprep.mubr.msk.f32.mxu0 %vm81_vm0, %v5280_v57  ;;  %v5191_v28 = vpop.permute.xlu1 %5190 }
 0x6e9   :  { %7623 = vmatprep.subr.msk.mxu0 %vm81_vm0, %v5284_v15  ;;  %v5464_v48 = vpop.permute.xlu0 %5463 }
 0x6ec   :  { %7624 = vmatpush3.xpose.msk.msra.mxu0 %vm81_vm0, %v5284_v15 }
 0x6ed   :  { %7635 = vmatprep.subr.msk.mxu0 %vm81_vm0, %v5468_v53 }
 0x6ee   :  { %v7900_v58 = vpop.eup %7899 }
 0x6ef   :  { %7626 = vmatmul.mubr.msk.f32.vlgmr.msra.gmra.mxu0 %vm81_vm0, %v5282_v52  ;;  %v4218_v13 = vmul.f32 %v7900_v58, %v9828_v7 }
 0x6f0   :  { %7636 = vmatpush3.xpose.msk.msra.mxu0 %vm81_vm0, %v5468_v53  ;;  %7639 = vmatprep.mubr.msk.f32.mxu0 %vm81_vm0, %v5462_v4 }
 0x6f1   :  { %7637 = vmatprep.subr.msk.mxu0 %vm81_vm0, %v5466_v37 }
 0x6f4   :  { %7638 = vmatpush3.xpose.msk.msra.mxu0 %vm81_vm0, %v5466_v37 }
 0x6f7   :  { %7640 = vmatmul.mubr.msk.f32.vlgmr.msra.gmra.mxu0 %vm81_vm0, %v5464_v48 }
 0x6f9   :  { %v4183_v22 = vpop.xlane.xlu1 %4182 }
 0x6fa   :  { %7901 = vrcp.f32 %v4183_v22 }
 0x6fd   :  { %v5375_v35 = vpop.permute.xlu1 %5374 }
 0x701   :  { %v5371_v50 = vpop.permute.xlu1 %5370 }
 0x705   :  { %v5559_v45 = vpop.permute.xlu1 %5558 }
 0x707   :  { %v7902_v54 = vpop.eup %7901 }
 0x708   :  { %v4217_v25 = vmul.f32 %v7902_v54, %v9863_v29 }
 0x70a   :  { %7590 = vmatprep.mubr.msk.f32.mxu1 %vm810_vm1, %v4217_v25 }
 0x70b   :  { %7591 = vmatmul.mubr.msk.f32.vlgmr.msra.gmra.mxu1 %vm810_vm1, %v4218_v13 }
 0x70c   :  { %7601 = vmatpush3.xpose.msk.msra.mxu1 %vm81_vm0, %v9762_v32  ;;  %7604 = vmatprep.mubr.msk.f32.mxu1 %vm81_vm0, %v9766_v56  ;;  %v5373_v32 = vpop.permute.xlu1 %5372 }
 0x70d   :  { %7602 = vmatprep.subr.msk.mxu1 %vm81_vm0, %v9764_v12 }
 0x710   :  { %7603 = vmatpush3.xpose.msk.msra.mxu1 %vm81_vm0, %v9764_v12  ;;  %v5557_v12 = vpop.permute.xlu1 %5556 }
 0x711   :  { %7614 = vmatprep.subr.msk.mxu1 %vm81_vm0, %v9768_v5 }
 0x713   :  { %7605 = vmatmul.mubr.msk.f32.vlgmr.msra.gmra.mxu1 %vm81_vm0, %v9844_v27  ;;  %v5854_v27 = vpop.permute.xlu0 %5853 }
 0x714   :  { %7615 = vmatpush3.xpose.msk.msra.mxu1 %vm81_vm0, %v9768_v5  ;;  %7618 = vmatprep.mubr.msk.f32.mxu1 %vm81_vm0, %v9909_v41  ;;  %v5553_v5 = vpop.permute.xlu1 %5552 }
 0x715   :  { %7616 = vmatprep.subr.msk.mxu1 %vm81_vm0, %v9850_v11  ;;  %7649 = vmatprep.subr.mxu0 %v5854_v27 }
 0x716   :  { %7650 = vmatpush3.msra.mxu0 %v5854_v27 }
 0x717   :  { %v10051_v33 = vpop.permute.xlu0 %6027 }
 0x718   :  { %7617 = vmatpush3.xpose.msk.msra.mxu1 %vm81_vm0, %v9850_v11  ;;  %v5555_v56 = vpop.permute.xlu1 %5554 }
 0x719   :  { %7628 = vmatprep.subr.msk.mxu1 %vm81_vm0, %v5377_v43 }
 0x71b   :  { %7619 = vmatmul.mubr.msk.f32.vlgmr.msra.gmra.mxu1 %vm81_vm0, %v5191_v28 }
 0x71c   :  { %7629 = vmatpush3.xpose.msk.msra.mxu1 %vm81_vm0, %v5377_v43  ;;  %7632 = vmatprep.mubr.msk.f32.mxu1 %vm81_vm0, %v5371_v50  ;;  %v5941_v7 = vpop.permute.xlu1 %5940 }
 0x71d   :  { %7630 = vmatprep.subr.msk.mxu1 %vm81_vm0, %v5375_v35 }
 0x720   :  { %7631 = vmatpush3.xpose.msk.msra.mxu1 %vm81_vm0, %v5375_v35  ;;  %v5852_v11 = vpop.permute.xlu1 %5851 }
 0x721   :  { %7642 = vmatprep.subr.msk.mxu1 %vm81_vm0, %v5559_v45  ;;  %7651 = vmatprep.subr.mxu0 %v5852_v11 }
 0x722   :  { %7652 = vmatpush3.msra.mxu0 %v5852_v11  ;;  %v10751_v11 = vld [vmem:[#allocation57_spill] sm:$0xff] }
 0x723   :  { %7633 = vmatmul.mubr.msk.f32.vlgmr.msra.gmra.mxu1 %vm81_vm0, %v5373_v32  ;;  %7663 = vmatprep.subr.mxu0 %v10051_v33 }
 0x724   :  { %7643 = vmatpush3.xpose.msk.msra.mxu1 %vm81_vm0, %v5559_v45  ;;  %7646 = vmatprep.mubr.msk.f32.mxu1 %vm81_vm0, %v5553_v5  ;;  %v5939_v41 = vpop.permute.xlu1 %5938 }
 0x725   :  { %7644 = vmatprep.subr.msk.mxu1 %vm81_vm0, %v5557_v12 }
 0x728   :  { %7645 = vmatpush3.xpose.msk.msra.mxu1 %vm81_vm0, %v5557_v12  ;;  %v10056_v46 = vpop.permute.xlu1 %6114 }
 0x729   :  { %7656 = vmatprep.subr.mxu1 %v5941_v7 }
 0x72b   :  { %7647 = vmatmul.mubr.msk.f32.vlgmr.msra.gmra.mxu1 %vm81_vm0, %v5555_v56 }
 0x72c   :  { %7657 = vmatpush3.msra.mxu1 %v5941_v7  ;;  %v10750_v7 = vld [vmem:[#allocation56_spill] sm:$0xff] }
 0x72d   :  { %7658 = vmatprep.subr.mxu1 %v5939_v41 }
 0x72e   :  { %7659 = vmatpush3.msra.mxu1 %v5939_v41 }
 0x72f   :  { %7670 = vmatprep.subr.mxu1 %v10056_v46 }
 0x77e   :  { %v10074_v36 = vpop.f32.mrf.mxu1 }
 0x77f   :  { %v10047_v29 = vpop.f32.mrf.mxu0 }
 0x780   :  { %v10076_v59 = vpop.f32.mrf.mxu1 }
 0x781   :  { %v10049_v17 = vpop.f32.mrf.mxu0 }
 0x786   :  { %v10078_v20 = vpop.f32.mrf.mxu1 }
 0x787   :  { %v10054_v51 = vpop.f32.mrf.mxu0 }
 0x788   :  { %v10080_v47 = vpop.f32.mrf.mxu1 }
 0x789   :  { %v10059_v40 = vpop.f32.mrf.mxu0 }
 0x78e   :  { %v10082_v16 = vpop.f32.mrf.mxu1 }
 0x78f   :  { %v10061_v55 = vpop.f32.mrf.mxu0 }
 0x790   :  { %v10084_v10 = vpop.f32.mrf.mxu1 }
 0x791   :  { %v10063_v19 = vpop.f32.mrf.mxu0 }
 0x797   :  { %v10065_v21 = vpop.f32.mrf.mxu0 }
 0x799   :  { %v10067_v8 = vpop.f32.mrf.mxu0 }
 0x79f   :  { %v7599_v62 = vpop.f32.mrf.mxu0 }
 0x7a0   :  { %v5644_v42 = vmul.f32 0.35355338, %v7599_v62 }
 0x7a2   :  { %v10070_v18 = vadd.f32 %v9544_v49, %v5644_v42  ;;  %v4997_v49 = vpop.f32.mrf.mxu0 }
 0x7a3   :  { %v5643_v63 = vmul.f32 0.35355338, %v4997_v49 }
 0x7a4   :  { %v5678_v26 = vsel %vm810_vm1, %v10070_v18, -inf }
 0x7a5   :  { %5679 = vmax.xlane.f32.xlu0 %v5678_v26  ;;  %v10094_v57 = vadd.f32 %v9578_v31, %v5643_v63 }
 0x7a7   :  { %v7613_v9 = vpop.f32.mrf.mxu0  ;;  %v5675_v31 = vsel %vm810_vm1, %v10094_v57, -inf }
 0x7a8   :  { %v5648_v30 = vmul.f32 0.35355338, %v7613_v9 }
 0x7a9   :  { %v5179_v3 = vpop.f32.mrf.mxu0 }
 0x7aa   :  { %v5647_v37 = vmul.f32 0.35355338, %v5179_v3 }
 0x7ac   :  { %v10109_v28 = vadd.f32 %v9608_v60, %v5647_v37  ;;  %v10749_v60 = vld [vmem:[#allocation55_spill] sm:$0xff] }
 0x7af   :  { %v7627_v43 = vpop.f32.mrf.mxu0 }
 0x7b0   :  { %v5652_v58 = vmul.f32 0.35355338, %v7627_v43  ;;  %v10755_v43 = vld [vmem:[#allocation61_spill] sm:$0xff] }
 0x7b1   :  { %v5361_v54 = vpop.f32.mrf.mxu0 }
 0x7b2   :  { %v5651_v50 = vmul.f32 0.35355338, %v5361_v54  ;;  %v10122_v45 = vadd.f32 %v10749_v60, %v5652_v58  ;;  %v8026_v58 = vld [vmem:[%s10588_s2 + $0x40] sm:$0xff]  ;;  %v8027_v54 = vld [vmem:[%s10588_s2 + $0x68] sm:$0xff] }
 0x7b3   :  { %v10756_v60 = vld [vmem:[#allocation3_spill] sm:$0xff] }
 0x7b4   :  { %v10129_v27 = vadd.f32 %v10750_v7, %v5651_v50  ;;  %v5702_v42 = vsel %vm810_vm1, %v10122_v45, -inf }
 0x7b7   :  { %v7641_v12 = vpop.f32.mrf.mxu0 }
 0x7b8   :  { %v5656_v26 = vmul.f32 0.35355338, %v7641_v12 }
 0x7b9   :  { %v5543_v49 = vpop.f32.mrf.mxu0 }
 0x7cb   :  { %v10086_v23 = vpop.f32.mrf.mxu1 }
 0x7cd   :  { %v10088_v61 = vpop.f32.mrf.mxu1 }
 0x7d3   :  { %v7606_v14 = vpop.f32.mrf.mxu1 }
 0x7d4   :  { %v5646_v24 = vmul.f32 0.35355338, %v7606_v14  ;;  %v10752_v14 = vld [vmem:[#allocation58_spill] sm:$0xff] }
 0x7d5   :  { %v5088_v15 = vpop.f32.mrf.mxu1 }
 0x7d6   :  { %v10091_v1 = vadd.f32 %v9570_v34, %v5646_v24  ;;  %v5645_v0 = vmul.f32 0.35355338, %v5088_v15  ;;  %v10104_v34 = vadd.f32 %v9598_v38, %v5648_v30  ;;  %v10753_v24 = vld [vmem:[#allocation59_spill] sm:$0xff]  ;;  %v5655_v30 = vmul.f32 0.35355338, %v5543_v49 }
 0x7d7   :  { %v10142_v15 = vadd.f32 %v10753_v24, %v5656_v26  ;;  %v10190_v26 = vpop.permute.xlu1 %6112 }
 0x7d8   :  { %v10097_v53 = vadd.f32 %v9586_v6, %v5645_v0  ;;  %v5684_v52 = vsel %vm810_vm1, %v10091_v1, -inf  ;;  %v5690_v38 = vsel %vm810_vm1, %v10104_v34, -inf  ;;  %v5699_v0 = vsel %vm810_vm1, %v10129_v27, -inf }
 0x7d9   :  { %5685 = vmax.xlane.f32.xlu0 %v5684_v52 }
 0x7da   :  { %v5681_v44 = vsel %vm810_vm1, %v10097_v53, -inf }
 0x7db   :  { %5682 = vmax.xlane.f32.xlu1 %v5681_v44  ;;  %v7620_v4 = vpop.f32.mrf.mxu1  ;;  %v10754_v44 = vld [vmem:[#allocation60_spill] sm:$0xff]  ;;  %v10192_v49 = vpop.permute.xlu1 %6288 }
 0x7dc   :  { %v5650_v48 = vmul.f32 0.35355338, %v7620_v4 }
 0x7dd   :  { %v5270_v6 = vpop.f32.mrf.mxu1  ;;  %5676 = vmax.xlane.f32.xlu0 %v5675_v31  ;;  %v5714_v31 = vsel %vm810_vm1, %v10142_v15, -inf }
 0x7de   :  { %v10112_v22 = vadd.f32 %v9616_v2, %v5650_v48  ;;  %v5649_v35 = vmul.f32 0.35355338, %v5270_v6  ;;  %v5687_v2 = vsel %vm810_vm1, %v10109_v28, -inf  ;;  %v10152_v48 = vadd.f32 %v10755_v43, %v5655_v30 }
 0x7e0   :  { %v10117_v25 = vadd.f32 %v9626_v39, %v5649_v35  ;;  %v5696_v13 = vsel %vm810_vm1, %v10112_v22, -inf  ;;  %v5711_v35 = vsel %vm810_vm1, %v10152_v48, -inf }
 0x7e1   :  { %5697 = vmax.xlane.f32.xlu1 %v5696_v13  ;;  %5691 = vmax.xlane.f32.xlu0 %v5690_v38  ;;  %v8025_v38 = vld [vmem:[%s10588_s2 + $0x50] sm:$0xff] }
 0x7e2   :  { %v5693_v56 = vsel %vm810_vm1, %v10117_v25, -inf }
 0x7e3   :  { %v7634_v32 = vpop.f32.mrf.mxu1 }
 0x7e4   :  { %v5654_v5 = vmul.f32 0.35355338, %v7634_v32  ;;  %v10175_v32 = vpop.permute.xlu0 %6025 }
 0x7e5   :  { %5694 = vmax.xlane.f32.xlu1 %v5693_v56  ;;  %v5452_v39 = vpop.f32.mrf.mxu1  ;;  %5688 = vmax.xlane.f32.xlu0 %v5687_v2 }
 0x7e6   :  { %v10132_v41 = vadd.f32 %v10751_v11, %v5654_v5  ;;  %v5653_v62 = vmul.f32 0.35355338, %v5452_v39  ;;  %v8028_v11 = vld [vmem:[%s10588_s2 + $0x78] sm:$0xff] }
 0x7e8   :  { %v10137_v9 = vadd.f32 %v10752_v14, %v5653_v62  ;;  %v5708_v63 = vsel %vm810_vm1, %v10132_v41, -inf  ;;  %v10179_v5 = vpop.permute.xlu0 %6201 }
 0x7e9   :  { %5709 = vmax.xlane.f32.xlu1 %v5708_v63  ;;  %5703 = vmax.xlane.f32.xlu0 %v5702_v42 }
 0x7ea   :  { %v5705_v37 = vsel %vm810_vm1, %v10137_v9, -inf }
 0x7eb   :  { %v7648_v3 = vpop.f32.mrf.mxu1 }
 0x7ec   :  { %v5658_v52 = vmul.f32 0.35355338, %v7648_v3 }
 0x7ed   :  { %5706 = vmax.xlane.f32.xlu1 %v5705_v37  ;;  %5700 = vmax.xlane.f32.xlu0 %v5699_v0  ;;  %v5634_v13 = vpop.f32.mrf.mxu1 }
 0x7ee   :  { %v10149_v4 = vadd.f32 %v10754_v44, %v5658_v52  ;;  %v5657_v50 = vmul.f32 0.35355338, %v5634_v13 }
 0x7f0   :  { %v5720_v6 = vsel %vm810_vm1, %v10149_v4, -inf  ;;  %v10173_v2 = vadd.f32 %v10756_v60, %v5657_v50 }
 0x7f1   :  { %5721 = vmax.xlane.f32.xlu1 %v5720_v6  ;;  %5715 = vmax.xlane.f32.xlu0 %v5714_v31 }
 0x7f2   :  { %v5717_v12 = vsel %vm810_vm1, %v10173_v2, -inf }
 0x7f5   :  { %5712 = vmax.xlane.f32.xlu0 %v5711_v35 }
 0x802   :  { %6286 = vrot.lane.b32.xlu1 %v8025_v38, %s8033_s28 }
 0x80b   :  { %6199 = vrot.lane.b32.xlu0 %v8026_v58, %s8033_s28 }
 0x80f   :  { %6375 = vrot.lane.b32.xlu0 %v8027_v54, %s8033_s28 }
 0x826   :  { %5718 = vmax.xlane.f32.xlu1 %v5717_v12 }
 0x82e   :  { %v5680_v56 = vpop.xlane.xlu0 %5679 }
 0x82f   :  { %v5724_v39 = vsub.f32 %v10070_v18, %v5680_v56 }
 0x831   :  { %v5741_v7 = vmul.f32 1.442695, %v5724_v39 }
 0x833   :  { %7903 = vpow2.f32 %v5741_v7 }
 0x837   :  { %6462 = vrot.lane.b32.xlu1 %v8028_v11, %s8033_s28 }
 0x840   :  { %v10186_v62 = vpop.eup %7903 }
 0x841   :  { %v5774_v42 = vsel %vm810_vm1, %v10186_v62, 0.0 }
 0x842   :  { %5775 = vadd.xlane.f32.xlu0 %v5774_v42 }
 0x862   :  { %v5686_v14 = vpop.xlane.xlu0 %5685 }
 0x863   :  { %v5726_v18 = vsub.f32 %v10091_v1, %v5686_v14 }
 0x864   :  { %v5683_v63 = vpop.xlane.xlu1 %5682 }
 0x865   :  { %v5745_v24 = vmul.f32 1.442695, %v5726_v18  ;;  %v5725_v0 = vsub.f32 %v10097_v53, %v5683_v63 }
 0x866   :  { %v5677_v30 = vpop.xlane.xlu0 %5676 }
 0x867   :  { %7905 = vpow2.f32 %v5745_v24  ;;  %v5743_v3 = vmul.f32 1.442695, %v5725_v0  ;;  %v5723_v52 = vsub.f32 %v10094_v57, %v5677_v30 }
 0x869   :  { %7907 = vpow2.f32 %v5743_v3  ;;  %v5739_v37 = vmul.f32 1.442695, %v5723_v52 }
 0x86a   :  { %v5698_v44 = vpop.xlane.xlu1 %5697  ;;  %v5692_v43 = vpop.xlane.xlu0 %5691 }
 0x86b   :  { %7909 = vpow2.f32 %v5739_v37  ;;  %v5730_v31 = vsub.f32 %v10112_v22, %v5698_v44  ;;  %v5728_v6 = vsub.f32 %v10104_v34, %v5692_v43 }
 0x86d   :  { %v5753_v35 = vmul.f32 1.442695, %v5730_v31  ;;  %v5749_v1 = vmul.f32 1.442695, %v5728_v6 }
 0x86e   :  { %v5695_v38 = vpop.xlane.xlu1 %5694  ;;  %v5689_v58 = vpop.xlane.xlu0 %5688 }
 0x86f   :  { %7911 = vpow2.f32 %v5753_v35  ;;  %v5729_v53 = vsub.f32 %v10117_v25, %v5695_v38  ;;  %v5727_v54 = vsub.f32 %v10109_v28, %v5689_v58 }
 0x870   :  { %7913 = vpow2.f32 %v5749_v1 }
 0x871   :  { %v5751_v57 = vmul.f32 1.442695, %v5729_v53  ;;  %v5747_v13 = vmul.f32 1.442695, %v5727_v54 }
 0x872   :  { %v5710_v50 = vpop.xlane.xlu1 %5709  ;;  %v5704_v60 = vpop.xlane.xlu0 %5703 }
 0x873   :  { %7915 = vpow2.f32 %v5751_v57  ;;  %v5734_v12 = vsub.f32 %v10132_v41, %v5710_v50  ;;  %v5732_v22 = vsub.f32 %v10122_v45, %v5704_v60 }
 0x874   :  { %v10203_v34 = vpop.eup %7905  ;;  %7917 = vpow2.f32 %v5747_v13 }
 0x875   :  { %v5761_v56 = vmul.f32 1.442695, %v5734_v12  ;;  %v5757_v39 = vmul.f32 1.442695, %v5732_v22  ;;  %v5780_v25 = vsel %vm810_vm1, %v10203_v34, 0.0 }
 0x876   :  { %v10207_v7 = vpop.eup %7907  ;;  %v5707_v28 = vpop.xlane.xlu1 %5706  ;;  %5781 = vadd.xlane.f32.xlu1 %v5780_v25 }
 0x877   :  { %v5701_v11 = vpop.xlane.xlu0 %5700  ;;  %7919 = vpow2.f32 %v5761_v56  ;;  %v5733_v42 = vsub.f32 %v10137_v9, %v5707_v28  ;;  %v5777_v63 = vsel %vm810_vm1, %v10207_v7, 0.0 }
 0x878   :  { %v5731_v41 = vsub.f32 %v10129_v27, %v5701_v11  ;;  %v10211_v14 = vpop.eup %7909  ;;  %7921 = vpow2.f32 %v5757_v39 }
 0x879   :  { %v5759_v45 = vmul.f32 1.442695, %v5733_v42  ;;  %v5771_v24 = vsel %vm810_vm1, %v10211_v14, 0.0  ;;  %v8029_v42 = vld [vmem:[%s10588_s2 + $0x60] sm:$0xff] }
 0x87a   :  { %v5755_v18 = vmul.f32 1.442695, %v5731_v41  ;;  %v5722_v0 = vpop.xlane.xlu1 %5721  ;;  %5778 = vadd.xlane.f32.xlu1 %v5777_v63  ;;  %5772 = vadd.xlane.f32.xlu0 %v5771_v24  ;;  %v10758_v24 = vld [vmem:[#allocation48_spill] sm:$0xff] }
 0x87b   :  { %v5716_v30 = vpop.xlane.xlu0 %5715  ;;  %7923 = vpow2.f32 %v5759_v45  ;;  %v5738_v9 = vsub.f32 %v10149_v4, %v5722_v0  ;;  %v10757_v45 = vld [vmem:[#allocation40_spill] sm:$0xff] }
 0x87c   :  { %v5736_v27 = vsub.f32 %v10142_v15, %v5716_v30  ;;  %v10219_v3 = vpop.eup %7911  ;;  %7925 = vpow2.f32 %v5755_v18  ;;  %v10759_v30 = vld [vmem:[#allocation42_spill] sm:$0xff] }
 0x87d   :  { %v10221_v52 = vpop.eup %7913  ;;  %v5769_v37 = vmul.f32 1.442695, %v5738_v9  ;;  %v5792_v43 = vsel %vm810_vm1, %v10219_v3, 0.0  ;;  %v10760_v9 = vld [vmem:[#allocation50_spill] sm:$0xff] }
 0x87e   :  { %v5765_v44 = vmul.f32 1.442695, %v5736_v27  ;;  %5793 = vadd.xlane.f32.xlu1 %v5792_v43  ;;  %v5786_v31 = vsel %vm810_vm1, %v10221_v52, 0.0  ;;  %v10268_v41 = vpop.permute.xlu1 %6286  ;;  %v10761_v27 = vld [vmem:[#allocation44_spill] sm:$0xff]  ;;  %v10763_v43 = vld [vmem:[#allocation46_spill] sm:$0xff] }
 0x87f   :  { %v5713_v6 = vpop.xlane.xlu0 %5712  ;;  %7927 = vpow2.f32 %v5769_v37  ;;  %5787 = vadd.xlane.f32.xlu0 %v5786_v31  ;;  %v10764_v31 = vld [vmem:[#allocation54_spill] sm:$0xff] }
 0x880   :  { %v5735_v4 = vsub.f32 %v10152_v48, %v5713_v6  ;;  %v10228_v15 = vpop.eup %7915  ;;  %7929 = vpow2.f32 %v5765_v44  ;;  %v10762_v44 = vld [vmem:[#allocation52_spill] sm:$0xff] }
 0x881   :  { %v10230_v35 = vpop.eup %7917  ;;  %v5789_v38 = vsel %vm810_vm1, %v10228_v15, 0.0  ;;  %v8030_v6 = vld [vmem:[%s10588_s2 + $0x70] sm:$0xff]  ;;  %s8036_s2 = smov 24  }
 0x882   :  { %v5763_v1 = vmul.f32 1.442695, %v5735_v4  ;;  %5790 = vadd.xlane.f32.xlu1 %v5789_v38  ;;  %v5783_v58 = vsel %vm810_vm1, %v10230_v35, 0.0  ;;  %v10765_v4 = vld [vmem:[#allocation39_spill] sm:$0xff] }
 0x883   :  { %5784 = vadd.xlane.f32.xlu0 %v5783_v58  ;;  %v10325_v38 = vpop.permute.xlu0 %6199 }
 0x884   :  { %7931 = vpow2.f32 %v5763_v1  ;;  %v10236_v53 = vpop.eup %7919  ;;  %v10771_v1 = vld [vmem:[#allocation45_spill] sm:$0xff] }
 0x885   :  { %v10238_v54 = vpop.eup %7921  ;;  %v5804_v48 = vsel %vm810_vm1, %v10236_v53, 0.0 }
 0x886   :  { %5805 = vadd.xlane.f32.xlu1 %v5804_v48  ;;  %v5798_v57 = vsel %vm810_vm1, %v10238_v54, 0.0 }
 0x887   :  { %5799 = vadd.xlane.f32.xlu0 %v5798_v57 }
 0x888   :  { %v10244_v13 = vpop.eup %7923 }
 0x889   :  { %v10246_v50 = vpop.eup %7925  ;;  %v5801_v60 = vsel %vm810_vm1, %v10244_v13, 0.0 }
 0x88a   :  { %5802 = vadd.xlane.f32.xlu1 %v5801_v60  ;;  %v5795_v12 = vsel %vm810_vm1, %v10246_v50, 0.0 }
 0x88b   :  { %5796 = vadd.xlane.f32.xlu0 %v5795_v12 }
 0x88c   :  { %v10252_v22 = vpop.eup %7927 }
 0x88d   :  { %v10254_v56 = vpop.eup %7929  ;;  %v5816_v39 = vsel %vm810_vm1, %v10252_v22, 0.0 }
 0x88e   :  { %5817 = vadd.xlane.f32.xlu1 %v5816_v39  ;;  %v5810_v25 = vsel %vm810_vm1, %v10254_v56, 0.0 }
 0x88f   :  { %5811 = vadd.xlane.f32.xlu0 %v5810_v25 }
 0x891   :  { %v10260_v28 = vpop.eup %7931 }
 0x892   :  { %v5807_v11 = vsel %vm810_vm1, %v10260_v28, 0.0 }
 0x893   :  { %5808 = vadd.xlane.f32.xlu0 %v5807_v11 }
 0x8a9   :  { %6373 = vrot.lane.b32.xlu0 %v8029_v42, %s8033_s28 }
 0x8ad   :  { %6563 = vrot.lane.b32.xlu0 %v10757_v45, %s8034_s15 }
 0x8af   :  { %v5719_v18 = vpop.xlane.xlu1 %5718 }
 0x8b0   :  { %v5737_v63 = vsub.f32 %v10173_v2, %v5719_v18 }
 0x8b1   :  { %6567 = vrot.lane.b32.xlu0 %v10758_v24, %s8034_s15 }
 0x8b2   :  { %v5767_v0 = vmul.f32 1.442695, %v5737_v63 }
 0x8b3   :  { %v10333_v58 = vpop.permute.xlu1 %6462 }
 0x8b4   :  { %7933 = vpow2.f32 %v5767_v0 }
 0x8b5   :  { %6571 = vrot.lane.b32.xlu0 %v10759_v30, %s8034_s15 }
 0x8b9   :  { %6575 = vrot.lane.b32.xlu0 %v10760_v9, %s8034_s15 }
 0x8bd   :  { %6579 = vrot.lane.b32.xlu0 %v10761_v27, %s8034_s15 }
 0x8c1   :  { %v10281_v37 = vpop.eup %7933  ;;  %6583 = vrot.lane.b32.xlu0 %v10762_v44, %s8034_s15 }
 0x8c2   :  { %v5813_v2 = vsel %vm810_vm1, %v10281_v37, 0.0 }
 0x8c3   :  { %5814 = vadd.xlane.f32.xlu1 %v5813_v2 }
 0x8c5   :  { %6587 = vrot.lane.b32.xlu0 %v10763_v43, %s8034_s15 }
 0x8c9   :  { %6591 = vrot.lane.b32.xlu0 %v10764_v31, %s8034_s15 }
 0x8cd   :  { %6627 = vrot.lane.b32.xlu0 %v10049_v17, %s8035_s16  ;;  %v10766_v17 = vld [vmem:[#allocation47_spill] sm:$0xff] }
 0x8d1   :  { %6631 = vrot.lane.b32.xlu0 %v10076_v59, %s8035_s16  ;;  %v10767_v59 = vld [vmem:[#allocation41_spill] sm:$0xff] }
 0x8d4   :  { %6460 = vrot.lane.b32.xlu1 %v8030_v6, %s8033_s28 }
 0x8d5   :  { %6635 = vrot.lane.b32.xlu0 %v10059_v40, %s8035_s16  ;;  %v10768_v40 = vld [vmem:[#allocation49_spill] sm:$0xff] }
 0x8d8   :  { %6565 = vrot.lane.b32.xlu1 %v10765_v4, %s8034_s15 }
 0x8d9   :  { %6639 = vrot.lane.b32.xlu0 %v10080_v47, %s8035_s16  ;;  %v10769_v47 = vld [vmem:[#allocation43_spill] sm:$0xff] }
 0x8dc   :  { %6569 = vrot.lane.b32.xlu1 %v10766_v17, %s8034_s15 }
 0x8dd   :  { %6643 = vrot.lane.b32.xlu0 %v10063_v19, %s8035_s16  ;;  %v10770_v19 = vld [vmem:[#allocation51_spill] sm:$0xff] }
 0x8e0   :  { %6573 = vrot.lane.b32.xlu1 %v10767_v59, %s8034_s15 }
 0x8e1   :  { %6647 = vrot.lane.b32.xlu0 %v10084_v10, %s8035_s16  ;;  %v10772_v10 = vld [vmem:[#allocation53_spill] sm:$0xff] }
 0x8e4   :  { %6577 = vrot.lane.b32.xlu1 %v10768_v40, %s8034_s15 }
 0x8e5   :  { %6651 = vrot.lane.b32.xlu0 %v10067_v8, %s8035_s16  ;;  %v10331_v8 = vpop.permute.xlu0 %6375 }
 0x8e8   :  { %6581 = vrot.lane.b32.xlu1 %v10769_v47, %s8034_s15 }
 0x8e9   :  { %6655 = vrot.lane.b32.xlu0 %v10088_v61, %s8035_s16  ;;  %v5776_v61 = vpop.xlane.xlu0 %5775 }
 0x8ea   :  { %7935 = vrcp.f32 %v5776_v61 }
 0x8ec   :  { %6585 = vrot.lane.b32.xlu1 %v10770_v19, %s8034_s15 }
 0x8f0   :  { %6589 = vrot.lane.b32.xlu1 %v10771_v1, %s8034_s15 }
 0x8f4   :  { %6593 = vrot.lane.b32.xlu1 %v10772_v10, %s8034_s15 }
 0x8f8   :  { %6629 = vrot.lane.b32.xlu1 %v10047_v29, %s8035_s16 }
 0x8fc   :  { %6633 = vrot.lane.b32.xlu1 %v10074_v36, %s8035_s16 }
 0x8ff   :  { %v5782_v48 = vpop.xlane.xlu1 %5781 }
 0x900   :  { %6637 = vrot.lane.b32.xlu1 %v10054_v51, %s8035_s16  ;;  %7937 = vrcp.f32 %v5782_v48  ;;  %v7936_v51 = vpop.eup %7935 }
 0x903   :  { %v5779_v57 = vpop.xlane.xlu1 %5778  ;;  %v5773_v60 = vpop.xlane.xlu0 %5772 }
 0x904   :  { %7939 = vrcp.f32 %v5779_v57  ;;  %6641 = vrot.lane.b32.xlu1 %v10078_v20, %s8035_s16 }
 0x905   :  { %7941 = vrcp.f32 %v5773_v60 }
 0x907   :  { %v5794_v29 = vpop.xlane.xlu1 %5793 }
 0x908   :  { %v5788_v12 = vpop.xlane.xlu0 %5787  ;;  %6645 = vrot.lane.b32.xlu1 %v10061_v55, %s8035_s16  ;;  %7943 = vrcp.f32 %v5794_v29 }
 0x909   :  { %7945 = vrcp.f32 %v5788_v12 }
 0x90b   :  { %v5791_v36 = vpop.xlane.xlu1 %5790 }
 0x90c   :  { %7947 = vrcp.f32 %v5791_v36  ;;  %v5785_v39 = vpop.xlane.xlu0 %5784  ;;  %6649 = vrot.lane.b32.xlu1 %v10082_v16, %s8035_s16 }
 0x90d   :  { %7949 = vrcp.f32 %v5785_v39  ;;  %v7938_v11 = vpop.eup %7937 }
 0x90e   :  { %v5838_v24 = vmul.f32 %v7938_v11, %v10203_v34 }
 0x90f   :  { %v5806_v25 = vpop.xlane.xlu1 %5805 }
 0x910   :  { %v5800_v42 = vpop.xlane.xlu0 %5799  ;;  %6653 = vrot.lane.b32.xlu1 %v10065_v21, %s8035_s16  ;;  %7951 = vrcp.f32 %v5806_v25  ;;  %v5836_v21 = vmul.f32 %v7936_v51, %v10186_v62 }
 0x911   :  { %v7940_v20 = vpop.eup %7939  ;;  %7953 = vrcp.f32 %v5800_v42 }
 0x912   :  { %v7942_v45 = vpop.eup %7941  ;;  %v5837_v55 = vmul.f32 %v7940_v20, %v10207_v7 }
 0x913   :  { %v5803_v18 = vpop.xlane.xlu1 %5802  ;;  %v5835_v63 = vmul.f32 %v7942_v45, %v10211_v14 }
 0x914   :  { %7955 = vrcp.f32 %v5803_v18  ;;  %v5797_v16 = vpop.xlane.xlu0 %5796  ;;  %6657 = vrot.lane.b32.xlu1 %v10086_v23, %s8035_s16  ;;  %7660 = vmatprep.mubr.msk.f32.mxu1 %vm810_vm1, %v5837_v55 }
 0x915   :  { %7957 = vrcp.f32 %v5797_v16  ;;  %7653 = vmatprep.mubr.msk.f32.mxu0 %vm810_vm1, %v5835_v63  ;;  %7661 = vmatmul.mubr.msk.f32.vlgmr.msra.gmra.mxu1 %vm810_vm1, %v5838_v24  ;;  %v7944_v7 = vpop.eup %7943 }
 0x916   :  { %7654 = vmatmul.mubr.msk.f32.vlgmr.msra.gmra.mxu0 %vm810_vm1, %v5836_v21  ;;  %7671 = vmatpush3.msra.mxu1 %v10056_v46  ;;  %v7946_v34 = vpop.eup %7945  ;;  %v5842_v0 = vmul.f32 %v7944_v7, %v10219_v3 }
 0x917   :  { %7664 = vmatpush3.msra.mxu0 %v10051_v33  ;;  %7672 = vmatprep.subr.mxu1 %v10190_v26 }
 0x918   :  { %7665 = vmatprep.subr.mxu0 %v10175_v32  ;;  %7673 = vmatpush3.msra.mxu1 %v10190_v26  ;;  %v5812_v23 = vpop.xlane.xlu0 %5811  ;;  %v5840_v26 = vmul.f32 %v7946_v34, %v10221_v52 }
 0x919   :  { %v7948_v62 = vpop.eup %7947  ;;  %7666 = vmatpush3.msra.mxu0 %v10175_v32  ;;  %7684 = vmatprep.subr.mxu1 %v10192_v49  ;;  %7959 = vrcp.f32 %v5812_v23 }
 0x91a   :  { %v7950_v14 = vpop.eup %7949  ;;  %7677 = vmatprep.subr.mxu0 %v10179_v5  ;;  %v5841_v46 = vmul.f32 %v7948_v62, %v10228_v15 }
 0x91b   :  { %v5839_v33 = vmul.f32 %v7950_v14, %v10230_v35 }
 0x91c   :  { %v5809_v30 = vpop.xlane.xlu0 %5808  ;;  %7674 = vmatprep.mubr.msk.f32.mxu1 %vm810_vm1, %v5841_v46 }
 0x91d   :  { %7961 = vrcp.f32 %v5809_v30  ;;  %7667 = vmatprep.mubr.msk.f32.mxu0 %vm810_vm1, %v5839_v33  ;;  %7675 = vmatmul.mubr.msk.f32.vlgmr.msra.gmra.mxu1 %vm810_vm1, %v5842_v0  ;;  %v7952_v32 = vpop.eup %7951 }
 0x91e   :  { %7668 = vmatmul.mubr.msk.f32.vlgmr.msra.gmra.mxu0 %vm810_vm1, %v5840_v26  ;;  %7685 = vmatpush3.msra.mxu1 %v10192_v49  ;;  %v7954_v3 = vpop.eup %7953 }
 0x91f   :  { %7678 = vmatpush3.msra.mxu0 %v10179_v5  ;;  %7686 = vmatprep.subr.mxu1 %v10268_v41  ;;  %v5846_v5 = vmul.f32 %v7952_v32, %v10236_v53  ;;  %v5844_v9 = vmul.f32 %v7954_v3, %v10238_v54  ;;  %v5818_v54 = vpop.xlane.xlu1 %5817 }
 0x920   :  { %7679 = vmatprep.subr.mxu0 %v10325_v38  ;;  %7687 = vmatpush3.msra.mxu1 %v10268_v41  ;;  %v6374_v41 = vpop.permute.xlu0 %6373  ;;  %7963 = vrcp.f32 %v5818_v54  ;;  %v10775_v54 = vld [vmem:[#allocation2_spill] sm:$0xff] }
 0x921   :  { %v7956_v52 = vpop.eup %7955  ;;  %7680 = vmatpush3.msra.mxu0 %v10325_v38  ;;  %7698 = vmatprep.subr.mxu1 %v10333_v58 }
 0x922   :  { %v7958_v15 = vpop.eup %7957  ;;  %7691 = vmatprep.subr.mxu0 %v10331_v8  ;;  %v5845_v49 = vmul.f32 %v7956_v52, %v10244_v13 }
 0x923   :  { %v5843_v35 = vmul.f32 %v7958_v15, %v10246_v50 }
 0x924   :  { %7688 = vmatprep.mubr.msk.f32.mxu1 %vm810_vm1, %v5845_v49  ;;  %v10773_v49 = vld [vmem:[#allocation18_spill] sm:$0xff] }
 0x925   :  { %7681 = vmatprep.mubr.msk.f32.mxu0 %vm810_vm1, %v5843_v35  ;;  %7689 = vmatmul.mubr.msk.f32.vlgmr.msra.gmra.mxu1 %vm810_vm1, %v5846_v5 }
 0x926   :  { %7682 = vmatmul.mubr.msk.f32.vlgmr.msra.gmra.mxu0 %vm810_vm1, %v5844_v9  ;;  %7699 = vmatpush3.msra.mxu1 %v10333_v58  ;;  %v7960_v13 = vpop.eup %7959  ;;  %v6564_v58 = vpop.permute.xlu0 %6563 }
 0x927   :  { %7692 = vmatpush3.msra.mxu0 %v10331_v8  ;;  %v5848_v27 = vmul.f32 %v7960_v13, %v10254_v56 }
 0x928   :  { %7693 = vmatprep.subr.mxu0 %v6374_v41 }
 0x929   :  { %7694 = vmatpush3.msra.mxu0 %v6374_v41  ;;  %v10774_v41 = vld [vmem:[#allocation19_spill] sm:$0xff] }
 0x92a   :  { %v7962_v50 = vpop.eup %7961  ;;  %v6568_v60 = vpop.permute.xlu0 %6567  ;;  %v6739_v13 = vsel %vm81_vm0, %v10774_v41, %v6564_v58  ;;  %v10779_v58 = vld [vmem:[#allocation27_spill] sm:$0xff] }
 0x92b   :  { %v5847_v53 = vmul.f32 %v7962_v50, %v10260_v28 }
 0x92d   :  { %7695 = vmatprep.mubr.msk.f32.mxu0 %vm810_vm1, %v5847_v53  ;;  %v7964_v43 = vpop.eup %7963 }
 0x92e   :  { %7696 = vmatmul.mubr.msk.f32.vlgmr.msra.gmra.mxu0 %vm810_vm1, %v5848_v27  ;;  %v5850_v4 = vmul.f32 %v7964_v43, %v10252_v22  ;;  %v6572_v12 = vpop.permute.xlu0 %6571 }
 0x932   :  { %v10413_v39 = vpop.permute.xlu0 %6575 }
 0x936   :  { %v10417_v25 = vpop.permute.xlu0 %6579 }
 0x93a   :  { %v10421_v42 = vpop.permute.xlu0 %6583 }
 0x93e   :  { %v10425_v45 = vpop.permute.xlu0 %6587 }
 0x942   :  { %v10429_v18 = vpop.permute.xlu0 %6591 }
 0x946   :  { %v6628_v24 = vpop.permute.xlu0 %6627 }
 0x947   :  { %v6755_v53 = vsel %vm810_vm1, %v6739_v13, %v6628_v24 }
 0x94a   :  { %v6632_v34 = vpop.permute.xlu0 %6631 }
 0x94c   :  { %v5815_v44 = vpop.xlane.xlu1 %5814 }
 0x94d   :  { %7965 = vrcp.f32 %v5815_v44 }
 0x94e   :  { %v6636_v62 = vpop.permute.xlu0 %6635 }
 0x950   :  { %v6461_v2 = vpop.permute.xlu1 %6460 }
 0x951   :  { %7700 = vmatprep.subr.mxu1 %v6461_v2 }
 0x952   :  { %7701 = vmatpush3.msra.mxu1 %v6461_v2  ;;  %v6640_v46 = vpop.permute.xlu0 %6639 }
 0x954   :  { %v6566_v10 = vpop.permute.xlu1 %6565 }
 0x955   :  { %v6740_v35 = vsel %vm81_vm0, %v10773_v49, %v6566_v10 }
 0x956   :  { %v6644_v0 = vpop.permute.xlu0 %6643 }
 0x958   :  { %v6570_v57 = vpop.permute.xlu1 %6569 }
 0x959   :  { %v6742_v44 = vsel %vm81_vm0, %v10775_v54, %v6570_v57 }
 0x95a   :  { %v7966_v31 = vpop.eup %7965  ;;  %v10433_v26 = vpop.permute.xlu0 %6647 }
 0x95b   :  { %v5849_v6 = vmul.f32 %v7966_v31, %v10281_v37 }
 0x95c   :  { %v6574_v29 = vpop.permute.xlu1 %6573 }
 0x95d   :  { %7702 = vmatprep.mubr.msk.f32.mxu1 %vm810_vm1, %v5849_v6  ;;  %v10776_v6 = vld [vmem:[#allocation26_spill] sm:$0xff] }
 0x95e   :  { %7703 = vmatmul.mubr.msk.f32.vlgmr.msra.gmra.mxu1 %vm810_vm1, %v5850_v4  ;;  %v10437_v3 = vpop.permute.xlu0 %6651  ;;  %v6741_v4 = vsel %vm81_vm0, %v10776_v6, %v6568_v60  ;;  %v10788_v6 = vld [vmem:[#allocation32_spill] sm:$0xff] }
 0x960   :  { %v6578_v36 = vpop.permute.xlu1 %6577 }
 0x962   :  { %v10441_v15 = vpop.permute.xlu0 %6655 }
 0x964   :  { %v10415_v51 = vpop.permute.xlu1 %6581 }
 0x968   :  { %v10419_v11 = vpop.permute.xlu1 %6585 }
 0x96c   :  { %v10423_v20 = vpop.permute.xlu1 %6589 }
 0x970   :  { %v10427_v55 = vpop.permute.xlu1 %6593 }
 0x974   :  { %v6630_v63 = vpop.permute.xlu1 %6629 }
 0x975   :  { %v6756_v5 = vsel %vm810_vm1, %v6740_v35, %v6630_v63 }
 0x978   :  { %v6634_v7 = vpop.permute.xlu1 %6633 }
 0x979   :  { %v6758_v43 = vsel %vm810_vm1, %v6742_v44, %v6634_v7 }
 0x97c   :  { %v6638_v23 = vpop.permute.xlu1 %6637 }
 0x980   :  { %v6642_v14 = vpop.permute.xlu1 %6641 }
 0x984   :  { %v6646_v33 = vpop.permute.xlu1 %6645 }
 0x988   :  { %v6650_v30 = vpop.permute.xlu1 %6649 }
 0x98c   :  { %v10435_v32 = vpop.permute.xlu1 %6653 }
 0x990   :  { %v10439_v52 = vpop.permute.xlu1 %6657 }
 0x9d5   :  { %v7662_v28 = vpop.f32.mrf.mxu1 }
 0x9d6   :  { %v7655_v56 = vpop.f32.mrf.mxu0 }
 0x9d7   :  { %6693 = vrot.lane.b32.xlu1 %v7655_v56, %s8036_s2  ;;  %v6016_v59 = vpop.f32.mrf.mxu1 }
 0x9d8   :  { %v5929_v17 = vpop.f32.mrf.mxu0 }
 0x9d9   :  { %6691 = vrot.lane.b32.xlu0 %v5929_v17, %s8036_s2 }
 0x9db   :  { %6697 = vrot.lane.b32.xlu1 %v7662_v28, %s8036_s2  ;;  %v6757_v28 = vsel %vm810_vm1, %v6741_v4, %v6632_v34  ;;  %v6753_v4 = vsel %vm81_vm0, %v10788_v6, %v10429_v18 }
 0x9dd   :  { %6695 = vrot.lane.b32.xlu0 %v6016_v59, %s8036_s2  ;;  %v7676_v22 = vpop.f32.mrf.mxu1  ;;  %v10777_v59 = vld [vmem:[#allocation20_spill] sm:$0xff] }
 0x9de   :  { %v7669_v37 = vpop.f32.mrf.mxu0 }
 0x9df   :  { %6701 = vrot.lane.b32.xlu1 %v7669_v37, %s8036_s2  ;;  %v6190_v47 = vpop.f32.mrf.mxu1  ;;  %v6744_v37 = vsel %vm81_vm0, %v10777_v59, %v6574_v29  ;;  %v10780_v29 = vld [vmem:[#allocation28_spill] sm:$0xff] }
 0x9e0   :  { %v6103_v40 = vpop.f32.mrf.mxu0 }
 0x9e1   :  { %6699 = vrot.lane.b32.xlu0 %v6103_v40, %s8036_s2  ;;  %v6760_v40 = vsel %vm810_vm1, %v6744_v37, %v6638_v23  ;;  %v10782_v23 = vld [vmem:[#allocation23_spill] sm:$0xff] }
 0x9e3   :  { %6705 = vrot.lane.b32.xlu1 %v7676_v22, %s8036_s2 }
 0x9e5   :  { %6703 = vrot.lane.b32.xlu0 %v6190_v47, %s8036_s2  ;;  %v7690_v1 = vpop.f32.mrf.mxu1 }
 0x9e6   :  { %v7683_v19 = vpop.f32.mrf.mxu0 }
 0x9e7   :  { %6709 = vrot.lane.b32.xlu1 %v7683_v19, %s8036_s2  ;;  %v6364_v8 = vpop.f32.mrf.mxu1  ;;  %v10778_v19 = vld [vmem:[#allocation21_spill] sm:$0xff] }
 0x9e8   :  { %v6277_v38 = vpop.f32.mrf.mxu0 }
 0x9e9   :  { %6707 = vrot.lane.b32.xlu0 %v6277_v38, %s8036_s2 }
 0x9eb   :  { %6713 = vrot.lane.b32.xlu1 %v7690_v1, %s8036_s2  ;;  %v6743_v1 = vsel %vm81_vm0, %v10778_v19, %v6572_v12  ;;  %v6745_v12 = vsel %vm81_vm0, %v10780_v29, %v10413_v39 }
 0x9ec   :  { %v6759_v10 = vsel %vm810_vm1, %v6743_v1, %v6636_v62  ;;  %v6761_v24 = vsel %vm810_vm1, %v6745_v12, %v6640_v46  ;;  %v6747_v62 = vsel %vm81_vm0, %v10782_v23, %v10417_v25 }
 0x9ed   :  { %6711 = vrot.lane.b32.xlu0 %v6364_v8, %s8036_s2  ;;  %v6763_v46 = vsel %vm810_vm1, %v6747_v62, %v6644_v0  ;;  %v10784_v0 = vld [vmem:[#allocation30_spill] sm:$0xff] }
 0x9ee   :  { %v7697_v61 = vpop.f32.mrf.mxu0 }
 0x9ef   :  { %6717 = vrot.lane.b32.xlu1 %v7697_v61, %s8036_s2  ;;  %v6746_v61 = vsel %vm81_vm0, %v10779_v58, %v6578_v36 }
 0x9f0   :  { %v6451_v48 = vpop.f32.mrf.mxu0  ;;  %v6762_v57 = vsel %vm810_vm1, %v6746_v61, %v6642_v14 }
 0x9f1   :  { %6715 = vrot.lane.b32.xlu0 %v6451_v48, %s8036_s2 }
 0xa1e   :  { %v7704_v16 = vpop.f32.mrf.mxu1 }
 0xa1f   :  { %6721 = vrot.lane.b32.xlu1 %v7704_v16, %s8036_s2  ;;  %v10781_v16 = vld [vmem:[#allocation22_spill] sm:$0xff] }
 0xa20   :  { %v6538_v21 = vpop.f32.mrf.mxu1 }
 0xa21   :  { %6719 = vrot.lane.b32.xlu0 %v6538_v21, %s8036_s2  ;;  %v6748_v21 = vsel %vm81_vm0, %v10781_v16, %v10415_v51 }
 0xa22   :  { %v6764_v34 = vsel %vm810_vm1, %v6748_v21, %v6646_v33  ;;  %v10783_v33 = vld [vmem:[#allocation29_spill] sm:$0xff] }
 0xa23   :  { %v6750_v49 = vsel %vm81_vm0, %v10783_v33, %v10419_v11 }
 0xa49   :  { %v6694_v9 = vpop.permute.xlu1 %6693 }
 0xa4a   :  { %v6773_v50 = vsel %vm6771_vm2, %v6756_v5, %v6694_v9  ;;  %v6766_v5 = vsel %vm810_vm1, %v6750_v49, %v6650_v30  ;;  %v6749_v9 = vsel %vm81_vm0, %v10784_v0, %v10421_v42  ;;  %v10785_v30 = vld [vmem:[#allocation24_spill] sm:$0xff] }
 0xa4b   :  { %6790 = vst.msk [vmem:[%s10589_s4 + $0x8] sm:$0xff] %vm6788_vm3, %v6773_v50  ;;  %v6692_v27 = vpop.permute.xlu0 %6691  ;;  %v6765_v13 = vsel %vm810_vm1, %v6749_v9, %v10433_v26  ;;  %v6752_v50 = vsel %vm81_vm0, %v10785_v30, %v10423_v20 }
 0xa4c   :  { %v6772_v2 = vsel %vm6771_vm2, %v6755_v53, %v6692_v27  ;;  %v6768_v42 = vsel %vm810_vm1, %v6752_v50, %v10435_v32  ;;  %v10786_v27 = vld [vmem:[#allocation25_spill] sm:$0xff] }
 0xa4d   :  { %6789 = vst.msk [vmem:[%s10589_s4] sm:$0xff] %vm6788_vm3, %v6772_v2  ;;  %v6698_v31 = vpop.permute.xlu1 %6697  ;;  %v6751_v54 = vsel %vm81_vm0, %v10786_v27, %v10425_v45  ;;  %v10787_v45 = vld [vmem:[#allocation31_spill] sm:$0xff] }
 0xa4e   :  { %v6775_v56 = vsel %vm6771_vm2, %v6758_v43, %v6698_v31  ;;  %v6767_v20 = vsel %vm810_vm1, %v6751_v54, %v10437_v3  ;;  %v6754_v43 = vsel %vm81_vm0, %v10787_v45, %v10427_v55 }
 0xa4f   :  { %6792 = vst.msk [vmem:[%s10589_s4 + $0x18] sm:$0xff] %vm6788_vm3, %v6775_v56  ;;  %v6696_v17 = vpop.permute.xlu0 %6695  ;;  %v6770_v3 = vsel %vm810_vm1, %v6754_v43, %v10439_v52 }
 0xa50   :  { %v6774_v22 = vsel %vm6771_vm2, %v6757_v28, %v6696_v17  ;;  %v6769_v28 = vsel %vm810_vm1, %v6753_v4, %v10441_v15 }
 0xa51   :  { %6791 = vst.msk [vmem:[%s10589_s4 + $0x10] sm:$0xff] %vm6788_vm3, %v6774_v22  ;;  %v6702_v47 = vpop.permute.xlu1 %6701 }
 0xa52   :  { %v6777_v38 = vsel %vm6771_vm2, %v6760_v40, %v6702_v47 }
 0xa53   :  { %6794 = vst.msk [vmem:[%s10589_s4 + $0x28] sm:$0xff] %vm6788_vm3, %v6777_v38  ;;  %v6700_v8 = vpop.permute.xlu0 %6699 }
 0xa54   :  { %v6776_v48 = vsel %vm6771_vm2, %v6759_v10, %v6700_v8 }
 0xa55   :  { %6793 = vst.msk [vmem:[%s10589_s4 + $0x20] sm:$0xff] %vm6788_vm3, %v6776_v48  ;;  %v6706_v60 = vpop.permute.xlu1 %6705 }
 0xa56   :  { %v6779_v63 = vsel %vm6771_vm2, %v6762_v57, %v6706_v60 }
 0xa57   :  { %6796 = vst.msk [vmem:[%s10589_s4 + $0x38] sm:$0xff] %vm6788_vm3, %v6779_v63  ;;  %v6704_v36 = vpop.permute.xlu0 %6703 }
 0xa58   :  { %v6778_v7 = vsel %vm6771_vm2, %v6761_v24, %v6704_v36 }
 0xa59   :  { %6795 = vst.msk [vmem:[%s10589_s4 + $0x30] sm:$0xff] %vm6788_vm3, %v6778_v7  ;;  %v6710_v39 = vpop.permute.xlu1 %6709 }
 0xa5a   :  { %v6781_v14 = vsel %vm6771_vm2, %v6764_v34, %v6710_v39 }
 0xa5b   :  { %6798 = vst.msk [vmem:[%s10589_s4 + $0x48] sm:$0xff] %vm6788_vm3, %v6781_v14  ;;  %v6708_v51 = vpop.permute.xlu0 %6707 }
 0xa5c   :  { %v6780_v35 = vsel %vm6771_vm2, %v6763_v46, %v6708_v51 }
 0xa5d   :  { %6797 = vst.msk [vmem:[%s10589_s4 + $0x40] sm:$0xff] %vm6788_vm3, %v6780_v35  ;;  %v6714_v25 = vpop.permute.xlu1 %6713 }
 0xa5e   :  { %v6783_v41 = vsel %vm6771_vm2, %v6766_v5, %v6714_v25 }
 0xa5f   :  { %6800 = vst.msk [vmem:[%s10589_s4 + $0x58] sm:$0xff] %vm6788_vm3, %v6783_v41  ;;  %v6712_v11 = vpop.permute.xlu0 %6711 }
 0xa60   :  { %v6782_v53 = vsel %vm6771_vm2, %v6765_v13, %v6712_v11 }
 0xa61   :  { %6799 = vst.msk [vmem:[%s10589_s4 + $0x50] sm:$0xff] %vm6788_vm3, %v6782_v53  ;;  %v6718_v26 = vpop.permute.xlu1 %6717 }
 0xa62   :  { %v6785_v44 = vsel %vm6771_vm2, %v6768_v42, %v6718_v26 }
 0xa63   :  { %6802 = vst.msk [vmem:[%s10589_s4 + $0x68] sm:$0xff] %vm6788_vm3, %v6785_v44  ;;  %v6716_v32 = vpop.permute.xlu0 %6715 }
 0xa64   :  { %v6784_v2 = vsel %vm6771_vm2, %v6767_v20, %v6716_v32 }
 0xa65   :  { %6801 = vst.msk [vmem:[%s10589_s4 + $0x60] sm:$0xff] %vm6788_vm3, %v6784_v2 }
 0xa91   :  { %v6722_v31 = vpop.permute.xlu1 %6721 }
 0xa92   :  { %v6787_v56 = vsel %vm6771_vm2, %v6770_v3, %v6722_v31 }
 0xa93   :  { %6804 = vst.msk [vmem:[%s10589_s4 + $0x78] sm:$0xff] %vm6788_vm3, %v6787_v56  ;;  %v6720_v17 = vpop.permute.xlu0 %6719 }
 0xa94   :  { %v6786_v55 = vsel %vm6771_vm2, %v6769_v28, %v6720_v17 }
 0xa95   :  { %6803 = vst.msk [vmem:[%s10589_s4 + $0x70] sm:$0xff] %vm6788_vm3, %v6786_v55 }

</bundles_post_ra>
